<compile_context>
chip_gen: v6e
topology: v6e:2x2x1
jax: 0.10.0
libtpu: 0.0.40
codegen_flags: <defaults>
</compile_context>

<pallas_src>
import functools

import jax
import jax.numpy as jnp
from jax import lax
from jax.experimental import pallas as pl
from jax.experimental.pallas import tpu as pltpu

LN_EPS = 1e-5                    # PyTorch nn.LayerNorm default
NEG_BIAS = -1e9                  # masked-score value (robust vs. -inf + exp)


def _pick_vmem_limit():
    """Per-generation scoped-VMEM limit (~3/4 of physical VMEM), with fallback."""
    try:
        info = pltpu.get_tpu_info()
        cap = getattr(info, "vmem_capacity_bytes", None)
        if cap:
            return int(min(cap * 3 // 4, 112 * 1024 * 1024))
    except Exception:
        pass
    return 48 * 1024 * 1024      # conservative default (fits v7x's 64 MiB)


VMEM_LIMIT = _pick_vmem_limit()


def _probe_kernel(x_ref, o_ref):
    o_ref[...] = x_ref[...]


@functools.lru_cache(maxsize=None)
def _buffered_weights_supported():
    """Probe whether pipeline_mode=pl.Buffered(1) is accepted by this JAX/Mosaic."""
    try:
        x = jnp.zeros((8, 128), jnp.float32)
        out = pl.pallas_call(
            _probe_kernel,
            out_shape=jax.ShapeDtypeStruct((8, 128), jnp.float32),
            grid=(2,),
            in_specs=[pl.BlockSpec((8, 128), lambda i: (0, 0),
                                   pipeline_mode=pl.Buffered(1))],
            out_specs=pl.BlockSpec((8, 128), lambda i: (0, 0)),
        )(x)
        jax.block_until_ready(out)
        return True
    except Exception:
        return False


def _weight_spec(shape):
    """BlockSpec for an input whose index_map is constant across the (1-D) grid.

    Such inputs only need a single VMEM buffer; the default pipeliner would
    double-buffer them (wasting ~the whole weight footprint again).
    """
    ndim = len(shape)
    index_map = lambda b: (0,) * ndim
    if _buffered_weights_supported():
        return pl.BlockSpec(shape, index_map, pipeline_mode=pl.Buffered(1))
    return pl.BlockSpec(shape, index_map)


def _layernorm(h, w, b):
    mu = jnp.mean(h, axis=-1, keepdims=True)
    var = jnp.mean(jnp.square(h - mu), axis=-1, keepdims=True)
    return (h - mu) * lax.rsqrt(var + LN_EPS) * w + b


def block_kernel(n_heads, cond_len,
                 x_ref, ln1w_ref, ln1b_ref, tmix_ref,
                 wq_ref, bq_ref, wk_ref, bk_ref, wv_ref, bv_ref,
                 wp_ref, bp_ref,
                 ln2w_ref, ln2b_ref, w0_ref, b0_ref, w1_ref, b1_ref,
                 out_ref):
    """One transformer Block (PreNorm attention + PreNorm FFN, both residual)."""
    x = x_ref[0]                       # (T, E) f32 residual stream
    T, E = x.shape
    hd = E // n_heads

    # ---- attention branch: LN1 -> time-mix -> MHSA -> proj ----
    h = _layernorm(x, ln1w_ref[0], ln1b_ref[0])

    # time_shift(h)[t] = h[t-1], row 0 zero: sublane roll (XLU slot) + row-0 mask
    # instead of an unaligned (T-1, E) slice + concat copy.
    rows = lax.broadcasted_iota(jnp.int32, (T, E), 0)
    shifted = jnp.where(rows == 0, 0.0, pltpu.roll(h, shift=1, axis=0))

    tmix = tmix_ref[0]                 # (E,)
    xm = (h * tmix + shifted * (1.0 - tmix)).astype(jnp.bfloat16)

    q = jnp.dot(xm, wq_ref[...], preferred_element_type=jnp.float32) + bq_ref[0]
    k = jnp.dot(xm, wk_ref[...], preferred_element_type=jnp.float32) + bk_ref[0]
    v = jnp.dot(xm, wv_ref[...], preferred_element_type=jnp.float32) + bv_ref[0]

    scale = 1.0 / (hd ** 0.5)
    # Fold the softmax scale into q once (O(T*E)), not into (H,T,T) scores.
    q = (q * scale).astype(jnp.bfloat16).reshape(T, n_heads, hd).transpose(1, 0, 2)
    k = k.astype(jnp.bfloat16).reshape(T, n_heads, hd).transpose(1, 0, 2)
    v = v.astype(jnp.bfloat16).reshape(T, n_heads, hd).transpose(1, 0, 2)

    # Batched-head scores: one dot_general with batch dim H ('hqd,hkd->hqk').
    s = lax.dot_general(q, k, (((2,), (2,)), ((0,), (0,))),
                        preferred_element_type=jnp.float32)        # (H, T, T) f32

    # causal mask + bidirectional conditioning block, boolean, generated from iota
    # and applied with a select (no resident (T,T) f32 bias array).
    r = lax.broadcasted_iota(jnp.int32, (T, T), 0)
    c = lax.broadcasted_iota(jnp.int32, (T, T), 1)
    keep = (c <= r) | ((r < cond_len) & (c < cond_len))
    s = jnp.where(keep[None, :, :], s, NEG_BIAS)

    s = s - jnp.max(s, axis=-1, keepdims=True)
    p = jnp.exp(s)
    p = p * pl.reciprocal(jnp.sum(p, axis=-1, keepdims=True), approx=True)

    # Batched P.V: 'hqk,hkd->hqd', then relayout to (T, E) for the output proj.
    y = lax.dot_general(p.astype(jnp.bfloat16), v, (((2,), (1,)), ((0,), (0,))),
                        preferred_element_type=jnp.float32)        # (H, T, hd) f32
    y = y.transpose(1, 0, 2).reshape(T, E)
    y = jnp.dot(y.astype(jnp.bfloat16), wp_ref[...],
                preferred_element_type=jnp.float32) + bp_ref[0]

    x = x + y                          # residual 1 (f32)

    # ---- MLP branch: LN2 -> Linear -> relu^2 -> Linear ----
    h2 = _layernorm(x, ln2w_ref[0], ln2b_ref[0]).astype(jnp.bfloat16)
    f = jnp.dot(h2, w0_ref[...], preferred_element_type=jnp.float32) + b0_ref[0]
    f = jnp.square(jnp.maximum(f, 0.0)).astype(jnp.bfloat16)
    f = jnp.dot(f, w1_ref[...], preferred_element_type=jnp.float32) + b1_ref[0]

    out_ref[0] = x + f                 # residual 2


def head_kernel(x_ref, lnw_ref, lnb_ref, wh_ref, out_ref):
    """Final LayerNorm + one vocab-column tile of the head matmul.

    Batch is pre-folded into the M (row) dim by the caller; the grid streams
    lane-dense 128-column tiles of head_w. LN is recomputed per vocab tile
    (negligible vs. the matmul) so the vocab axis can stay 'parallel'.
    """
    h = _layernorm(x_ref[...], lnw_ref[0], lnb_ref[0])
    out_ref[...] = jnp.dot(h.astype(jnp.bfloat16), wh_ref[...],
                           preferred_element_type=jnp.float32)


def run_block(x, blk, n_heads, cond_len):
    B, T, E = x.shape
    weights = [blk['ln1w'], blk['ln1b'], blk['tmix'],
               blk['wq'], blk['bq'], blk['wk'], blk['bk'],
               blk['wv'], blk['bv'], blk['wp'], blk['bp'],
               blk['ln2w'], blk['ln2b'],
               blk['w0'], blk['b0'], blk['w1'], blk['b1']]
    kernel = functools.partial(block_kernel, n_heads, cond_len)
    return pl.pallas_call(
        kernel,
        out_shape=jax.ShapeDtypeStruct((B, T, E), jnp.float32),
        grid=(B,),
        in_specs=[pl.BlockSpec((1, T, E), lambda b: (b, 0, 0))]
                + [_weight_spec(w.shape) for w in weights],
        out_specs=pl.BlockSpec((1, T, E), lambda b: (b, 0, 0)),
        compiler_params=pltpu.CompilerParams(
            dimension_semantics=("parallel",),
            vmem_limit_bytes=VMEM_LIMIT),
    )(x, *weights)


def run_head(x, lnw, lnb, head_w, tv=128):
    B, Ti, E = x.shape
    V = head_w.shape[1]
    assert V % tv == 0, "vocab dim must be a multiple of the 128-lane tile"
    M = B * Ti
    xm = x.reshape(M, E)                               # fold batch into MXU rows
    out = pl.pallas_call(
        head_kernel,
        out_shape=jax.ShapeDtypeStruct((M, V), jnp.float32),
        grid=(V // tv,),
        in_specs=[_weight_spec((M, E)),                # constant across V tiles
                  _weight_spec(lnw.shape),
                  _weight_spec(lnb.shape),
                  pl.BlockSpec((E, tv), lambda j: (0, j))],   # streamed V tiles
        out_specs=pl.BlockSpec((M, tv), lambda j: (0, j)),
        compiler_params=pltpu.CompilerParams(
            dimension_semantics=("parallel",),
            vmem_limit_bytes=VMEM_LIMIT),
    )(xm, lnw, lnb, head_w)
    return out.reshape(B, Ti, V)


def gpt_forward(params, codes, conds, n_heads, cond_len, img_len):
    B = codes.shape[0]
    codes = codes.reshape(B, -1)                                   # (B, T_img)
    code_emb = params['tok_emb_code'][codes] + params['pos_emb_code']
    cond_emb = params['tok_emb_cond'][conds] + params['pos_emb_cond']
    x = jnp.concatenate([cond_emb, code_emb], axis=1)              # (B, T, E) f32
    for blk in params['blocks']:
        x = run_block(x, blk, n_heads, cond_len)
    # Slice the kept rows [cond_len-1 : -1] BEFORE the final LN/head kernel so no
    # LayerNorm work or DMA is spent on discarded rows.
    x = x[:, cond_len - 1: cond_len - 1 + img_len, :]
    return run_head(x, params['lnw'], params['lnb'], params['head_w'])


def init_params(key, vocab_cond, vocab_img, E, cond_len, img_len, n_layers):
    keys = jax.random.split(key, 8 + 8 * n_layers)
    kit = iter(range(len(keys)))

    def nrm(shape, dtype=jnp.float32):
        w = 0.02 * jax.random.normal(keys[next(kit)], shape, jnp.float32)
        return w.astype(dtype)

    bf16 = jnp.bfloat16
    params = {
        'tok_emb_cond': nrm((vocab_cond, E)),
        'tok_emb_code': nrm((vocab_img, E)),
        'pos_emb_cond': jnp.zeros((1, cond_len, E), jnp.float32),  # zero nn.Parameter
        'pos_emb_code': jnp.zeros((1, img_len, E), jnp.float32),
        'lnw': jnp.ones((1, E), jnp.float32),
        'lnb': jnp.zeros((1, E), jnp.float32),
        'head_w': nrm((E, vocab_img), bf16),
    }
    tmix = (jnp.arange(E, dtype=jnp.float32) / (E - 1)).reshape(1, E)
    blocks = []
    for _ in range(n_layers):
        blocks.append({
            'ln1w': jnp.ones((1, E), jnp.float32), 'ln1b': jnp.zeros((1, E), jnp.float32),
            'ln2w': jnp.ones((1, E), jnp.float32), 'ln2b': jnp.zeros((1, E), jnp.float32),
            'tmix': tmix,
            'wq': nrm((E, E), bf16), 'bq': jnp.zeros((1, E), jnp.float32),
            'wk': nrm((E, E), bf16), 'bk': jnp.zeros((1, E), jnp.float32),
            'wv': nrm((E, E), bf16), 'bv': jnp.zeros((1, E), jnp.float32),
            'wp': nrm((E, E), bf16), 'bp': jnp.zeros((1, E), jnp.float32),
            'w0': nrm((E, 4 * E), bf16), 'b0': jnp.zeros((1, 4 * E), jnp.float32),
            'w1': nrm((4 * E, E), bf16), 'b1': jnp.zeros((1, E), jnp.float32),
        })
    params['blocks'] = blocks
    return params


if __name__ == "__main__":
    # Small but lane-dense demo shapes: E and V are multiples of 128, head dim 128.
    vocab_cond_size = 16
    vocab_img_size = 256         # two 128-wide vocab tiles -> exercises head tiling
    embed_dim = 256
    n_heads = 2                  # head dim = 128 (fills the MXU contraction lanes)
    n_layers = 2
    cond_num_tokens = 4
    img_num_tokens = 12          # codes passed as (B, 3, 4) and flattened
    B = 2

    key = jax.random.PRNGKey(0)
    kp, kc, kd = jax.random.split(key, 3)
    params = init_params(kp, vocab_cond_size, vocab_img_size, embed_dim,
                         cond_num_tokens, img_num_tokens, n_layers)

    codes = jax.random.randint(kc, (B, 3, 4), 0, vocab_img_size, dtype=jnp.int32)
    conds = jax.random.randint(kd, (B, cond_num_tokens), 0, vocab_cond_size, dtype=jnp.int32)

    logits = gpt_forward(params, codes, conds, n_heads,
                         cond_num_tokens, img_num_tokens)
    jax.block_until_ready(logits)
    assert logits.shape == (B, img_num_tokens, vocab_img_size)
    assert bool(jnp.all(jnp.isfinite(logits)))
    print("KERNEL_OK")
</pallas_src>

<mosaic_0001>
module attributes {stable_mosaic.version = 11 : i64} {
  func.func @_probe_kernel(%arg0: i32, %arg1: memref<8x128xf32, #tpu.memory_space<vmem>>, %arg2: memref<8x128xf32, #tpu.memory_space<vmem>>) attributes {dimension_semantics = [#tpu.dimension_semantics<arbitrary>], iteration_bounds = array<i64: 2>, scalar_prefetch = 0 : i64, scratch_operands = 0 : i64, tpu.core_type = #tpu.core_type<tc>, window_params = [{pipeline_mode = #tpu.pipeline_mode<synchronous>, transform_indices = @transform_0, window_bounds = array<i64: 8, 128>}, {pipeline_mode = #tpu.pipeline_mode<synchronous>, transform_indices = @transform_1, window_bounds = array<i64: 8, 128>}]} {
    %c0 = arith.constant 0 : index
    %c0_0 = arith.constant 0 : index
    %0 = vector.load %arg1[%c0, %c0_0] : memref<8x128xf32, #tpu.memory_space<vmem>>, vector<8x128xf32>
    %c0_1 = arith.constant 0 : index
    %c0_2 = arith.constant 0 : index
    %1 = vector.load %arg2[%c0_1, %c0_2] : memref<8x128xf32, #tpu.memory_space<vmem>>, vector<8x128xf32>
    tpu.vector_store %arg2[%c0_1, %c0_2], %0 {strides = array<i32>} : memref<8x128xf32, #tpu.memory_space<vmem>>, vector<8x128xf32>,
    return
  }
  func.func @transform_0(%arg0: i32) -> (i32, i32) {
    %c0_i32 = arith.constant 0 : i32
    %c0_i32_0 = arith.constant 0 : i32
    %c0_i32_1 = arith.constant 0 : i32
    return %c0_i32, %c0_i32_0 : i32, i32
  }
  func.func @transform_1(%arg0: i32) -> (i32, i32) {
    %c0_i32 = arith.constant 0 : i32
    %c0_i32_0 = arith.constant 0 : i32
    %c0_i32_1 = arith.constant 0 : i32
    return %c0_i32, %c0_i32_0 : i32, i32
  }
}

module attributes {stable_mosaic.version = 11 : i64} {
  func.func @block_kernel(%arg0: i32, %arg1: memref<1x16x256xf32, #tpu.memory_space<vmem>>, %arg2: memref<1x256xf32, #tpu.memory_space<vmem>>, %arg3: memref<1x256xf32, #tpu.memory_space<vmem>>, %arg4: memref<1x256xf32, #tpu.memory_space<vmem>>, %arg5: memref<256x256xbf16, #tpu.memory_space<vmem>>, %arg6: memref<1x256xf32, #tpu.memory_space<vmem>>, %arg7: memref<256x256xbf16, #tpu.memory_space<vmem>>, %arg8: memref<1x256xf32, #tpu.memory_space<vmem>>, %arg9: memref<256x256xbf16, #tpu.memory_space<vmem>>, %arg10: memref<1x256xf32, #tpu.memory_space<vmem>>, %arg11: memref<256x256xbf16, #tpu.memory_space<vmem>>, %arg12: memref<1x256xf32, #tpu.memory_space<vmem>>, %arg13: memref<1x256xf32, #tpu.memory_space<vmem>>, %arg14: memref<1x256xf32, #tpu.memory_space<vmem>>, %arg15: memref<256x1024xbf16, #tpu.memory_space<vmem>>, %arg16: memref<1x1024xf32, #tpu.memory_space<vmem>>, %arg17: memref<1024x256xbf16, #tpu.memory_space<vmem>>, %arg18: memref<1x256xf32, #tpu.memory_space<vmem>>, %arg19: memref<1x16x256xf32, #tpu.memory_space<vmem>>) attributes {dimension_semantics = [#tpu.dimension_semantics<parallel>], iteration_bounds = array<i64: 2>, scalar_prefetch = 0 : i64, scratch_operands = 0 : i64, tpu.core_type = #tpu.core_type<tc>, window_params = [{transform_indices = @transform_0, window_bounds = array<i64: 1, 16, 256>}, {pipeline_mode = #tpu.pipeline_mode<synchronous>, transform_indices = @transform_1, window_bounds = array<i64: 1, 256>}, {pipeline_mode = #tpu.pipeline_mode<synchronous>, transform_indices = @transform_2, window_bounds = array<i64: 1, 256>}, {pipeline_mode = #tpu.pipeline_mode<synchronous>, transform_indices = @transform_3, window_bounds = array<i64: 1, 256>}, {pipeline_mode = #tpu.pipeline_mode<synchronous>, transform_indices = @transform_4, window_bounds = array<i64: 256, 256>}, {pipeline_mode = #tpu.pipeline_mode<synchronous>, transform_indices = @transform_5, window_bounds = array<i64: 1, 256>}, {pipeline_mode = #tpu.pipeline_mode<synchronous>, transform_indices = @transform_6, window_bounds = array<i64: 256, 256>}, {pipeline_mode = #tpu.pipeline_mode<synchronous>, transform_indices = @transform_7, window_bounds = array<i64: 1, 256>}, {pipeline_mode = #tpu.pipeline_mode<synchronous>, transform_indices = @transform_8, window_bounds = array<i64: 256, 256>}, {pipeline_mode = #tpu.pipeline_mode<synchronous>, transform_indices = @transform_9, window_bounds = array<i64: 1, 256>}, {pipeline_mode = #tpu.pipeline_mode<synchronous>, transform_indices = @transform_10, window_bounds = array<i64: 256, 256>}, {pipeline_mode = #tpu.pipeline_mode<synchronous>, transform_indices = @transform_11, window_bounds = array<i64: 1, 256>}, {pipeline_mode = #tpu.pipeline_mode<synchronous>, transform_indices = @transform_12, window_bounds = array<i64: 1, 256>}, {pipeline_mode = #tpu.pipeline_mode<synchronous>, transform_indices = @transform_13, window_bounds = array<i64: 1, 256>}, {pipeline_mode = #tpu.pipeline_mode<synchronous>, transform_indices = @transform_14, window_bounds = array<i64: 256, 1024>}, {pipeline_mode = #tpu.pipeline_mode<synchronous>, transform_indices = @transform_15, window_bounds = array<i64: 1, 1024>}, {pipeline_mode = #tpu.pipeline_mode<synchronous>, transform_indices = @transform_16, window_bounds = array<i64: 1024, 256>}, {pipeline_mode = #tpu.pipeline_mode<synchronous>, transform_indices = @transform_17, window_bounds = array<i64: 1, 256>}, {transform_indices = @transform_18, window_bounds = array<i64: 1, 16, 256>}]} {
    %c0 = arith.constant 0 : index
    %c0_0 = arith.constant 0 : index
    %c0_1 = arith.constant 0 : index
    %0 = vector.load %arg1[%c0, %c0_0, %c0_1] : memref<1x16x256xf32, #tpu.memory_space<vmem>>, vector<1x16x256xf32>
    %1 = vector.shape_cast %0 : vector<1x16x256xf32> to vector<16x256xf32>
    %c0_2 = arith.constant 0 : index
    %c0_3 = arith.constant 0 : index
    %2 = vector.load %arg2[%c0_2, %c0_3] : memref<1x256xf32, #tpu.memory_space<vmem>>, vector<1x256xf32>
    %3 = vector.shape_cast %2 : vector<1x256xf32> to vector<256xf32>
    %c0_4 = arith.constant 0 : index
    %c0_5 = arith.constant 0 : index
    %4 = vector.load %arg3[%c0_4, %c0_5] : memref<1x256xf32, #tpu.memory_space<vmem>>, vector<1x256xf32>
    %5 = vector.shape_cast %4 : vector<1x256xf32> to vector<256xf32>
    %cst = arith.constant dense<0.000000e+00> : vector<16xf32>
    %6 = vector.multi_reduction <add>, %1, %cst [1] : vector<16x256xf32> to vector<16xf32>
    %7 = vector.shape_cast %6 : vector<16xf32> to vector<16x1xf32>
    %cst_6 = arith.constant 2.560000e+02 : f32
    %8 = vector.broadcast %cst_6 : f32 to vector<16x1xf32>
    %9 = arith.divf %7, %8 : vector<16x1xf32>
    %10 = vector.broadcast %9 : vector<16x1xf32> to vector<16x256xf32>
    %11 = arith.subf %1, %10 : vector<16x256xf32>
    %12 = arith.mulf %11, %11 : vector<16x256xf32>
    %cst_7 = arith.constant dense<0.000000e+00> : vector<16xf32>
    %13 = vector.multi_reduction <add>, %12, %cst_7 [1] : vector<16x256xf32> to vector<16xf32>
    %14 = vector.shape_cast %13 : vector<16xf32> to vector<16x1xf32>
    %cst_8 = arith.constant 2.560000e+02 : f32
    %15 = vector.broadcast %cst_8 : f32 to vector<16x1xf32>
    %16 = arith.divf %14, %15 : vector<16x1xf32>
    %17 = vector.broadcast %9 : vector<16x1xf32> to vector<16x256xf32>
    %18 = arith.subf %1, %17 : vector<16x256xf32>
    %cst_9 = arith.constant 9.99999974E-6 : f32
    %19 = vector.broadcast %cst_9 : f32 to vector<16x1xf32>
    %20 = arith.addf %16, %19 : vector<16x1xf32>
    %21 = math.rsqrt %20 : vector<16x1xf32>
    %22 = vector.broadcast %21 : vector<16x1xf32> to vector<16x256xf32>
    %23 = arith.mulf %18, %22 : vector<16x256xf32>
    %24 = vector.shape_cast %3 : vector<256xf32> to vector<1x256xf32>
    %25 = vector.broadcast %24 : vector<1x256xf32> to vector<16x256xf32>
    %26 = arith.mulf %23, %25 : vector<16x256xf32>
    %27 = vector.shape_cast %5 : vector<256xf32> to vector<1x256xf32>
    %28 = vector.broadcast %27 : vector<1x256xf32> to vector<16x256xf32>
    %29 = arith.addf %26, %28 : vector<16x256xf32>
    %30 = tpu.iota {dimensions = array<i32: 0>} : vector<16x256xi32>
    %c0_i32 = arith.constant 0 : i32
    %31 = vector.broadcast %c0_i32 : i32 to vector<16x256xi32>
    %32 = arith.cmpi eq, %30, %31 : vector<16x256xi32>
    %c1_i32 = arith.constant 1 : i32
    %33 = tpu.dynamic_rotate %29 by %c1_i32 dim 0 : vector<16x256xf32>, i32 -> vector<16x256xf32>
    %cst_10 = arith.constant 0.000000e+00 : f32
    %34 = vector.broadcast %cst_10 : f32 to vector<16x256xf32>
    %35 = arith.select %32, %34, %33 : vector<16x256xi1>, vector<16x256xf32>
    %c0_11 = arith.constant 0 : index
    %c0_12 = arith.constant 0 : index
    %36 = vector.load %arg4[%c0_11, %c0_12] : memref<1x256xf32, #tpu.memory_space<vmem>>, vector<1x256xf32>
    %37 = vector.shape_cast %36 : vector<1x256xf32> to vector<256xf32>
    %38 = vector.shape_cast %37 : vector<256xf32> to vector<1x256xf32>
    %39 = vector.broadcast %38 : vector<1x256xf32> to vector<16x256xf32>
    %40 = arith.mulf %29, %39 : vector<16x256xf32>
    %cst_13 = arith.constant 1.000000e+00 : f32
    %41 = vector.broadcast %cst_13 : f32 to vector<256xf32>
    %42 = arith.subf %41, %37 : vector<256xf32>
    %43 = vector.shape_cast %42 : vector<256xf32> to vector<1x256xf32>
    %44 = vector.broadcast %43 : vector<1x256xf32> to vector<16x256xf32>
    %45 = arith.mulf %35, %44 : vector<16x256xf32>
    %46 = arith.addf %40, %45 : vector<16x256xf32>
    %47 = arith.truncf %46 : vector<16x256xf32> to vector<16x256xbf16>
    %c0_14 = arith.constant 0 : index
    %c0_15 = arith.constant 0 : index
    %48 = vector.load %arg5[%c0_14, %c0_15] : memref<256x256xbf16, #tpu.memory_space<vmem>>, vector<256x256xbf16>
    %cst_16 = arith.constant dense<0.000000e+00> : vector<16x256xf32>
    %49 = tpu.matmul %47, %48, %cst_16 {dimension_numbers = #tpu.dot_dimension_numbers<[1], [0], [0], [1], [0, 0, 1, 1], [], []>} : vector<16x256xbf16>, vector<256x256xbf16>, vector<16x256xf32> -> vector<16x256xf32>
    %c0_17 = arith.constant 0 : index
    %c0_18 = arith.constant 0 : index
    %50 = vector.load %arg6[%c0_17, %c0_18] : memref<1x256xf32, #tpu.memory_space<vmem>>, vector<1x256xf32>
    %51 = vector.shape_cast %50 : vector<1x256xf32> to vector<256xf32>
    %52 = vector.shape_cast %51 : vector<256xf32> to vector<1x256xf32>
    %53 = vector.broadcast %52 : vector<1x256xf32> to vector<16x256xf32>
    %54 = arith.addf %49, %53 : vector<16x256xf32>
    %c0_19 = arith.constant 0 : index
    %c0_20 = arith.constant 0 : index
    %55 = vector.load %arg7[%c0_19, %c0_20] : memref<256x256xbf16, #tpu.memory_space<vmem>>, vector<256x256xbf16>
    %cst_21 = arith.constant dense<0.000000e+00> : vector<16x256xf32>
    %56 = tpu.matmul %47, %55, %cst_21 {dimension_numbers = #tpu.dot_dimension_numbers<[1], [0], [0], [1], [0, 0, 1, 1], [], []>} : vector<16x256xbf16>, vector<256x256xbf16>, vector<16x256xf32> -> vector<16x256xf32>
    %c0_22 = arith.constant 0 : index
    %c0_23 = arith.constant 0 : index
    %57 = vector.load %arg8[%c0_22, %c0_23] : memref<1x256xf32, #tpu.memory_space<vmem>>, vector<1x256xf32>
    %58 = vector.shape_cast %57 : vector<1x256xf32> to vector<256xf32>
    %59 = vector.shape_cast %58 : vector<256xf32> to vector<1x256xf32>
    %60 = vector.broadcast %59 : vector<1x256xf32> to vector<16x256xf32>
    %61 = arith.addf %56, %60 : vector<16x256xf32>
    %c0_24 = arith.constant 0 : index
    %c0_25 = arith.constant 0 : index
    %62 = vector.load %arg9[%c0_24, %c0_25] : memref<256x256xbf16, #tpu.memory_space<vmem>>, vector<256x256xbf16>
    %cst_26 = arith.constant dense<0.000000e+00> : vector<16x256xf32>
    %63 = tpu.matmul %47, %62, %cst_26 {dimension_numbers = #tpu.dot_dimension_numbers<[1], [0], [0], [1], [0, 0, 1, 1], [], []>} : vector<16x256xbf16>, vector<256x256xbf16>, vector<16x256xf32> -> vector<16x256xf32>
    %c0_27 = arith.constant 0 : index
    %c0_28 = arith.constant 0 : index
    %64 = vector.load %arg10[%c0_27, %c0_28] : memref<1x256xf32, #tpu.memory_space<vmem>>, vector<1x256xf32>
    %65 = vector.shape_cast %64 : vector<1x256xf32> to vector<256xf32>
    %66 = vector.shape_cast %65 : vector<256xf32> to vector<1x256xf32>
    %67 = vector.broadcast %66 : vector<1x256xf32> to vector<16x256xf32>
    %68 = arith.addf %63, %67 : vector<16x256xf32>
    %cst_29 = arith.constant 0.0883883461 : f32
    %69 = vector.broadcast %cst_29 : f32 to vector<16x256xf32>
    %70 = arith.mulf %54, %69 : vector<16x256xf32>
    %71 = arith.truncf %70 : vector<16x256xf32> to vector<16x256xbf16>
    %72 = vector.shape_cast %71 : vector<16x256xbf16> to vector<16x2x128xbf16>
    %73 = tpu.transpose %72, [1, 0, 2] : vector<16x2x128xbf16> -> vector<2x16x128xbf16>
    %74 = arith.truncf %61 : vector<16x256xf32> to vector<16x256xbf16>
    %75 = vector.shape_cast %74 : vector<16x256xbf16> to vector<16x2x128xbf16>
    %76 = tpu.transpose %75, [1, 0, 2] : vector<16x2x128xbf16> -> vector<2x16x128xbf16>
    %77 = arith.truncf %68 : vector<16x256xf32> to vector<16x256xbf16>
    %78 = vector.shape_cast %77 : vector<16x256xbf16> to vector<16x2x128xbf16>
    %79 = tpu.transpose %78, [1, 0, 2] : vector<16x2x128xbf16> -> vector<2x16x128xbf16>
    %cst_30 = arith.constant dense<0.000000e+00> : vector<2x16x16xf32>
    %80 = tpu.matmul %73, %76, %cst_30 {dimension_numbers = #tpu.dot_dimension_numbers<[2], [2], [1], [1], [0, 0, 0, 1, 1, 1], [0], [0]>} : vector<2x16x128xbf16>, vector<2x16x128xbf16>, vector<2x16x16xf32> -> vector<2x16x16xf32>
    %81 = tpu.iota {dimensions = array<i32: 0>} : vector<16x16xi32>
    %82 = tpu.iota {dimensions = array<i32: 1>} : vector<16x16xi32>
    %83 = arith.cmpi sle, %82, %81 : vector<16x16xi32>
    %c4_i32 = arith.constant 4 : i32
    %84 = vector.broadcast %c4_i32 : i32 to vector<16x16xi32>
    %85 = arith.cmpi slt, %81, %84 : vector<16x16xi32>
    %c4_i32_31 = arith.constant 4 : i32
    %86 = vector.broadcast %c4_i32_31 : i32 to vector<16x16xi32>
    %87 = arith.cmpi slt, %82, %86 : vector<16x16xi32>
    %88 = arith.andi %85, %87 : vector<16x16xi1>
    %89 = arith.ori %83, %88 : vector<16x16xi1>
    %90 = vector.shape_cast %89 : vector<16x16xi1> to vector<1x16x16xi1>
    %cst_32 = arith.constant -1.000000e+09 : f32
    %91 = vector.shape_cast %90 : vector<1x16x16xi1> to vector<1x16x16xi1>
    %92 = vector.broadcast %91 : vector<1x16x16xi1> to vector<2x16x16xi1>
    %93 = vector.broadcast %cst_32 : f32 to vector<2x16x16xf32>
    %94 = arith.select %92, %80, %93 : vector<2x16x16xi1>, vector<2x16x16xf32>
    %cst_33 = arith.constant dense<0xFF800000> : vector<2x16xf32>
    %95 = vector.multi_reduction <maximumf>, %94, %cst_33 [2] : vector<2x16x16xf32> to vector<2x16xf32>
    %96 = vector.shape_cast %95 : vector<2x16xf32> to vector<2x16x1xf32>
    %97 = vector.broadcast %96 : vector<2x16x1xf32> to vector<2x16x16xf32>
    %98 = arith.subf %94, %97 : vector<2x16x16xf32>
    %99 = math.exp %98 : vector<2x16x16xf32>
    %cst_34 = arith.constant dense<0.000000e+00> : vector<2x16xf32>
    %100 = vector.multi_reduction <add>, %99, %cst_34 [2] : vector<2x16x16xf32> to vector<2x16xf32>
    %101 = vector.shape_cast %100 : vector<2x16xf32> to vector<2x16x1xf32>
    %102 = tpu.reciprocal %101 {approx = true} : vector<2x16x1xf32> -> vector<2x16x1xf32>
    %103 = vector.broadcast %102 : vector<2x16x1xf32> to vector<2x16x16xf32>
    %104 = arith.mulf %99, %103 : vector<2x16x16xf32>
    %105 = arith.truncf %104 : vector<2x16x16xf32> to vector<2x16x16xbf16>
    %cst_35 = arith.constant dense<0.000000e+00> : vector<2x16x128xf32>
    %106 = tpu.matmul %105, %79, %cst_35 {dimension_numbers = #tpu.dot_dimension_numbers<[2], [1], [1], [2], [0, 0, 0, 1, 1, 2], [0], [0]>} : vector<2x16x16xbf16>, vector<2x16x128xbf16>, vector<2x16x128xf32> -> vector<2x16x128xf32>
    %107 = tpu.transpose %106, [1, 0, 2] : vector<2x16x128xf32> -> vector<16x2x128xf32>
    %108 = vector.shape_cast %107 : vector<16x2x128xf32> to vector<16x256xf32>
    %109 = arith.truncf %108 : vector<16x256xf32> to vector<16x256xbf16>
    %c0_36 = arith.constant 0 : index
    %c0_37 = arith.constant 0 : index
    %110 = vector.load %arg11[%c0_36, %c0_37] : memref<256x256xbf16, #tpu.memory_space<vmem>>, vector<256x256xbf16>
    %cst_38 = arith.constant dense<0.000000e+00> : vector<16x256xf32>
    %111 = tpu.matmul %109, %110, %cst_38 {dimension_numbers = #tpu.dot_dimension_numbers<[1], [0], [0], [1], [0, 0, 1, 1], [], []>} : vector<16x256xbf16>, vector<256x256xbf16>, vector<16x256xf32> -> vector<16x256xf32>
    %c0_39 = arith.constant 0 : index
    %c0_40 = arith.constant 0 : index
    %112 = vector.load %arg12[%c0_39, %c0_40] : memref<1x256xf32, #tpu.memory_space<vmem>>, vector<1x256xf32>
    %113 = vector.shape_cast %112 : vector<1x256xf32> to vector<256xf32>
    %114 = vector.shape_cast %113 : vector<256xf32> to vector<1x256xf32>
    %115 = vector.broadcast %114 : vector<1x256xf32> to vector<16x256xf32>
    %116 = arith.addf %111, %115 : vector<16x256xf32>
    %117 = arith.addf %1, %116 : vector<16x256xf32>
    %c0_41 = arith.constant 0 : index
    %c0_42 = arith.constant 0 : index
    %118 = vector.load %arg13[%c0_41, %c0_42] : memref<1x256xf32, #tpu.memory_space<vmem>>, vector<1x256xf32>
    %119 = vector.shape_cast %118 : vector<1x256xf32> to vector<256xf32>
    %c0_43 = arith.constant 0 : index
    %c0_44 = arith.constant 0 : index
    %120 = vector.load %arg14[%c0_43, %c0_44] : memref<1x256xf32, #tpu.memory_space<vmem>>, vector<1x256xf32>
    %121 = vector.shape_cast %120 : vector<1x256xf32> to vector<256xf32>
    %cst_45 = arith.constant dense<0.000000e+00> : vector<16xf32>
    %122 = vector.multi_reduction <add>, %117, %cst_45 [1] : vector<16x256xf32> to vector<16xf32>
    %123 = vector.shape_cast %122 : vector<16xf32> to vector<16x1xf32>
    %cst_46 = arith.constant 2.560000e+02 : f32
    %124 = vector.broadcast %cst_46 : f32 to vector<16x1xf32>
    %125 = arith.divf %123, %124 : vector<16x1xf32>
    %126 = vector.broadcast %125 : vector<16x1xf32> to vector<16x256xf32>
    %127 = arith.subf %117, %126 : vector<16x256xf32>
    %128 = arith.mulf %127, %127 : vector<16x256xf32>
    %cst_47 = arith.constant dense<0.000000e+00> : vector<16xf32>
    %129 = vector.multi_reduction <add>, %128, %cst_47 [1] : vector<16x256xf32> to vector<16xf32>
    %130 = vector.shape_cast %129 : vector<16xf32> to vector<16x1xf32>
    %cst_48 = arith.constant 2.560000e+02 : f32
    %131 = vector.broadcast %cst_48 : f32 to vector<16x1xf32>
    %132 = arith.divf %130, %131 : vector<16x1xf32>
    %133 = vector.broadcast %125 : vector<16x1xf32> to vector<16x256xf32>
    %134 = arith.subf %117, %133 : vector<16x256xf32>
    %cst_49 = arith.constant 9.99999974E-6 : f32
    %135 = vector.broadcast %cst_49 : f32 to vector<16x1xf32>
    %136 = arith.addf %132, %135 : vector<16x1xf32>
    %137 = math.rsqrt %136 : vector<16x1xf32>
    %138 = vector.broadcast %137 : vector<16x1xf32> to vector<16x256xf32>
    %139 = arith.mulf %134, %138 : vector<16x256xf32>
    %140 = vector.shape_cast %119 : vector<256xf32> to vector<1x256xf32>
    %141 = vector.broadcast %140 : vector<1x256xf32> to vector<16x256xf32>
    %142 = arith.mulf %139, %141 : vector<16x256xf32>
    %143 = vector.shape_cast %121 : vector<256xf32> to vector<1x256xf32>
    %144 = vector.broadcast %143 : vector<1x256xf32> to vector<16x256xf32>
    %145 = arith.addf %142, %144 : vector<16x256xf32>
    %146 = arith.truncf %145 : vector<16x256xf32> to vector<16x256xbf16>
    %c0_50 = arith.constant 0 : index
    %c0_51 = arith.constant 0 : index
    %147 = vector.load %arg15[%c0_50, %c0_51] : memref<256x1024xbf16, #tpu.memory_space<vmem>>, vector<256x1024xbf16>
    %cst_52 = arith.constant dense<0.000000e+00> : vector<16x1024xf32>
    %148 = tpu.matmul %146, %147, %cst_52 {dimension_numbers = #tpu.dot_dimension_numbers<[1], [0], [0], [1], [0, 0, 1, 1], [], []>} : vector<16x256xbf16>, vector<256x1024xbf16>, vector<16x1024xf32> -> vector<16x1024xf32>
    %c0_53 = arith.constant 0 : index
    %c0_54 = arith.constant 0 : index
    %149 = vector.load %arg16[%c0_53, %c0_54] : memref<1x1024xf32, #tpu.memory_space<vmem>>, vector<1x1024xf32>
    %150 = vector.shape_cast %149 : vector<1x1024xf32> to vector<1024xf32>
    %151 = vector.shape_cast %150 : vector<1024xf32> to vector<1x1024xf32>
    %152 = vector.broadcast %151 : vector<1x1024xf32> to vector<16x1024xf32>
    %153 = arith.addf %148, %152 : vector<16x1024xf32>
    %cst_55 = arith.constant 0.000000e+00 : f32
    %154 = vector.broadcast %cst_55 : f32 to vector<16x1024xf32>
    %155 = arith.maximumf %153, %154 : vector<16x1024xf32>
    %156 = arith.mulf %155, %155 : vector<16x1024xf32>
    %157 = arith.truncf %156 : vector<16x1024xf32> to vector<16x1024xbf16>
    %c0_56 = arith.constant 0 : index
    %c0_57 = arith.constant 0 : index
    %158 = vector.load %arg17[%c0_56, %c0_57] : memref<1024x256xbf16, #tpu.memory_space<vmem>>, vector<1024x256xbf16>
    %cst_58 = arith.constant dense<0.000000e+00> : vector<16x256xf32>
    %159 = tpu.matmul %157, %158, %cst_58 {dimension_numbers = #tpu.dot_dimension_numbers<[1], [0], [0], [1], [0, 0, 1, 1], [], []>} : vector<16x1024xbf16>, vector<1024x256xbf16>, vector<16x256xf32> -> vector<16x256xf32>
    %c0_59 = arith.constant 0 : index
    %c0_60 = arith.constant 0 : index
    %160 = vector.load %arg18[%c0_59, %c0_60] : memref<1x256xf32, #tpu.memory_space<vmem>>, vector<1x256xf32>
    %161 = vector.shape_cast %160 : vector<1x256xf32> to vector<256xf32>
    %162 = vector.shape_cast %161 : vector<256xf32> to vector<1x256xf32>
    %163 = vector.broadcast %162 : vector<1x256xf32> to vector<16x256xf32>
    %164 = arith.addf %159, %163 : vector<16x256xf32>
    %165 = arith.addf %117, %164 : vector<16x256xf32>
    %c0_61 = arith.constant 0 : index
    %c0_62 = arith.constant 0 : index
    %c0_63 = arith.constant 0 : index
    %166 = vector.load %arg19[%c0_61, %c0_62, %c0_63] : memref<1x16x256xf32, #tpu.memory_space<vmem>>, vector<1x16x256xf32>
    %167 = vector.shape_cast %166 : vector<1x16x256xf32> to vector<16x256xf32>
    %168 = vector.shape_cast %165 : vector<16x256xf32> to vector<1x16x256xf32>
    tpu.vector_store %arg19[%c0_61, %c0_62, %c0_63], %168 {strides = array<i32>} : memref<1x16x256xf32, #tpu.memory_space<vmem>>, vector<1x16x256xf32>,
    return
  }
  func.func @transform_0(%arg0: i32) -> (i32, i32, i32) {
    %c0_i32 = arith.constant 0 : i32
    %c0_i32_0 = arith.constant 0 : i32
    %c0_i32_1 = arith.constant 0 : i32
    return %arg0, %c0_i32, %c0_i32_0 : i32, i32, i32
  }
  func.func @transform_1(%arg0: i32) -> (i32, i32) {
    %c0_i32 = arith.constant 0 : i32
    %c0_i32_0 = arith.constant 0 : i32
    %c0_i32_1 = arith.constant 0 : i32
    return %c0_i32, %c0_i32_0 : i32, i32
  }
  func.func @transform_2(%arg0: i32) -> (i32, i32) {
    %c0_i32 = arith.constant 0 : i32
    %c0_i32_0 = arith.constant 0 : i32
    %c0_i32_1 = arith.constant 0 : i32
    return %c0_i32, %c0_i32_0 : i32, i32
  }
  func.func @transform_3(%arg0: i32) -> (i32, i32) {
    %c0_i32 = arith.constant 0 : i32
    %c0_i32_0 = arith.constant 0 : i32
    %c0_i32_1 = arith.constant 0 : i32
    return %c0_i32, %c0_i32_0 : i32, i32
  }
  func.func @transform_4(%arg0: i32) -> (i32, i32) {
    %c0_i32 = arith.constant 0 : i32
    %c0_i32_0 = arith.constant 0 : i32
    %c0_i32_1 = arith.constant 0 : i32
    return %c0_i32, %c0_i32_0 : i32, i32
  }
  func.func @transform_5(%arg0: i32) -> (i32, i32) {
    %c0_i32 = arith.constant 0 : i32
    %c0_i32_0 = arith.constant 0 : i32
    %c0_i32_1 = arith.constant 0 : i32
    return %c0_i32, %c0_i32_0 : i32, i32
  }
  func.func @transform_6(%arg0: i32) -> (i32, i32) {
    %c0_i32 = arith.constant 0 : i32
    %c0_i32_0 = arith.constant 0 : i32
    %c0_i32_1 = arith.constant 0 : i32
    return %c0_i32, %c0_i32_0 : i32, i32
  }
  func.func @transform_7(%arg0: i32) -> (i32, i32) {
    %c0_i32 = arith.constant 0 : i32
    %c0_i32_0 = arith.constant 0 : i32
    %c0_i32_1 = arith.constant 0 : i32
    return %c0_i32, %c0_i32_0 : i32, i32
  }
  func.func @transform_8(%arg0: i32) -> (i32, i32) {
    %c0_i32 = arith.constant 0 : i32
    %c0_i32_0 = arith.constant 0 : i32
    %c0_i32_1 = arith.constant 0 : i32
    return %c0_i32, %c0_i32_0 : i32, i32
  }
  func.func @transform_9(%arg0: i32) -> (i32, i32) {
    %c0_i32 = arith.constant 0 : i32
    %c0_i32_0 = arith.constant 0 : i32
    %c0_i32_1 = arith.constant 0 : i32
    return %c0_i32, %c0_i32_0 : i32, i32
  }
  func.func @transform_10(%arg0: i32) -> (i32, i32) {
    %c0_i32 = arith.constant 0 : i32
    %c0_i32_0 = arith.constant 0 : i32
    %c0_i32_1 = arith.constant 0 : i32
    return %c0_i32, %c0_i32_0 : i32, i32
  }
  func.func @transform_11(%arg0: i32) -> (i32, i32) {
    %c0_i32 = arith.constant 0 : i32
    %c0_i32_0 = arith.constant 0 : i32
    %c0_i32_1 = arith.constant 0 : i32
    return %c0_i32, %c0_i32_0 : i32, i32
  }
  func.func @transform_12(%arg0: i32) -> (i32, i32) {
    %c0_i32 = arith.constant 0 : i32
    %c0_i32_0 = arith.constant 0 : i32
    %c0_i32_1 = arith.constant 0 : i32
    return %c0_i32, %c0_i32_0 : i32, i32
  }
  func.func @transform_13(%arg0: i32) -> (i32, i32) {
    %c0_i32 = arith.constant 0 : i32
    %c0_i32_0 = arith.constant 0 : i32
    %c0_i32_1 = arith.constant 0 : i32
    return %c0_i32, %c0_i32_0 : i32, i32
  }
  func.func @transform_14(%arg0: i32) -> (i32, i32) {
    %c0_i32 = arith.constant 0 : i32
    %c0_i32_0 = arith.constant 0 : i32
    %c0_i32_1 = arith.constant 0 : i32
    return %c0_i32, %c0_i32_0 : i32, i32
  }
  func.func @transform_15(%arg0: i32) -> (i32, i32) {
    %c0_i32 = arith.constant 0 : i32
    %c0_i32_0 = arith.constant 0 : i32
    %c0_i32_1 = arith.constant 0 : i32
    return %c0_i32, %c0_i32_0 : i32, i32
  }
  func.func @transform_16(%arg0: i32) -> (i32, i32) {
    %c0_i32 = arith.constant 0 : i32
    %c0_i32_0 = arith.constant 0 : i32
    %c0_i32_1 = arith.constant 0 : i32
    return %c0_i32, %c0_i32_0 : i32, i32
  }
  func.func @transform_17(%arg0: i32) -> (i32, i32) {
    %c0_i32 = arith.constant 0 : i32
    %c0_i32_0 = arith.constant 0 : i32
    %c0_i32_1 = arith.constant 0 : i32
    return %c0_i32, %c0_i32_0 : i32, i32
  }
  func.func @transform_18(%arg0: i32) -> (i32, i32, i32) {
    %c0_i32 = arith.constant 0 : i32
    %c0_i32_0 = arith.constant 0 : i32
    %c0_i32_1 = arith.constant 0 : i32
    return %arg0, %c0_i32, %c0_i32_0 : i32, i32, i32
  }
}

</mosaic_0001>

<bundles_post_ra>
// kernel: tpu_custom_call.1
= control target key start
LH: loop header
LB: loop body
LE: loop exit
PB: predicated region body
PF: predicated region fallthrough
CT: control target
= control target key end

     0   :  { %6 = vsyncpa [#allocation3], 0  ;;  %s304_s0 = inlined_call_operand.hbm [shape: f32[8,128], index: 0, kind: input, shape index: {}]   ;;  %s305_s1 = inlined_call_operand.hbm [shape: f32[8,128], index: 1, kind: output, shape index: {}]  }
   0x1   :  { %7 = vsyncpa [#allocation4], 0  ;;  %s257_s6 = smov 0  }
   0x2 LB: > { %s144_s7 = sadd.s32 4294967295, %s243_s6   ;;  %p145_p0 = scmp.ge.s32.totalorder %s243_s6, 1  ;;  %s243_s6 = sphi %s257_s6, %s13_s6  }
   0x3   : > { %p60_p1 = scmp.lt.s32.totalorder %s243_s6, 3  ;;  %p269_p3 = scmp.eq.s32.totalorder %s144_s7, 0 }
   0x4   : > { %s245_s10 = smov [#allocation2]  }
   0x5   : > { %p265_p2 = pnand %p145_p0, %p60_p1  ;;  %s73_s11 = sshll.u32 %s245_s10, 4  ;;  %s74_s11 = int_to_ptr.vmem [resolvable:$true] %s73_s11 }
   0x6   : > { %s190_s12 = scalar_lea.vmem %s74_s11, 128  ;;  %p198_p10 = scmp.lt.s32.totalorder %s74_s11, %s74_s11 }
   0x7   : > { %p161_p4 = pneg %p265_p2  ;;  %p191_p7 = scmp.ne.s32.totalorder %s74_s11, %s190_s12 }
   0x8   : > { %p199_p11 = scmp.lt.s32.totalorder %s190_s12, %s190_s12 }
   0x9   : > { %p162_p5 = pnand %p269_p3, %p161_p4 }
   0xa   : > { %p200_p12 = por %p199_p11, %p198_p10 }
   0xb   : > { %p181_p6 = pneg %p162_p5 }
   0xd   : > { %p193_p8 = pnand %p191_p7, %p181_p6 }
   0xf   : > { %p194_p9 = pneg %p193_p8 }
  0x11   : > { %p201_p13 = pnand %p200_p12, %p194_p9 }
  0x13   : > { %204 = shalt.err (!%p201_p13)
}
  0x14   : > { %164 = dma.hbm_to_vmem [thread:$0]  (!%p162_p5), %s304_s0, 128, %s74_s11, [#allocation3]  }
  0x15   : > { %86 = sbr.rel (%p265_p2) target bundleno = 42 (0x2a), region = 24 }
  0x1a   : > { %234 = dma.done.wait (%p269_p3), [#allocation3], 128  }
  0x1b   : > { %236 = vsyncadd (%p269_p3), [#allocation3], 4294967168  ;;  %s246_s15 = smov [#allocation5]   ;;  %p286_p0 = scmp.eq.s32.totalorder %s144_s7, 1  ;;  %v96_v0 = vld [vmem:[#allocation2] sm:$0xff] }
  0x1c   : > { %s105_s16 = sshll.u32 %s246_s15, 4  ;;  %97 = vst [vmem:[#allocation5] sm:$0xff] %v96_v0  ;;  %s106_s16 = int_to_ptr.vmem [resolvable:$true] %s105_s16 }
  0x1d   : > { %s205_s18 = scalar_lea.vmem %s106_s16, 128  ;;  %p212_p5 = scmp.lt.s32.totalorder %s106_s16, %s106_s16 }
  0x1e   : > { %p206_p1 = scmp.ne.s32.totalorder %s106_s16, %s205_s18  ;;  %p213_p6 = scmp.lt.s32.totalorder %s205_s18, %s205_s18 }
  0x20   : > { %p207_p2 = pnand %p206_p1, %p286_p0  ;;  %p214_p7 = por %p213_p6, %p212_p5 }
  0x22   : > { %p208_p4 = pneg %p207_p2 }
  0x24   : > { %p215_p8 = pnand %p214_p7, %p208_p4 }
  0x26   : > { %218 = shalt.err (!%p215_p8)
}
  0x27   : > { %158 = dma.vmem_to_hbm [thread:$0]  (%p286_p0), %s106_s16, 128, %s305_s1, [#allocation4]  }
  0x28   : > { %238 = dma.done.wait (%p286_p0), [#allocation4], 128  }
  0x29   : > { %240 = vsyncadd (%p286_p0), [#allocation4], 4294967168 }
  0x2a PF: > { %s13_s6 = sadd.s32 1, %s243_s6  }
  0x2b   : > { %p10_p3 = scmp.ge.s32.totalorder %s13_s6, 4  }
  0x2d   :  { %12 = sbr.rel (!%p10_p3) target bundleno = 2 (0x2), region = 53 }
  0x32   :  { %118 = vsyncpa [#allocation3], 1 }
  0x33   :  { %120 = vsyncpa [#allocation3 + $0x1], 1 }
  0x34   :  { %121 = vsyncpa [#allocation4], 1 }
  0x35   :  { %123 = vsyncpa [#allocation4 + $0x1], 1 }

// kernel: tpu_custom_call.1
= control target key start
LH: loop header
LB: loop body
LE: loop exit
PB: predicated region body
PF: predicated region fallthrough
CT: control target
= control target key end

     0   :  { %s7232_s0 = inlined_call_operand.hbm [shape: f32[2,16,256], index: 0, kind: input, shape index: {}]   ;;  %s7233_s1 = inlined_call_operand.hbm [shape: f32[1,256], index: 1, kind: input, shape index: {}]   ;;  %s7234_s2 = inlined_call_operand.vmem [shape: f32[1,256], index: 2, kind: input, shape index: {}]   ;;  %s7235_s3 = inlined_call_operand.vmem [shape: f32[1,256], index: 3, kind: input, shape index: {}]   ;;  %s7236_s4 = inlined_call_operand.hbm [shape: bf16[256,256], index: 4, kind: input, shape index: {}]   ;;  %s7237_s5 = inlined_call_operand.vmem [shape: f32[1,256], index: 5, kind: input, shape index: {}]   ;;  %s7238_s6 = inlined_call_operand.hbm [shape: bf16[256,256], index: 6, kind: input, shape index: {}]   ;;  %s7239_s7 = inlined_call_operand.vmem [shape: f32[1,256], index: 7, kind: input, shape index: {}]   ;;  %s7240_s8 = inlined_call_operand.hbm [shape: bf16[256,256], index: 8, kind: input, shape index: {}]   ;;  %s7241_s9 = inlined_call_operand.hbm [shape: f32[1,256], index: 9, kind: input, shape index: {}]   ;;  %s7242_s10 = inlined_call_operand.hbm [shape: bf16[256,256], index: 10, kind: input, shape index: {}]   ;;  %s7243_s11 = inlined_call_operand.vmem [shape: f32[1,256], index: 11, kind: input, shape index: {}]   ;;  %s7244_s12 = inlined_call_operand.vmem [shape: f32[1,256], index: 12, kind: input, shape index: {}]   ;;  %s7245_s13 = inlined_call_operand.vmem [shape: f32[1,256], index: 13, kind: input, shape index: {}]   ;;  %s7246_s14 = inlined_call_operand.hbm [shape: bf16[256,1024], index: 14, kind: input, shape index: {}]   ;;  %s7247_s15 = inlined_call_operand.vmem [shape: f32[1,1024], index: 15, kind: input, shape index: {}]   ;;  %s7248_s16 = inlined_call_operand.hbm [shape: bf16[1024,256], index: 16, kind: input, shape index: {}]   ;;  %s7249_s17 = inlined_call_operand.vmem [shape: f32[1,256], index: 17, kind: input, shape index: {}]   ;;  %s7250_s18 = inlined_call_operand.hbm [shape: f32[2,16,256], index: 18, kind: output, shape index: {}]  }
   0x1   :  { %7261 = sst [smem:[#allocation25_spill]] %s7232_s0 }
   0x2   :  { %7262 = sst [smem:[#allocation26_spill]] %s7233_s1 }
   0x3   :  { %7263 = sst [smem:[#allocation27_spill]] %s7234_s2 }
   0x4   :  { %7264 = sst [smem:[#allocation28_spill]] %s7236_s4 }
   0x5   :  { %7265 = sst [smem:[#allocation29_spill]] %s7238_s6 }
   0x6   :  { %7266 = sst [smem:[#allocation30_spill]] %s7240_s8 }
   0x7   :  { %7267 = sst [smem:[#allocation31_spill]] %s7241_s9 }
   0x8   :  { %7268 = sst [smem:[#allocation32_spill]] %s7242_s10 }
   0x9   :  { %7269 = sst [smem:[#allocation33_spill]] %s7246_s14 }
   0xa   :  { %7270 = sst [smem:[#allocation34_spill]] %s7248_s16 }
   0xb   :  { %7271 = sst [smem:[#allocation35_spill]] %s7249_s17 }
   0xc   :  { %7272 = sst [smem:[#allocation36_spill]] %s7250_s18 }
   0xd   :  { %23 = vsyncpa [#allocation3], 0 }
   0xe   :  { %25 = vsyncpa [#allocation3 + $0x1], 0 }
   0xf   :  { %26 = vsyncpa [#allocation6], 0 }
  0x10   :  { %27 = vsyncpa [#allocation9], 0 }
  0x11   :  { %28 = vsyncpa [#allocation12], 0 }
  0x12   :  { %29 = vsyncpa [#allocation15], 0 }
  0x13   :  { %30 = vsyncpa [#allocation4], 0 }
  0x14   :  { %32 = vsyncpa [#allocation4 + $0x1], 0  ;;  %s6611_s27 = smov 0   ;;  %s6613_s28 = smov 0  }
  0x15   :  { %s6615_s29 = smov 0   ;;  %s6617_s30 = smov 0  }
  0x16 LB: > { %s6493_s0 = smov [#allocation5]   ;;  %s6632_s1 = sadd.s32 4294967295, %s6491_s30   ;;  %s6491_s30 = sphi %s6617_s30, %s7313_s30   ;;  %s6487_s29 = sphi %s6615_s29, %s7312_s29   ;;  %s6483_s28 = sphi %s6613_s28, %s7311_s28   ;;  %s6479_s27 = sphi %s6611_s27, %s7310_s27  }
  0x17   : > { %s465_s19 = sshll.u32 %s6493_s0, 4  ;;  %p5158_p0 = scmp.ge.s32.totalorder %s6491_s30, 1  ;;  %s466_s19 = int_to_ptr.vmem [resolvable:$true] %s465_s19 }
  0x18   : > { %p7257_p1 = scmp.eq.s32.totalorder %s6632_s1, 0  ;;  %p452_p2 = scmp.lt.s32.totalorder %s6491_s30, 3 }
  0x19   : > { %s6494_s21 = smov [#allocation8]   ;;  %s6495_s23 = smov [#allocation11]  }
  0x1a   : > { %p6637_p3 = pnand %p5158_p0, %p452_p2  ;;  %s497_s22 = sshll.u32 %s6494_s21, 4  ;;  %s6650_s22 = int_to_ptr.vmem [resolvable:$true] %s497_s22 }
  0x1b   : > { %s527_s24 = sshll.u32 %s6495_s23, 4  ;;  %s6186_s26 = scalar_lea.vmem %s466_s19, 32  ;;  %s6652_s24 = int_to_ptr.vmem [resolvable:$true] %s527_s24 }
  0x1c   : > { %s7273_s20 = scalar_select %p6637_p3, 1, 0 }
  0x1d   : > { %p5659_p5 = pneg %p6637_p3  ;;  %p6187_p8 = scmp.ne.s32.totalorder %s466_s19, %s6186_s26 }
  0x1e   : > { %p6194_p11 = scmp.lt.s32.totalorder %s466_s19, %s466_s19  ;;  %p6195_p12 = scmp.lt.s32.totalorder %s6186_s26, %s6186_s26 }
  0x1f   : > { %p6646_p6 = pnand %p5659_p5, %p7257_p1 }
  0x20   : > { %p6196_p13 = por %p6195_p12, %p6194_p11 }
  0x21   : > { %p6656_p7 = pneg %p6646_p6 }
  0x23   : > { %p6189_p9 = pnand %p6187_p8, %p6656_p7 }
  0x25   : > { %p6190_p10 = pneg %p6189_p9 }
  0x27   : > { %p6197_p0 = pnand %p6196_p13, %p6190_p10 }
  0x29   : > { %6200 = shalt.err (!%p6197_p0)
}
  0x2a   : > { %s7276_s23 = sld [smem:[#allocation26_spill]]  ;;  %s6212_s18 = scalar_lea.vmem %s6650_s22, 4096 }
  0x2b   : > { %p6213_p2 = scmp.ne.s32.totalorder %s6650_s22, %s6212_s18  ;;  %p6220_p9 = scmp.lt.s32.totalorder %s6650_s22, %s6650_s22 }
  0x2c   : > { %p6221_p11 = scmp.lt.s32.totalorder %s6212_s18, %s6212_s18 }
  0x2d   : > { %p6215_p5 = pnand %p6213_p2, %p6656_p7 }
  0x2e   : > { %p6222_p10 = por %p6221_p11, %p6220_p9 }
  0x2f   : > { %p6216_p8 = pneg %p6215_p5 }
  0x30   : > { %5662 = dma.hbm_to_vmem [thread:$0]  (!%p6646_p6), %s7276_s23, 32, %s466_s19, [#allocation6]  }
  0x31   : > { %p6223_p12 = pnand %p6222_p10, %p6216_p8 }
  0x33   : > { %6226 = shalt.err (!%p6223_p12)
}
  0x34   : > { %s7253_s26 = smov 128   ;;  %s7255_s0 = smov 8  }
  0x35   : > { %s7277_s6 = sld [smem:[#allocation29_spill]]  ;;  %s6238_s18 = scalar_lea.vmem %s6652_s24, 32 }
  0x36   : > { %p6239_p13 = scmp.ne.s32.totalorder %s6652_s24, %s6238_s18  ;;  %p6246_p5 = scmp.lt.s32.totalorder %s6652_s24, %s6652_s24 }
  0x37   : > { %p6247_p8 = scmp.lt.s32.totalorder %s6238_s18, %s6238_s18 }
  0x38   : > { %p6241_p0 = pnand %p6239_p13, %p6656_p7 }
  0x39   : > { %p6248_p9 = por %p6247_p8, %p6246_p5 }
  0x3a   : > { %p6242_p2 = pneg %p6241_p0 }
  0x3b   : > { %5668 = dma.hbm_to_vmem [thread:$0]  (!%p6646_p6), %s7277_s6, 4096, %s6650_s22, [#allocation9], %s7253_s26, %s7253_s26, %s7255_s0  }
  0x3c   : > { %p6249_p11 = pnand %p6248_p9, %p6242_p2 }
  0x3e   : > { %6252 = shalt.err (!%p6249_p11)
}
  0x3f   : > { %s7278_s9 = sld [smem:[#allocation31_spill]]  ;;  %s6498_s22 = smov [#allocation14]  }
  0x40   : > { %s559_s19 = sshll.u32 %s6498_s22, 4  ;;  %s560_s19 = int_to_ptr.vmem [resolvable:$true] %s559_s19 }
  0x41   : > { %s6264_s21 = scalar_lea.vmem %s560_s19, 16384  ;;  %p6272_p0 = scmp.lt.s32.totalorder %s560_s19, %s560_s19 }
  0x42   : > { %p6265_p10 = scmp.ne.s32.totalorder %s560_s19, %s6264_s21  ;;  %p6273_p5 = scmp.lt.s32.totalorder %s6264_s21, %s6264_s21 }
  0x44   : > { %p6267_p12 = pnand %p6265_p10, %p6656_p7  ;;  %p6274_p2 = por %p6273_p5, %p6272_p0 }
  0x45   : > { %5674 = dma.hbm_to_vmem [thread:$0]  (!%p6646_p6), %s7278_s9, 32, %s6652_s24, [#allocation12]  }
  0x46   : > { %p6268_p13 = pneg %p6267_p12 }
  0x48   : > { %p6275_p8 = pnand %p6274_p2, %p6268_p13 }
  0x4a   : > { %6278 = shalt.err (!%p6275_p8)
}
  0x4b   : > { %s6499_s18 = smov 512   ;;  %s6500_s26 = smov 32  }
  0x4c   : > { %s7279_s14 = sld [smem:[#allocation33_spill]]  ;;  %s6501_s23 = smov [#allocation7]  }
  0x4d   : > { %s481_s22 = sshll.u32 %s6501_s23, 4  ;;  %s6502_s0 = smov [#allocation10]   ;;  %s482_s22 = int_to_ptr.vmem [resolvable:$true] %s481_s22 }
  0x4e   : > { %s513_s6 = sshll.u32 %s6502_s0, 4  ;;  %s6290_s9 = scalar_lea.vmem %s482_s22, 4096  ;;  %s514_s6 = int_to_ptr.vmem [resolvable:$true] %s513_s6 }
  0x4f   : > { %p6291_p9 = scmp.ne.s32.totalorder %s482_s22, %s6290_s9  ;;  %p6298_p12 = scmp.lt.s32.totalorder %s482_s22, %s482_s22 }
  0x50   : > { %p6299_p13 = scmp.lt.s32.totalorder %s6290_s9, %s6290_s9 }
  0x51   : > { %p6293_p11 = pnand %p6291_p9, %p6656_p7 }
  0x52   : > { %5680 = dma.hbm_to_vmem [thread:$0]  (!%p6646_p6), %s7279_s14, 16384, %s560_s19, [#allocation15], %s6499_s18, %s6499_s18, %s6500_s26  }
  0x53   : > { %p6294_p10 = pneg %p6293_p11  ;;  %p6300_p0 = por %p6299_p13, %p6298_p12 }
  0x55   : > { %p6301_p5 = pnand %p6300_p0, %p6294_p10 }
  0x57   : > { %6304 = shalt.err (!%p6301_p5)
}
  0x58   : > { %s7280_s21 = smov 8   ;;  %s7281_s26 = smov 128  }
  0x59   : > { %s7282_s4 = sld [smem:[#allocation28_spill]]  ;;  %s6316_s0 = scalar_lea.vmem %s514_s6, 4096 }
  0x5a   : > { %p6317_p2 = scmp.ne.s32.totalorder %s514_s6, %s6316_s0  ;;  %p6324_p11 = scmp.lt.s32.totalorder %s514_s6, %s514_s6 }
  0x5b   : > { %p6325_p4 = scmp.lt.s32.totalorder %s6316_s0, %s6316_s0 }
  0x5c   : > { %p6319_p8 = pnand %p6317_p2, %p6656_p7 }
  0x5d   : > { %p6326_p12 = por %p6325_p4, %p6324_p11 }
  0x5e   : > { %p6320_p9 = pneg %p6319_p8 }
  0x5f   : > { %5665 = dma.hbm_to_vmem [thread:$0]  (!%p6646_p6), %s7282_s4, 4096, %s482_s22, [#allocation6], %s7281_s26, %s7281_s26, %s7280_s21  }
  0x60   : > { %p6327_p10 = pnand %p6326_p12, %p6320_p9 }
  0x62   : > { %6330 = shalt.err (!%p6327_p10)
}
  0x63   : > { %s7283_s8 = sld [smem:[#allocation30_spill]]  ;;  %s6503_s24 = smov [#allocation13]  }
  0x64   : > { %s537_s23 = sshll.u32 %s6503_s24, 4  ;;  %s6504_s22 = smov [#allocation16]   ;;  %s538_s23 = int_to_ptr.vmem [resolvable:$true] %s537_s23 }
  0x65   : > { %s575_s19 = sshll.u32 %s6504_s22, 4  ;;  %s6342_s18 = scalar_lea.vmem %s538_s23, 4096  ;;  %s576_s19 = int_to_ptr.vmem [resolvable:$true] %s575_s19 }
  0x66   : > { %p6343_p4 = scmp.ne.s32.totalorder %s538_s23, %s6342_s18  ;;  %p6350_p5 = scmp.lt.s32.totalorder %s538_s23, %s538_s23 }
  0x67   : > { %p6351_p2 = scmp.lt.s32.totalorder %s6342_s18, %s6342_s18 }
  0x68   : > { %p6345_p13 = pnand %p6343_p4, %p6656_p7 }
  0x69   : > { %5671 = dma.hbm_to_vmem [thread:$0]  (!%p6646_p6), %s7283_s8, 4096, %s514_s6, [#allocation9], %s7281_s26, %s7281_s26, %s7280_s21  }
  0x6a   : > { %p6346_p0 = pneg %p6345_p13  ;;  %p6352_p8 = por %p6351_p2, %p6350_p5 }
  0x6c   : > { %p6353_p9 = pnand %p6352_p8, %p6346_p0 }
  0x6e   : > { %6356 = shalt.err (!%p6353_p9)
}
  0x6f   : > { %s7284_s10 = sld [smem:[#allocation32_spill]]  ;;  %s6368_s9 = scalar_lea.vmem %s576_s19, 16384 }
  0x70   : > { %p6369_p11 = scmp.ne.s32.totalorder %s576_s19, %s6368_s9  ;;  %p6376_p4 = scmp.lt.s32.totalorder %s576_s19, %s576_s19 }
  0x71   : > { %p6377_p13 = scmp.lt.s32.totalorder %s6368_s9, %s6368_s9 }
  0x72   : > { %p6371_p12 = pnand %p6369_p11, %p6656_p7 }
  0x73   : > { %p6378_p5 = por %p6377_p13, %p6376_p4 }
  0x74   : > { %p6372_p10 = pneg %p6371_p12 }
  0x75   : > { %5677 = dma.hbm_to_vmem [thread:$0]  (!%p6646_p6), %s7284_s10, 4096, %s538_s23, [#allocation12], %s7281_s26, %s7281_s26, %s7280_s21  }
  0x76   : > { %p6379_p0 = pnand %p6378_p5, %p6372_p10 }
  0x78   : > { %6382 = shalt.err (!%p6379_p0)
}
  0x79   : > { %s7285_s16 = sld [smem:[#allocation34_spill]]  ;;  %s5157_s2 = sadd.s32 4294967294, %s6491_s30  }
  0x7a   : > { %s6743_s25 = sadd.s32 1, %s6491_s30   ;;  %s45_s22 = sadd.s32 1, %s6487_s29 }
  0x7b   : > { %s42_s23 = ssub.s32 %s6491_s30, %s6743_s25  ;;  %p52_p2 = scmp.ne.s32.totalorder %s6487_s29, %s6483_s28 }
  0x7c   : > { %p43_p7 = scmp.eq.s32.totalorder %s42_s23, 0  ;;  %p53_p8 = scmp.eq.s32.totalorder %s6491_s30, 0 }
  0x7d   : > { %p58_p9 = scmp.ne.s32.totalorder %s6483_s28, %s6479_s27  ;;  %p439_p12 = scmp.eq.s32.totalorder %s6632_s1, 1 }
  0x7e   : > { %s6754_s18 = scalar_select %p43_p7, %s6487_s29, %s45_s22  }
  0x7f   : > { %5683 = dma.hbm_to_vmem [thread:$0]  (!%p6646_p6), %s7285_s16, 16384, %s576_s19, [#allocation15], %s7281_s26, %s7281_s26, %s7280_s21  }
  0x80   : > { %7286 = sst [smem:[#allocation24_spill]] %s6754_s18  ;;  %p6756_p11 = por %p53_p8, %p52_p2 }
  0x81   : > { %p6762_p6 = por %p7257_p1, %p58_p9  ;;  %p445_p10 = scmp.eq.s32.totalorder %s5157_s2, 1 }
  0x82   : > { %p5700_p4 = scmp.lt.s32.totalorder %s6491_s30, 2  ;;  %s592_s26 = sand.u32 1, %s6487_s29  }
  0x83   : > { %s7288_s21 = scalar_select %p6762_p6, 1, 0 }
  0x84   : > { %p6769_p13 = por %p439_p12, %p52_p2  ;;  %p6773_p5 = por %p445_p10, %p58_p9 }
  0x85   : > { %s5168_s9 = sshll.u32 %s592_s26, 5  ;;  %s5589_s17 = sshll.u32 %s6491_s30, 9 }
  0x86   : > { %s7289_s19 = scalar_select %p6769_p13, 1, 0 }
  0x87   : > { %s7290_s0 = scalar_select %p6773_p5, 1, 0 }
  0x88   : > { %s7291_s22 = sld [smem:[#allocation25_spill]]  ;;  %s596_s2 = scalar_lea.vmem [#allocation2], %s5168_s9 }
  0x89   : > { %s603_s8 = sshll.u32 %s596_s2, 4  ;;  %p6787_p0 = pnand %p5700_p4, %p6756_p11  ;;  %s6783_s8 = int_to_ptr.vmem [resolvable:$true] %s603_s8 }
  0x8a   : > { %s6791_s14 = scalar_lea.sflag [#allocation3], %s592_s26 }
  0x8b   : > { %p6385_p2 = pneg %p6787_p0 }
  0x8e   : > { %s6781_s4 = scalar_lea.hbm %s7291_s22, %s5589_s17  ;;  %s6388_s9 = scalar_lea.hbm %s7291_s22, 1024 }
  0x8f   : > { %s6383_s16 = scalar_lea.hbm %s6781_s4, 512  ;;  %p6389_p11 = scmp.lt.s32.totalorder %s6781_s4, %s7291_s22 }
  0x90   : > { %p6384_p7 = scmp.ne.s32.totalorder %s6781_s4, %s6383_s16  ;;  %p6390_p12 = scmp.lt.s32.totalorder %s6388_s9, %s6383_s16 }
  0x92   : > { %p6386_p8 = pnand %p6385_p2, %p6384_p7  ;;  %p6391_p10 = por %p6390_p12, %p6389_p11 }
  0x94   : > { %p6387_p9 = pneg %p6386_p8 }
  0x96   : > { %p6392_p4 = pnand %p6391_p10, %p6387_p9 }
  0x98   : > { %6395 = shalt.err (!%p6392_p4)
}
  0x99   : > { %s6396_s6 = scalar_lea.vmem %s6783_s8, 512  ;;  %s6505_s26 = smov [#allocation2]  }
  0x9a   : > { %p6397_p1 = scmp.ne.s32.totalorder %s6783_s8, %s6396_s6  ;;  %s6401_s18 = sshll.u32 %s6505_s26, 4  ;;  %s6402_s18 = int_to_ptr.vmem [resolvable:$false] %s6401_s18 }
  0x9b   : > { %s6403_s17 = scalar_lea.vmem %s6402_s18, 1024  ;;  %p6404_p8 = scmp.lt.s32.totalorder %s6783_s8, %s6402_s18 }
  0x9c   : > { %p6399_p5 = pnand %p6397_p1, %p6385_p2  ;;  %p6405_p13 = scmp.lt.s32.totalorder %s6403_s17, %s6396_s6 }
  0x9e   : > { %p6400_p7 = pneg %p6399_p5  ;;  %p6406_p6 = por %p6405_p13, %p6404_p8 }
  0xa0   : > { %p6407_p3 = pnand %p6406_p6, %p6400_p7 }
  0xa2   : > { %6410 = shalt.err (!%p6407_p3)
}
  0xa3   : > { %s6506_s16 = smov 256   ;;  %s6507_s24 = smov 16  }
  0xa4   : > { %5687 = dma.hbm_to_vmem [thread:$0]  (!%p6787_p0), %s6781_s4, 512, %s6783_s8, %s6791_s14, %s6506_s16, %s6506_s16, %s6507_s24  }
  0xa5   : > { %p7293_p1 = scmp.ne.s32.totalorder %s7273_s20, 0 }
  0xa6   : > { %s6815_s9 = sand.u32 (!%p7293_p1), 1, %s6483_s28   ;;  %p7294_p3 = scmp.ne.s32.totalorder (!%p7293_p1), %s7288_s21, 0 }
  0xa7   : > { %615 = sbr.rel (%p7293_p1) target bundleno = 2497 (0x9c1), region = 92  ;;  %s5172_s18 = sshll.u32 (!%p7293_p1), %s6815_s9, 5 }
  0xa8   : > { %s618_s23 = scalar_lea.sflag (!%p7293_p1), [#allocation3], %s6815_s9  ;;  %s6821_s2 = scalar_lea.vmem (!%p7293_p1), [#allocation2], %s5172_s18 }
  0xac   : > { %6454 = dma.done.wait (%p7294_p3), %s618_s23, 512  }
  0xad   : > { %6456 = vsyncadd (%p7294_p3), %s618_s23, 4294966784  ;;  %p7295_p6 = scmp.eq.s32.totalorder %s6632_s1, 0 }
  0xaf   : > { %6458 = dma.done.wait (%p7295_p6), [#allocation6], 4128   ;;  %p7296_p13 = pmov %p7295_p6 }
  0xb0   : > { %p7297_p5 = pmov %p7295_p6 }
  0xb1   : > { %6460 = vsyncadd (%p7296_p13), [#allocation6], 4294963168 }
  0xb2   : > { %6462 = dma.done.wait (%p7297_p5), [#allocation9], 8192   ;;  %p7298_p0 = pmov %p7297_p5 }
  0xb4   : > { %6464 = vsyncadd (%p7298_p0), [#allocation9], 4294959104  ;;  %p7299_p2 = pmov %p7298_p0 }
  0xb5   : > { %p7300_p9 = pmov %p7298_p0 }
  0xb6   : > { %6466 = dma.done.wait (%p7299_p2), [#allocation12], 4128  }
  0xb7   : > { %6468 = vsyncadd (%p7300_p9), [#allocation12], 4294963168  ;;  %p7301_p11 = pmov %p7298_p0 }
  0xb8   : > { %p7302_p12 = pmov %p7298_p0 }
  0xb9   : > { %6470 = dma.done.wait (%p7301_p11), [#allocation15], 32768  }
  0xba   : > { %6472 = vsyncadd (%p7302_p12), [#allocation15], 4294934528  ;;  %v6844_v0 = vld [vmem:[%s6821_s2] sm:$0xff]  ;;  %v6847_v1 = vld [vmem:[%s6821_s2 + $0x8] sm:$0xff]  ;;  %s7303_s10 = sld [smem:[#allocation27_spill]]  ;;  %vm6509_vm2 = vmmov 0  }
  0xbb   : > { %v6850_v2 = vld [vmem:[%s6821_s2 + $0x10] sm:$0xff]  ;;  %v713_v3 = vadd.f32 %v6847_v1, %v6844_v0  ;;  %v6855_v4 = vld [vmem:[%s6821_s2 + $0x18] sm:$0xff]  ;;  %v5771_v12 = vld [vmem:[#allocation7 + $0x60] ss:$8 sps:$4 sm:$0xff]   ;;  %vm2326_vm8 = vcmask 130048   ;;  %s7304_s6 = sld [smem:[#allocation35_spill]] }
  0xbc   : > { %v716_v5 = vadd.f32 %v6855_v4, %v6850_v2  ;;  %v5763_v6 = vld [vmem:[#allocation7 + $0x74] ss:$8 sps:$4 sm:$0xff]   ;;  %v5765_v7 = vld [vmem:[#allocation7 + $0x70] ss:$8 sps:$4 sm:$0xff]   ;;  %v5769_v10 = vld [vmem:[#allocation7 + $0x64] ss:$8 sps:$4 sm:$0xff]  }
  0xbd   : > { %714 = vadd.xlane.f32.xlu0 %v713_v3  ;;  %v5766_v8 = vld [vmem:[#allocation8 + $0x74] ss:$8 sps:$4 sm:$0xff]   ;;  %v5768_v9 = vld [vmem:[#allocation8 + $0x70] ss:$8 sps:$4 sm:$0xff]   ;;  %1036 = vmatprep.subr.bf16.mxu0 %v5763_v6  ;;  %v5772_v11 = vld [vmem:[#allocation8 + $0x64] ss:$8 sps:$4 sm:$0xff]  }
  0xbe   : > { %1283 = vmatprep.subr.bf16.mxu1 %v5766_v8  ;;  %1037 = vmatpush1.bf16.msra.mxu0 %v5765_v7  ;;  %v5774_v13 = vld [vmem:[#allocation8 + $0x60] ss:$8 sps:$4 sm:$0xff]   ;;  %v5775_v14 = vld [vmem:[#allocation7 + $0x54] ss:$8 sps:$4 sm:$0xff]   ;;  %v5777_v16 = vld [vmem:[#allocation7 + $0x50] ss:$8 sps:$4 sm:$0xff]  }
  0xbf   : > { %1284 = vmatpush1.bf16.msra.mxu1 %v5768_v9  ;;  %1038 = vmatprep.subr.bf16.mxu0 %v5769_v10  ;;  %v5778_v15 = vld [vmem:[#allocation8 + $0x54] ss:$8 sps:$4 sm:$0xff]   ;;  %v5780_v17 = vld [vmem:[#allocation8 + $0x50] ss:$8 sps:$4 sm:$0xff]   ;;  %v5781_v18 = vld [vmem:[#allocation7 + $0x44] ss:$8 sps:$4 sm:$0xff]  }
  0xc0   : > { %1285 = vmatprep.subr.bf16.mxu1 %v5772_v11  ;;  %v5784_v19 = vld [vmem:[#allocation8 + $0x44] ss:$8 sps:$4 sm:$0xff]   ;;  %v5783_v20 = vld [vmem:[#allocation7 + $0x40] ss:$8 sps:$4 sm:$0xff]   ;;  %v5787_v22 = vld [vmem:[#allocation7 + $0x34] ss:$8 sps:$4 sm:$0xff]  }
  0xc1   : > { %717 = vadd.xlane.f32.xlu0 %v716_v5  ;;  %v5786_v21 = vld [vmem:[#allocation8 + $0x40] ss:$8 sps:$4 sm:$0xff]   ;;  %v5790_v23 = vld [vmem:[#allocation8 + $0x34] ss:$8 sps:$4 sm:$0xff]   ;;  %v5789_v24 = vld [vmem:[#allocation7 + $0x30] ss:$8 sps:$4 sm:$0xff]  }
  0xc2   : > { %1039 = vmatpush1.bf16.msra.mxu0 %v5771_v12  ;;  %v5792_v25 = vld [vmem:[#allocation8 + $0x30] ss:$8 sps:$4 sm:$0xff]   ;;  %v5793_v26 = vld [vmem:[#allocation7 + $0x24] ss:$8 sps:$4 sm:$0xff]   ;;  %v5795_v28 = vld [vmem:[#allocation7 + $0x20] ss:$8 sps:$4 sm:$0xff]  }
  0xc3   : > { %1286 = vmatpush1.bf16.msra.mxu1 %v5774_v13  ;;  %1040 = vmatprep.subr.bf16.mxu0 %v5775_v14  ;;  %v5796_v27 = vld [vmem:[#allocation8 + $0x24] ss:$8 sps:$4 sm:$0xff]   ;;  %v5798_v29 = vld [vmem:[#allocation8 + $0x20] ss:$8 sps:$4 sm:$0xff]   ;;  %v5799_v30 = vld [vmem:[#allocation7 + $0x14] ss:$8 sps:$4 sm:$0xff]  }
  0xc4   : > { %1287 = vmatprep.subr.bf16.mxu1 %v5778_v15  ;;  %v5802_v31 = vld [vmem:[#allocation8 + $0x14] ss:$8 sps:$4 sm:$0xff]   ;;  %v5801_v32 = vld [vmem:[#allocation7 + $0x10] ss:$8 sps:$4 sm:$0xff]   ;;  %v5805_v48 = vld [vmem:[#allocation7 + $0x4] ss:$8 sps:$4 sm:$0xff]  }
  0xc5   : > { %v5804_v47 = vld [vmem:[#allocation8 + $0x10] ss:$8 sps:$4 sm:$0xff]   ;;  %v5807_v49 = vld [vmem:[#allocation7] ss:$8 sps:$4 sm:$0xff]   ;;  %v5808_v50 = vld [vmem:[#allocation8 + $0x4] ss:$8 sps:$4 sm:$0xff]  }
  0xc6   : > { %1041 = vmatpush1.bf16.msra.mxu0 %v5777_v16  ;;  %v5810_v51 = vld [vmem:[#allocation8] ss:$8 sps:$4 sm:$0xff]   ;;  %v5811_v52 = vld [vmem:[#allocation7 + $0xf4] ss:$8 sps:$4 sm:$0xff]   ;;  %v5813_v53 = vld [vmem:[#allocation7 + $0xf0] ss:$8 sps:$4 sm:$0xff]  }
  0xc7   : > { %1288 = vmatpush1.bf16.msra.mxu1 %v5780_v17  ;;  %1042 = vmatprep.subr.bf16.mxu0 %v5781_v18  ;;  %v5814_v54 = vld [vmem:[#allocation8 + $0xf4] ss:$8 sps:$4 sm:$0xff]   ;;  %v5816_v55 = vld [vmem:[#allocation8 + $0xf0] ss:$8 sps:$4 sm:$0xff]   ;;  %v5817_v56 = vld [vmem:[#allocation7 + $0xe4] ss:$8 sps:$4 sm:$0xff]  }
  0xc8   : > { %1289 = vmatprep.subr.bf16.mxu1 %v5784_v19  ;;  %v5819_v57 = vld [vmem:[#allocation7 + $0xe0] ss:$8 sps:$4 sm:$0xff]   ;;  %v5820_v58 = vld [vmem:[#allocation8 + $0xe4] ss:$8 sps:$4 sm:$0xff]   ;;  %v5823_v60 = vld [vmem:[#allocation7 + $0xd4] ss:$8 sps:$4 sm:$0xff]  }
  0xc9   : > { %v5822_v59 = vld [vmem:[#allocation8 + $0xe0] ss:$8 sps:$4 sm:$0xff]   ;;  %v5826_v61 = vld [vmem:[#allocation8 + $0xd4] ss:$8 sps:$4 sm:$0xff]   ;;  %v5825_v62 = vld [vmem:[#allocation7 + $0xd0] ss:$8 sps:$4 sm:$0xff]  }
  0xca   : > { %1043 = vmatpush1.bf16.msra.mxu0 %v5783_v20  ;;  %v5828_v63 = vld [vmem:[#allocation8 + $0xd0] ss:$8 sps:$4 sm:$0xff]   ;;  %v5834_v3 = vld [vmem:[#allocation8 + $0xc0] ss:$8 sps:$4 sm:$0xff]   ;;  %v5838_v5 = vld [vmem:[#allocation8 + $0xb4] ss:$8 sps:$4 sm:$0xff]  }
  0xcb   : > { %1290 = vmatpush1.bf16.msra.mxu1 %v5786_v21  ;;  %1044 = vmatprep.subr.bf16.mxu0 %v5787_v22  ;;  %v5837_v6 = vld [vmem:[#allocation7 + $0xb0] ss:$8 sps:$4 sm:$0xff]   ;;  %v5841_v8 = vld [vmem:[#allocation7 + $0xa4] ss:$8 sps:$4 sm:$0xff]   ;;  %v5843_v10 = vld [vmem:[#allocation7 + $0xa0] ss:$8 sps:$4 sm:$0xff]  }
  0xcc   : > { %1291 = vmatprep.subr.bf16.mxu1 %v5790_v23  ;;  %v5840_v7 = vld [vmem:[#allocation8 + $0xb0] ss:$8 sps:$4 sm:$0xff]   ;;  %v5844_v9 = vld [vmem:[#allocation8 + $0xa4] ss:$8 sps:$4 sm:$0xff]   ;;  %v5846_v11 = vld [vmem:[#allocation8 + $0xa0] ss:$8 sps:$4 sm:$0xff]  }
  0xcd   : > { %v5847_v12 = vld [vmem:[#allocation7 + $0x94] ss:$8 sps:$4 sm:$0xff]   ;;  %v5849_v14 = vld [vmem:[#allocation7 + $0x90] ss:$8 sps:$4 sm:$0xff]   ;;  %v5853_v16 = vld [vmem:[#allocation7 + $0x84] ss:$8 sps:$4 sm:$0xff]  }
  0xce   : > { %1045 = vmatpush1.bf16.msra.mxu0 %v5789_v24  ;;  %v5850_v13 = vld [vmem:[#allocation8 + $0x94] ss:$8 sps:$4 sm:$0xff]   ;;  %v5852_v15 = vld [vmem:[#allocation8 + $0x90] ss:$8 sps:$4 sm:$0xff]   ;;  %v5856_v17 = vld [vmem:[#allocation8 + $0x84] ss:$8 sps:$4 sm:$0xff]  }
  0xcf   : > { %1292 = vmatpush1.bf16.msra.mxu1 %v5792_v25  ;;  %1046 = vmatprep.subr.bf16.mxu0 %v5793_v26  ;;  %v5855_v18 = vld [vmem:[#allocation7 + $0x80] ss:$8 sps:$4 sm:$0xff]   ;;  %v5861_v20 = vld [vmem:[#allocation10 + $0x74] ss:$8 sps:$4 sm:$0xff]   ;;  %v747_v26 = vlaneseq  ;;  %s705_s26 = scalar_lea.vmem [#allocation17], %s5172_s18  ;;  %s5590_s16 = sshll.u32 %s6632_s1, 9 }
  0xd0   : > { %1293 = vmatprep.subr.bf16.mxu1 %v5796_v27  ;;  %v5858_v19 = vld [vmem:[#allocation8 + $0x80] ss:$8 sps:$4 sm:$0xff]   ;;  %s5008_s17 = sshll.u32 %s705_s26, 4  ;;  %s7305_s23 = sld [smem:[#allocation36_spill]]  ;;  %s7182_s17 = int_to_ptr.vmem [resolvable:$true] %s5008_s17 }
  0xd1   : > { %s4995_s1 = scalar_lea.sflag [#allocation4], %s6815_s9  ;;  %s6411_s4 = scalar_lea.vmem %s7182_s17, 512 }
  0xd2   : > { %1047 = vmatpush1.bf16.msra.mxu0 %v5795_v28  ;;  %v6880_v28 = vshrl.u32 %v747_v26, 7  ;;  %p6412_p10 = scmp.ne.s32.totalorder %s7182_s17, %s6411_s4  ;;  %p7306_p4 = scmp.ne.s32.totalorder %s7289_s19, 0 }
  0xd3   : > { %1294 = vmatpush1.bf16.msra.mxu1 %v5798_v29  ;;  %1048 = vmatprep.subr.bf16.mxu0 %v5799_v30  ;;  %s6513_s8 = smov [#allocation17]  }
  0xd4   : > { %1295 = vmatprep.subr.bf16.mxu1 %v5802_v31  ;;  %v6883_v29 = vsub.s32 1, %v6880_v28  ;;  %v6886_v30 = vsub.s32 0, %v6880_v28  ;;  %v711_v31 = vld [vmem:[#allocation5] sm:$0x3]  ;;  %vm779_vm0 = vcmp.eq.s32.totalorder %v6880_v28, 0  ;;  %vm785_vm1 = vcmp.lt.s32.totalorder %v6880_v28, 1  ;;  %p6413_p7 = pnand %p6412_p10, %p7306_p4 }
  0xd5   : > { %vm2311_vm3 = vcmp.lt.s32.totalorder %v6880_v28, 4 }
  0xd6   : > { %1049 = vmatpush1.bf16.msra.mxu0 %v5801_v32  ;;  %v754_v32 = vrot.slane %v711_v31, %v6883_v29  ;;  %p6414_p8 = pneg %p6413_p7 }
  0xd7   : > { %1296 = vmatpush1.bf16.msra.mxu1 %v5804_v47  ;;  %1050 = vmatprep.subr.bf16.mxu0 %v5805_v48  ;;  %v794_v48 = vld [vmem:[%s7235_s3] sm:$0x3] }
  0xd8   : > { %1297 = vmatprep.subr.bf16.mxu1 %v5808_v50  ;;  %v810_v50 = vsub.f32 1.0, %v794_v48 }
  0xda   : > { %1051 = vmatpush1.bf16.msra.mxu0 %v5807_v49 }
  0xdb   : > { %1298 = vmatpush1.bf16.msra.mxu1 %v5810_v51  ;;  %1052 = vmatprep.subr.bf16.mxu0 %v5811_v52 }
  0xdc   : > { %1299 = vmatprep.subr.bf16.mxu1 %v5814_v54  ;;  %v803_v54 = vrot.slane %v794_v48, %v6883_v29 }
  0xde   : > { %1053 = vmatpush2.bf16.msra.mxu0 %v5813_v53 }
  0xdf   : > { %1300 = vmatpush2.bf16.msra.mxu1 %v5816_v55  ;;  %1054 = vmatprep.subr.bf16.mxu0 %v5817_v56  ;;  %v799_v56 = vrot.slane %v794_v48, %v6886_v30  ;;  %v5897_v48 = vld [vmem:[#allocation10 + $0xb4] ss:$8 sps:$4 sm:$0xff]  }
  0xe0   : > { %1301 = vmatprep.subr.bf16.mxu1 %v5820_v58 }
  0xe2   : > { %1055 = vmatpush2.bf16.msra.mxu0 %v5819_v57  ;;  %v815_v57 = vrot.slane %v810_v50, %v6886_v30 }
  0xe3   : > { %1302 = vmatpush2.bf16.msra.mxu1 %v5822_v59  ;;  %1056 = vmatprep.subr.bf16.mxu0 %v5823_v60 }
  0xe4   : > { %1303 = vmatprep.subr.bf16.mxu1 %v5826_v61 }
  0xe6   : > { %1057 = vmatpush2.bf16.msra.mxu0 %v5825_v62 }
  0xe7   : > { %1304 = vmatpush2.bf16.msra.mxu1 %v5828_v63 }
 0x146   : > { %v715_v33 = vpop.xlane.xlu0 %714 }
 0x147   : > { %v720_v34 = vmul.f32 0.00390625, %v715_v33  ;;  %v750_v33 = vrot.slane %v711_v31, %v6886_v30  ;;  %v5874_v31 = vld [vmem:[#allocation10 + $0x20] ss:$8 sps:$4 sm:$0xff]  }
 0x149   : > { %v6860_v35 = vsub.f32 %v6844_v0, %v720_v34  ;;  %v6863_v36 = vsub.f32 %v6847_v1, %v720_v34  ;;  %v5829_v0 = vld [vmem:[#allocation7 + $0xc4] ss:$8 sps:$4 sm:$0xff]  }
 0x14a   : > { %v718_v37 = vpop.xlane.xlu0 %717  ;;  %v5832_v1 = vld [vmem:[#allocation8 + $0xc4] ss:$8 sps:$4 sm:$0xff]   ;;  %1058 = vmatprep.subr.bf16.mxu0 %v5829_v0 }
 0x14b   : > { %v721_v38 = vmul.f32 0.00390625, %v718_v37  ;;  %v726_v39 = vmul.f32 %v6860_v35, %v6860_v35  ;;  %v727_v40 = vmul.f32 %v6863_v36, %v6863_v36  ;;  %1305 = vmatprep.subr.bf16.mxu1 %v5832_v1  ;;  %v712_v37 = vld [vmem:[%s7303_s10] sm:$0x3]  ;;  %s6415_s10 = sshll.u32 %s6513_s8, 4  ;;  %s6416_s10 = int_to_ptr.vmem [resolvable:$false] %s6415_s10 }
 0x14c   : > { %1306 = vmatpush2.bf16.msra.mxu1 %v5834_v3  ;;  %s6417_s14 = scalar_lea.vmem %s6416_s10, 1024  ;;  %p6418_p1 = scmp.lt.s32.totalorder %s7182_s17, %s6416_s10 }
 0x14d   : > { %v6870_v41 = vsub.f32 %v6850_v2, %v721_v38  ;;  %v6873_v42 = vsub.f32 %v6855_v4, %v721_v38  ;;  %v730_v43 = vadd.f32 %v727_v40, %v726_v39  ;;  %v5831_v2 = vld [vmem:[#allocation7 + $0xc0] ss:$8 sps:$4 sm:$0xff]   ;;  %v5835_v4 = vld [vmem:[#allocation7 + $0xb4] ss:$8 sps:$4 sm:$0xff]   ;;  %1307 = vmatprep.subr.bf16.mxu1 %v5838_v5  ;;  %p6419_p3 = scmp.lt.s32.totalorder %s6417_s14, %s6411_s4 }
 0x14e   : > { %1059 = vmatpush2.bf16.msra.mxu0 %v5831_v2 }
 0x14f   : > { %731 = vadd.xlane.f32.xlu1 %v730_v43  ;;  %v728_v44 = vmul.f32 %v6870_v41, %v6870_v41  ;;  %v729_v45 = vmul.f32 %v6873_v42, %v6873_v42  ;;  %1060 = vmatprep.subr.bf16.mxu0 %v5835_v4  ;;  %v769_v43 = vrot.slane %v712_v37, %v6883_v29  ;;  %p6420_p6 = por %p6419_p3, %p6418_p1 }
 0x150   : > { %1308 = vmatpush2.bf16.msra.mxu1 %v5840_v7 }
 0x151   : > { %v733_v46 = vadd.f32 %v729_v45, %v728_v44  ;;  %1309 = vmatprep.subr.bf16.mxu1 %v5844_v9  ;;  %v765_v45 = vrot.slane %v712_v37, %v6886_v30  ;;  %v5880_v37 = vld [vmem:[#allocation10] ss:$8 sps:$4 sm:$0xff]   ;;  %p6421_p13 = pnand %p6420_p6, %p6414_p8 }
 0x152   : > { %1061 = vmatpush2.bf16.msra.mxu0 %v5837_v6 }
 0x153   : > { %734 = vadd.xlane.f32.xlu1 %v733_v46  ;;  %1062 = vmatprep.subr.bf16.mxu0 %v5841_v8 }
 0x154   : > { %1310 = vmatpush2.bf16.msra.mxu1 %v5846_v11 }
 0x155   : > { %1311 = vmatprep.subr.bf16.mxu1 %v5850_v13 }
 0x156   : > { %1063 = vmatpush2.bf16.msra.mxu0 %v5843_v10 }
 0x157   : > { %1064 = vmatprep.subr.bf16.mxu0 %v5847_v12 }
 0x158   : > { %1312 = vmatpush2.bf16.msra.mxu1 %v5852_v15 }
 0x159   : > { %1313 = vmatprep.subr.bf16.mxu1 %v5856_v17 }
 0x15a   : > { %1065 = vmatpush2.bf16.msra.mxu0 %v5849_v14 }
 0x15b   : > { %1066 = vmatprep.subr.bf16.mxu0 %v5853_v16  ;;  %v5859_v16 = vld [vmem:[#allocation10 + $0x70] ss:$8 sps:$4 sm:$0xff]  }
 0x15c   : > { %1314 = vmatpush2.bf16.msra.mxu1 %v5858_v19  ;;  %v5862_v19 = vld [vmem:[#allocation10 + $0x60] ss:$8 sps:$4 sm:$0xff]  }
 0x15e   : > { %1067 = vmatpush2.bf16.msra.mxu0 %v5855_v18  ;;  %v5864_v18 = vld [vmem:[#allocation10 + $0x64] ss:$8 sps:$4 sm:$0xff]  }
 0x15f   : > { %1530 = vmatprep.subr.bf16.mxu0 %v5861_v20  ;;  %v5867_v20 = vld [vmem:[#allocation10 + $0x54] ss:$8 sps:$4 sm:$0xff]  }
 0x1d8   : > { %v732_v21 = vpop.xlane.xlu1 %731 }
 0x1d9   : > { %v736_v22 = vmul.f32 0.00390625, %v732_v21  ;;  %v5865_v21 = vld [vmem:[#allocation10 + $0x50] ss:$8 sps:$4 sm:$0xff]  }
 0x1db   : > { %v738_v23 = vadd.f32 1e-05, %v736_v22  ;;  %v5870_v22 = vld [vmem:[#allocation10 + $0x44] ss:$8 sps:$4 sm:$0xff]  }
 0x1dc   : > { %v735_v24 = vpop.xlane.xlu1 %734 }
 0x1dd   : > { %6147 = vrsqrt.f32 %v738_v23  ;;  %v737_v25 = vmul.f32 0.00390625, %v735_v24  ;;  %v5868_v23 = vld [vmem:[#allocation10 + $0x40] ss:$8 sps:$4 sm:$0xff]   ;;  %v5873_v24 = vld [vmem:[#allocation10 + $0x34] ss:$8 sps:$4 sm:$0xff]  }
 0x1df   : > { %v739_v27 = vadd.f32 1e-05, %v737_v25  ;;  %v5871_v25 = vld [vmem:[#allocation10 + $0x30] ss:$8 sps:$4 sm:$0xff]  }
 0x1e1   : > { %6149 = vrsqrt.f32 %v739_v27  ;;  %v5876_v27 = vld [vmem:[#allocation10 + $0x24] ss:$8 sps:$4 sm:$0xff]  }
 0x1ea   : > { %v6148_v34 = vpop.eup %6147 }
 0x1eb   : > { %v743_v38 = vmul.f32 %v6148_v34, %v6863_v36  ;;  %v742_v39 = vmul.f32 %v6148_v34, %v6860_v35  ;;  %v5882_v34 = vld [vmem:[#allocation10 + $0x4] ss:$8 sps:$4 sm:$0xff]  }
 0x1ed   : > { %v758_v40 = vmul.f32 %v754_v32, %v743_v38  ;;  %v757_v44 = vmul.f32 %v750_v33, %v742_v39  ;;  %v5885_v38 = vld [vmem:[#allocation10 + $0xf4] ss:$8 sps:$4 sm:$0xff]   ;;  %v5883_v39 = vld [vmem:[#allocation10 + $0xf0] ss:$8 sps:$4 sm:$0xff]  }
 0x1ee   : > { %v6150_v46 = vpop.eup %6149 }
 0x1ef   : > { %v745_v47 = vmul.f32 %v6150_v46, %v6873_v42  ;;  %v744_v49 = vmul.f32 %v6150_v46, %v6870_v41  ;;  %v773_v36 = vadd.f32 %v769_v43, %v758_v40  ;;  %v772_v35 = vadd.f32 %v765_v45, %v757_v44  ;;  %v5888_v40 = vld [vmem:[#allocation10 + $0xe4] ss:$8 sps:$4 sm:$0xff]   ;;  %v5891_v44 = vld [vmem:[#allocation10 + $0xd4] ss:$8 sps:$4 sm:$0xff]  }
 0x1f0   : > { %v819_v42 = vrot.slane %v810_v50, %v6883_v29  ;;  %v5894_v46 = vld [vmem:[#allocation10 + $0xc4] ss:$8 sps:$4 sm:$0xff]  }
 0x1f1   : > { %v760_v51 = vmul.f32 %v754_v32, %v745_v47  ;;  %v759_v52 = vmul.f32 %v750_v33, %v744_v49  ;;  %v782_v41 = vrot.slane %v773_v36, 7  ;;  %v781_v59 = vrot.slane %v772_v35, 7  ;;  %v5879_v32 = vld [vmem:[#allocation10 + $0x14] ss:$8 sps:$4 sm:$0xff]   ;;  %v5877_v33 = vld [vmem:[#allocation10 + $0x10] ss:$8 sps:$4 sm:$0xff]  }
 0x1f2   : > { %v807_v7 = vmul.f32 %v803_v54, %v773_v36  ;;  %v806_v9 = vmul.f32 %v799_v56, %v772_v35  ;;  %v5892_v47 = vld [vmem:[#allocation10 + $0xc0] ss:$8 sps:$4 sm:$0xff]   ;;  %v5895_v49 = vld [vmem:[#allocation10 + $0xb0] ss:$8 sps:$4 sm:$0xff]   ;;  %v5900_v50 = vld [vmem:[#allocation10 + $0xa4] ss:$8 sps:$4 sm:$0xff]  }
 0x1f3   : > { %v775_v53 = vadd.f32 %v769_v43, %v760_v51  ;;  %v774_v55 = vadd.f32 %v765_v45, %v759_v52  ;;  %v5886_v43 = vld [vmem:[#allocation10 + $0xe0] ss:$8 sps:$4 sm:$0xff]   ;;  %v5889_v45 = vld [vmem:[#allocation10 + $0xd0] ss:$8 sps:$4 sm:$0xff]   ;;  %v5903_v36 = vld [vmem:[#allocation10 + $0x94] ss:$8 sps:$4 sm:$0xff]  }
 0x1f4   : > { %v5898_v51 = vld [vmem:[#allocation10 + $0xa0] ss:$8 sps:$4 sm:$0xff]   ;;  %v5901_v52 = vld [vmem:[#allocation10 + $0x90] ss:$8 sps:$4 sm:$0xff]   ;;  %v5906_v35 = vld [vmem:[#allocation10 + $0x84] ss:$8 sps:$4 sm:$0xff]  }
 0x1f5   : > { %v784_v58 = vrot.slane %v775_v53, 7  ;;  %v783_v60 = vrot.slane %v774_v55, 7  ;;  %v809_v61 = vmul.f32 %v803_v54, %v775_v53  ;;  %v808_v62 = vmul.f32 %v799_v56, %v774_v55  ;;  %v5904_v53 = vld [vmem:[#allocation10 + $0x80] ss:$8 sps:$4 sm:$0xff]   ;;  %v864_v55 = vld [vmem:[%s7237_s5] sm:$0x3] }
 0x1f6   : > { %v6508_v54 = vmov 0.0   ;;  %v869_v56 = vrot.slane %v864_v55, %v6886_v30 }
 0x1f7   : > { %v787_v63 = vsel %vm785_vm1, %v782_v41, %v784_v58  ;;  %v789_v0 = vsel %vm785_vm1, %v784_v58, %v782_v41  ;;  %v786_v1 = vsel %vm785_vm1, %v781_v59, %v783_v60  ;;  %v788_v2 = vsel %vm785_vm1, %v783_v60, %v781_v59  ;;  %5611 = vmatprep.subr.bf16.mxu1 %v6508_v54 }
 0x1f8   : > { %v791_v3 = vsel %vm779_vm0, 0.0, %v789_v0  ;;  %v825_v4 = vmul.f32 %v819_v42, %v787_v63  ;;  %v790_v5 = vsel %vm779_vm0, 0.0, %v788_v2  ;;  %v824_v6 = vmul.f32 %v815_v57, %v786_v1 }
 0x1f9   : > { %v823_v8 = vmul.f32 %v819_v42, %v791_v3  ;;  %v822_v10 = vmul.f32 %v815_v57, %v790_v5  ;;  %v1111_v42 = vld [vmem:[%s7239_s7] sm:$0x3]  ;;  %v873_v58 = vrot.slane %v864_v55, %v6883_v29  ;;  %v6510_v59 = vmov 1983009808  }
 0x1fa   : > { %v829_v11 = vadd.f32 %v825_v4, %v809_v61  ;;  %v828_v12 = vadd.f32 %v824_v6, %v808_v62  ;;  %v1595_v60 = vunpack.c.l.s4 %v6510_v59  ;;  %v1116_v62 = vrot.slane %v1111_v42, %v6886_v30 }
 0x1fb   : > { %v827_v13 = vadd.f32 %v823_v8, %v807_v7  ;;  %v826_v14 = vadd.f32 %v822_v10, %v806_v9  ;;  %v1120_v1 = vrot.slane %v1111_v42, %v6883_v29 }
 0x1fc   : > { %v1596_v7 = vunpack.c.0.s8 %v1595_v60 }
 0x1fd   : > { %v831_v15 = vpack.c.bf16 %v829_v11, %v827_v13  ;;  %v6912_v17 = vpack.c.bf16 %v828_v12, %v826_v14 }
 0x1ff   : > { %1068 = vmatprep.mubr.bf16.mxu0 %v831_v15  ;;  %1315 = vmatprep.mubr.bf16.mxu1 %v831_v15 }
 0x200   : > { %1069 = vmatmul.mubr.bf16.vlgmr.msra.gmra.mxu0 %v6912_v17  ;;  %1316 = vmatmul.mubr.bf16.vlgmr.msra.gmra.mxu1 %v6912_v17 }
 0x201   : > { %1531 = vmatpush1.bf16.msra.mxu0 %v5859_v16  ;;  %1562 = vmatprep.mubr.bf16.mxu0 %v831_v15  ;;  %v6511_v16 = vmov 1934713408  }
 0x202   : > { %1532 = vmatprep.subr.bf16.mxu0 %v5864_v18  ;;  %5613 = vmatprep.mubr.msk.bf16.mxu1 %vm6509_vm2, %v6508_v54 }
 0x205   : > { %1533 = vmatpush1.bf16.msra.mxu0 %v5862_v19  ;;  %v6512_v19 = vmov 0  }
 0x206   : > { %1534 = vmatprep.subr.bf16.mxu0 %v5867_v20  ;;  %v6935_v20 = vpack.i.b16 %v6512_v19, %v6512_v19 }
 0x209   : > { %1535 = vmatpush1.bf16.msra.mxu0 %v5865_v21 }
 0x20a   : > { %1536 = vmatprep.subr.bf16.mxu0 %v5870_v22 }
 0x20d   : > { %1537 = vmatpush1.bf16.msra.mxu0 %v5868_v23 }
 0x20e   : > { %1538 = vmatprep.subr.bf16.mxu0 %v5873_v24 }
 0x211   : > { %1539 = vmatpush1.bf16.msra.mxu0 %v5871_v25  ;;  %v6938_v25 = vsub.s32 %v1596_v7, %v6880_v28 }
 0x212   : > { %1540 = vmatprep.subr.bf16.mxu0 %v5876_v27 }
 0x215   : > { %1541 = vmatpush1.bf16.msra.mxu0 %v5874_v31 }
 0x216   : > { %1542 = vmatprep.subr.bf16.mxu0 %v5879_v32 }
 0x219   : > { %1543 = vmatpush1.bf16.msra.mxu0 %v5877_v33 }
 0x21a   : > { %1544 = vmatprep.subr.bf16.mxu0 %v5882_v34 }
 0x21d   : > { %1545 = vmatpush1.bf16.msra.mxu0 %v5880_v37 }
 0x21e   : > { %1546 = vmatprep.subr.bf16.mxu0 %v5885_v38 }
 0x221   : > { %1547 = vmatpush2.bf16.msra.mxu0 %v5883_v39 }
 0x222   : > { %1548 = vmatprep.subr.bf16.mxu0 %v5888_v40 }
 0x225   : > { %1549 = vmatpush2.bf16.msra.mxu0 %v5886_v43 }
 0x226   : > { %1550 = vmatprep.subr.bf16.mxu0 %v5891_v44 }
 0x229   : > { %1551 = vmatpush2.bf16.msra.mxu0 %v5889_v45 }
 0x22a   : > { %1552 = vmatprep.subr.bf16.mxu0 %v5894_v46 }
 0x22d   : > { %1553 = vmatpush2.bf16.msra.mxu0 %v5892_v47 }
 0x22e   : > { %1554 = vmatprep.subr.bf16.mxu0 %v5897_v48 }
 0x231   : > { %1555 = vmatpush2.bf16.msra.mxu0 %v5895_v49 }
 0x232   : > { %1556 = vmatprep.subr.bf16.mxu0 %v5900_v50 }
 0x235   : > { %1557 = vmatpush2.bf16.msra.mxu0 %v5898_v51 }
 0x236   : > { %1558 = vmatprep.subr.bf16.mxu0 %v5903_v36 }
 0x239   : > { %1559 = vmatpush2.bf16.msra.mxu0 %v5901_v52 }
 0x23a   : > { %1560 = vmatprep.subr.bf16.mxu0 %v5906_v35 }
 0x23d   : > { %1561 = vmatpush2.bf16.msra.mxu0 %v5904_v53 }
 0x23e   : > { %5599 = vmatprep.subr.bf16.mxu0 %v6508_v54 }
 0x240   : > { %1563 = vmatmul.mubr.bf16.vlgmr.msra.gmra.mxu0 %v6912_v17  ;;  %v1610_v17 = vunpack.c.l.s4 %v6511_v16 }
 0x241   : > { %5601 = vmatprep.mubr.msk.bf16.mxu0 %vm6509_vm2, %v6508_v54 }
 0x242   : > { %v1611_v33 = vunpack.c.0.s8 %v1610_v17 }
 0x244   : > { %v6946_v49 = vsub.s32 %v1611_v33, %v6880_v28 }
 0x2c0   : > { %v1070_v57 = vpop.f32.mrf.mxu0  ;;  %v1317_v41 = vpop.f32.mrf.mxu1 }
 0x2c1   : > { %v1071_v61 = vadd.f32 %v1070_v57, %v869_v56  ;;  %v1318_v9 = vadd.f32 %v1317_v41, %v1116_v62 }
 0x2c2   : > { %v1072_v63 = vpop.f32.mrf.mxu0  ;;  %v1319_v0 = vpop.f32.mrf.mxu1 }
 0x2c3   : > { %v1073_v4 = vadd.f32 %v1072_v63, %v873_v58  ;;  %v1573_v8 = vmul.f32 0.088388346, %v1071_v61  ;;  %v1320_v12 = vadd.f32 %v1319_v0, %v1120_v1 }
 0x2c4   : > { %v1074_v2 = vpop.f32.mrf.mxu0  ;;  %v1321_v3 = vpop.f32.mrf.mxu1 }
 0x2c5   : > { %v1075_v5 = vadd.f32 %v1074_v2, %v869_v56  ;;  %v1322_v6 = vadd.f32 %v1321_v3, %v1116_v62  ;;  %v1574_v21 = vmul.f32 0.088388346, %v1073_v4 }
 0x2c6   : > { %v1076_v10 = vpop.f32.mrf.mxu0  ;;  %v1323_v11 = vpop.f32.mrf.mxu1 }
 0x2c7   : > { %v1575_v13 = vmul.f32 0.088388346, %v1075_v5  ;;  %v1077_v14 = vadd.f32 %v1076_v10, %v873_v58  ;;  %v1324_v15 = vadd.f32 %v1323_v11, %v1120_v1  ;;  %v1797_v18 = vpack.c.bf16 %v1322_v6, %v1318_v9 }
 0x2c9   : > { %v1577_v22 = vpack.c.bf16 %v1575_v13, %v1573_v8  ;;  %v1576_v23 = vmul.f32 0.088388346, %v1077_v14  ;;  %v1798_v24 = vpack.c.bf16 %v1324_v15, %v1320_v12  ;;  %v1803_v34 = vshrl.u32 %v1797_v18, 16 }
 0x2cb   : > { %v1578_v27 = vpack.c.bf16 %v1576_v23, %v1574_v21  ;;  %v1801_v31 = vpack.i.b16 %v1798_v24, %v1797_v18  ;;  %v1804_v32 = vshrl.u32 %v1798_v24, 16  ;;  %v1583_v37 = vshrl.u32 %v1577_v22, 16 }
 0x2cd   : > { %v1581_v38 = vpack.i.b16 %v1578_v27, %v1577_v22  ;;  %v1584_v39 = vshrl.u32 %v1578_v27, 16  ;;  %v1807_v40 = vcombine.high %v1801_v31, %v6935_v20  ;;  %v1805_v43 = vpack.i.b16 %v1804_v32, %v1803_v34 }
 0x2ce   : > { %v1814_v44 = vrot.slane %v1801_v31, %v6938_v25 }
 0x2cf   : > { %v1585_v45 = vpack.i.b16 %v1584_v39, %v1583_v37  ;;  %v1593_v46 = vcombine.high %v1581_v38, %v6935_v20  ;;  %v1600_v47 = vrot.slane %v1581_v38, %v6938_v25  ;;  %v1821_v48 = vrot.slane %v1807_v40, %v6938_v25 }
 0x2d0   : > { %v1822_v35 = vcombine.high %v1814_v44, %v6512_v19  ;;  %v1856_v53 = vcombine.high %v1805_v43, %v6935_v20  ;;  %v1863_v55 = vrot.slane %v1805_v43, %v6938_v25  ;;  %v1829_v62 = vrot.slane %v1814_v44, %v6946_v49 }
 0x2d1   : > { %v1607_v50 = vrot.slane %v1593_v46, %v6938_v25  ;;  %v1608_v51 = vcombine.high %v1600_v47, %v6512_v19  ;;  %v1642_v36 = vcombine.high %v1585_v45, %v6935_v20  ;;  %v1649_v52 = vrot.slane %v1585_v45, %v6938_v25 }
 0x2d2   : > { %v1837_v57 = vcombine.high %v1821_v48, %v6512_v19  ;;  %v1615_v59 = vrot.slane %v1600_v47, %v6946_v49  ;;  %v1836_v0 = vrot.slane %v1822_v35, %v6946_v49  ;;  %v1870_v1 = vrot.slane %v1856_v53, %v6938_v25 }
 0x2d3   : > { %v1623_v56 = vcombine.high %v1607_v50, %v6512_v19  ;;  %v1656_v42 = vrot.slane %v1642_v36, %v6938_v25  ;;  %v1622_v41 = vrot.slane %v1608_v51, %v6946_v49  ;;  %v1657_v58 = vcombine.high %v1649_v52, %v6512_v19 }
 0x2d4   : > { %v1871_v2 = vcombine.high %v1863_v55, %v6512_v19  ;;  %v1630_v3 = vrot.slane %v1607_v50, %v6946_v49  ;;  %v1664_v4 = vrot.slane %v1649_v52, %v6946_v49  ;;  %v1851_v6 = vrot.slane %v1837_v57, %v6946_v49 }
 0x2d5   : > { %v1637_v60 = vrot.slane %v1623_v56, %v6946_v49  ;;  %v1672_v61 = vcombine.high %v1656_v42, %v6512_v19  ;;  %v1671_v63 = vrot.slane %v1657_v58, %v6946_v49  ;;  %v1679_v7 = vrot.slane %v1656_v42, %v6946_v49 }
 0x2d6   : > { %v1691_v8 = vcombine.low %v1615_v59, %v1622_v41  ;;  %v1844_v9 = vrot.slane %v1821_v48, %v6946_v49  ;;  %v1885_v10 = vrot.slane %v1871_v2, %v6946_v49  ;;  %v1878_v14 = vrot.slane %v1863_v55, %v6946_v49 }
 0x2d7   : > { %v1686_v5 = vrot.slane %v1672_v61, %v6946_v49  ;;  %v1707_v11 = vcombine.low %v1630_v3, %v1637_v60  ;;  %v5279_v12 = vcombine.high %v1630_v3, %v1637_v60  ;;  %v1740_v13 = vcombine.low %v1664_v4, %v1671_v63 }
 0x2d8   : > { %v5280_v15 = vcombine.high %v1664_v4, %v1671_v63  ;;  %v1886_v18 = vcombine.high %v1870_v1, %v6512_v19  ;;  %v1905_v21 = vcombine.low %v1829_v62, %v1836_v0  ;;  %v5282_v22 = vcombine.high %v1829_v62, %v1836_v0 }
 0x2d9   : > { %v1756_v16 = vcombine.low %v1679_v7, %v1686_v5  ;;  %v5281_v17 = vcombine.high %v1679_v7, %v1686_v5  ;;  %v1921_v23 = vcombine.low %v1844_v9, %v1851_v6  ;;  %v5283_v24 = vcombine.high %v1844_v9, %v1851_v6 }
 0x2da   : > { %v1893_v27 = vrot.slane %v1870_v1, %v6946_v49  ;;  %v1900_v31 = vrot.slane %v1886_v18, %v6946_v49  ;;  %v1954_v32 = vcombine.low %v1878_v14, %v1885_v10  ;;  %v5284_v33 = vcombine.high %v1878_v14, %v1885_v10 }
 0x2db   : > { %v1912_v34 = vrot.slane %v1905_v21, %v6938_v25  ;;  %v1920_v37 = vrot.slane %v5282_v22, %v6938_v25  ;;  %v1928_v38 = vrot.slane %v1921_v23, %v6938_v25  ;;  %v1936_v39 = vrot.slane %v5283_v24, %v6938_v25  ;;  %v1358_v21 = vld [vmem:[#allocation11] sm:$0x3] }
 0x2dc   : > { %v1961_v40 = vrot.slane %v1954_v32, %v6938_v25  ;;  %v1969_v43 = vrot.slane %v5284_v33, %v6938_v25  ;;  %v1970_v44 = vcombine.low %v1893_v27, %v1900_v31  ;;  %v5285_v45 = vcombine.high %v1893_v27, %v1900_v31 }
 0x2dd   : > { %v5278_v46 = vcombine.high %v1615_v59, %v1622_v41  ;;  %v1714_v47 = vrot.slane %v1707_v11, %v6938_v25  ;;  %v1937_v48 = vcombine.low %v1912_v34, %v1920_v37  ;;  %v1945_v50 = vcombine.low %v1928_v38, %v1936_v39 }
 0x2de   : > { %v1977_v51 = vrot.slane %v1970_v44, %v6938_v25  ;;  %v1985_v36 = vrot.slane %v5285_v45, %v6938_v25  ;;  %v1986_v52 = vcombine.low %v1961_v40, %v1969_v43  ;;  %v1763_v35 = vrot.slane %v1756_v16, %v6938_v25 }
 0x2df   : > { %v1722_v53 = vrot.slane %v5279_v12, %v6938_v25  ;;  %v1747_v55 = vrot.slane %v1740_v13, %v6938_v25  ;;  %v1755_v56 = vrot.slane %v5280_v15, %v6938_v25  ;;  %v1771_v42 = vrot.slane %v5281_v17, %v6938_v25 }
 0x2e0   : > { %v1952_v57 = vrot.slane %v1945_v50, %v6946_v49  ;;  %v1994_v41 = vcombine.low %v1977_v51, %v1985_v36  ;;  %v1698_v58 = vrot.slane %v1691_v8, %v6938_v25  ;;  %v1706_v59 = vrot.slane %v5278_v46, %v6938_v25 }
 0x2e1   : > { %v1780_v60 = vcombine.low %v1763_v35, %v1771_v42  ;;  %v1944_v61 = vrot.slane %v1937_v48, %v6946_v49  ;;  %v1993_v62 = vrot.slane %v1986_v52, %v6946_v49  ;;  %v1731_v0 = vcombine.low %v1714_v47, %v1722_v53 }
 0x2e2   : > { %v2001_v63 = vrot.slane %v1994_v41, %v6946_v49  ;;  %v1772_v1 = vcombine.low %v1747_v55, %v1755_v56  ;;  %v1723_v4 = vcombine.low %v1698_v58, %v1706_v59  ;;  %v1363_v23 = vrot.slane %v1358_v21, %v6886_v30 }
 0x2e3   : > { %v1953_v2 = vcombine.low %v1944_v61, %v1952_v57  ;;  %v1787_v5 = vrot.slane %v1780_v60, %v6946_v49  ;;  %v1738_v7 = vrot.slane %v1731_v0, %v6946_v49  ;;  %v1367_v27 = vrot.slane %v1358_v21, %v6883_v29 }
 0x2e4   : > { %v2002_v3 = vcombine.low %v1993_v62, %v2001_v63  ;;  %v1779_v8 = vrot.slane %v1772_v1, %v6946_v49  ;;  %v1730_v9 = vrot.slane %v1723_v4, %v6946_v49 }
 0x2e5   : > { %v2007_v13 = vshrl.u32 %v1953_v2, 16 }
 0x2e6   : > { %v2005_v6 = vpack.i.b16 %v2002_v3, %v1953_v2  ;;  %v1788_v10 = vcombine.low %v1779_v8, %v1787_v5  ;;  %v2008_v11 = vshrl.u32 %v2002_v3, 16  ;;  %v1739_v12 = vcombine.low %v1730_v9, %v1738_v7 }
 0x2e8   : > { %5600 = vmatpush3.bf16.xpose.msra.mxu0 %v2005_v6  ;;  %v1791_v14 = vpack.i.b16 %v1788_v10, %v1739_v12  ;;  %v2009_v15 = vpack.i.b16 %v2008_v11, %v2007_v13  ;;  %v1794_v16 = vshrl.u32 %v1788_v10, 16  ;;  %v1793_v17 = vshrl.u32 %v1739_v12, 16 }
 0x2e9   : > { %5605 = vmatprep.subr.bf16.mxu0 %v6508_v54 }
 0x2ea   : > { %v1795_v18 = vpack.i.b16 %v1794_v16, %v1793_v17 }
 0x2ef   : > { %5602 = vmatmul.mubr.bf16.vlgmr.msra.gmra.mxu0 %v1791_v14 }
 0x2f0   : > { %5606 = vmatpush3.bf16.xpose.msra.mxu0 %v2009_v15  ;;  %5607 = vmatprep.mubr.msk.bf16.mxu0 %vm6509_vm2, %v6508_v54 }
 0x2f7   : > { %5608 = vmatmul.mubr.bf16.vlgmr.msra.gmra.mxu0 %v1795_v18 }
 0x300   : > { %v1564_v22 = vpop.f32.mrf.mxu0 }
 0x301   : > { %v1565_v32 = vadd.f32 %v1564_v22, %v1363_v23 }
 0x302   : > { %v1566_v24 = vpop.f32.mrf.mxu0 }
 0x303   : > { %v1567_v37 = vadd.f32 %v1566_v24, %v1367_v27 }
 0x304   : > { %v1568_v31 = vpop.f32.mrf.mxu0 }
 0x305   : > { %v1569_v33 = vadd.f32 %v1568_v31, %v1363_v23 }
 0x306   : > { %v1570_v34 = vpop.f32.mrf.mxu0 }
 0x307   : > { %v2011_v38 = vpack.c.bf16 %v1569_v33, %v1565_v32  ;;  %v1571_v39 = vadd.f32 %v1570_v34, %v1367_v27  ;;  %v2308_v34 = vand.u32 127, %v747_v26 }
 0x309   : > { %v2012_v40 = vpack.c.bf16 %v1571_v39, %v1567_v37  ;;  %v2017_v43 = vshrl.u32 %v2011_v38, 16  ;;  %vm2313_vm4 = vcmp.lt.s32.totalorder %v2308_v34, 4  ;;  %vm2309_vm5 = vcmp.le.s32.totalorder %v2308_v34, %v6880_v28 }
 0x30a   : > { %vm2314_vm6 = vmand %vm2311_vm3, %vm2313_vm4  ;;  %v778_v37 = vadd.s32 8, %v6880_v28 }
 0x30b   : > { %v2015_v44 = vpack.i.b16 %v2012_v40, %v2011_v38  ;;  %v2018_v45 = vshrl.u32 %v2012_v40, 16  ;;  %vm2316_vm7 = vmor %vm2309_vm5, %vm2314_vm6 }
 0x30c   : > { %vm2310_vm9 = vcmp.le.s32.totalorder %v2308_v34, %v778_v37  ;;  %v5913_v34 = vld [vmem:[#allocation13 + $0x50] ss:$8 sps:$4 sm:$0xff]   ;;  %v5916_v37 = vld [vmem:[#allocation13 + $0x40] ss:$8 sps:$4 sm:$0xff]  }
 0x30d   : > { %v2019_v46 = vpack.i.b16 %v2018_v45, %v2017_v43  ;;  %v2021_v47 = vcombine.high %v2015_v44, %v6935_v20  ;;  %v2028_v48 = vrot.slane %v2015_v44, %v6938_v25 }
 0x30f   : > { %v2035_v50 = vrot.slane %v2021_v47, %v6938_v25  ;;  %v2036_v51 = vcombine.high %v2028_v48, %v6512_v19  ;;  %v2070_v36 = vcombine.high %v2019_v46, %v6935_v20  ;;  %v2077_v52 = vrot.slane %v2019_v46, %v6938_v25 }
 0x310   : > { %v2043_v35 = vrot.slane %v2028_v48, %v6946_v49 }
 0x311   : > { %v2050_v53 = vrot.slane %v2036_v51, %v6946_v49  ;;  %v2051_v55 = vcombine.high %v2035_v50, %v6512_v19  ;;  %v2084_v56 = vrot.slane %v2070_v36, %v6938_v25  ;;  %v2085_v42 = vcombine.high %v2077_v52, %v6512_v19 }
 0x312   : > { %v2058_v57 = vrot.slane %v2035_v50, %v6946_v49  ;;  %v2092_v20 = vrot.slane %v2077_v52, %v6946_v49 }
 0x313   : > { %v2065_v41 = vrot.slane %v2051_v55, %v6946_v49  ;;  %v2100_v58 = vcombine.high %v2084_v56, %v6512_v19  ;;  %v2119_v59 = vcombine.low %v2043_v35, %v2050_v53  ;;  %v2099_v60 = vrot.slane %v2085_v42, %v6946_v49 }
 0x314   : > { %v2107_v61 = vrot.slane %v2084_v56, %v6946_v49  ;;  %v5286_v62 = vcombine.high %v2043_v35, %v2050_v53 }
 0x315   : > { %v2114_v63 = vrot.slane %v2100_v58, %v6946_v49  ;;  %v2126_v0 = vrot.slane %v2119_v59, %v6938_v25  ;;  %v2135_v1 = vcombine.low %v2058_v57, %v2065_v41  ;;  %v5287_v2 = vcombine.high %v2058_v57, %v2065_v41 }
 0x316   : > { %v2134_v3 = vrot.slane %v5286_v62, %v6938_v25  ;;  %v2168_v4 = vcombine.low %v2092_v20, %v2099_v60  ;;  %v5288_v5 = vcombine.high %v2092_v20, %v2099_v60 }
 0x317   : > { %v2142_v19 = vrot.slane %v2135_v1, %v6938_v25  ;;  %v2150_v6 = vrot.slane %v5287_v2, %v6938_v25  ;;  %v2184_v7 = vcombine.low %v2107_v61, %v2114_v63  ;;  %v5289_v8 = vcombine.high %v2107_v61, %v2114_v63 }
 0x318   : > { %v2175_v9 = vrot.slane %v2168_v4, %v6938_v25  ;;  %v2183_v10 = vrot.slane %v5288_v5, %v6938_v25  ;;  %v2151_v11 = vcombine.low %v2126_v0, %v2134_v3 }
 0x319   : > { %v2159_v12 = vcombine.low %v2142_v19, %v2150_v6  ;;  %v2191_v13 = vrot.slane %v2184_v7, %v6938_v25  ;;  %v2199_v14 = vrot.slane %v5289_v8, %v6938_v25 }
 0x31a   : > { %v2200_v15 = vcombine.low %v2175_v9, %v2183_v10  ;;  %v2158_v16 = vrot.slane %v2151_v11, %v6946_v49 }
 0x31b   : > { %v2166_v17 = vrot.slane %v2159_v12, %v6946_v49  ;;  %v2208_v18 = vcombine.low %v2191_v13, %v2199_v14 }
 0x31c   : > { %v2207_v22 = vrot.slane %v2200_v15, %v6946_v49 }
 0x31d   : > { %v2167_v21 = vcombine.low %v2158_v16, %v2166_v17  ;;  %v2215_v23 = vrot.slane %v2208_v18, %v6946_v49  ;;  %v5909_v16 = vld [vmem:[#allocation13 + $0x74] ss:$8 sps:$4 sm:$0xff]  }
 0x31f   : > { %v2216_v24 = vcombine.low %v2207_v22, %v2215_v23  ;;  %v2221_v31 = vshrl.u32 %v2167_v21, 16  ;;  %v5907_v23 = vld [vmem:[#allocation13 + $0x70] ss:$8 sps:$4 sm:$0xff]  }
 0x321   : > { %v2219_v27 = vpack.i.b16 %v2216_v24, %v2167_v21  ;;  %v2222_v32 = vshrl.u32 %v2216_v24, 16 }
 0x323   : > { %5612 = vmatpush3.bf16.msra.mxu1 %v2219_v27  ;;  %v7038_v33 = vpack.i.b16 %v2222_v32, %v2221_v31  ;;  %v5912_v27 = vld [vmem:[#allocation13 + $0x64] ss:$8 sps:$4 sm:$0xff]   ;;  %v5910_v31 = vld [vmem:[#allocation13 + $0x60] ss:$8 sps:$4 sm:$0xff]   ;;  %v5915_v32 = vld [vmem:[#allocation13 + $0x54] ss:$8 sps:$4 sm:$0xff]  }
 0x324   : > { %5617 = vmatprep.subr.bf16.mxu1 %v6508_v54 }
 0x3af   : > { %v2259_v38 = vpop.f32.mrf.mxu0 }
 0x3b0   : > { %v2322_v39 = vsel %vm2316_vm7, %v2259_v38, -1e+09  ;;  %v5921_v38 = vld [vmem:[#allocation13 + $0x34] ss:$8 sps:$4 sm:$0xff]  }
 0x3b1   : > { %v5603_v40 = vpop.f32.mrf.mxu0  ;;  %v2327_v43 = vsel %vm2326_vm8, %v2322_v39, -inf }
 0x3b2   : > { %2328 = vmax.xlane.f32.xlu0 %v2327_v43  ;;  %v5924_v40 = vld [vmem:[#allocation13 + $0x24] ss:$8 sps:$4 sm:$0xff]   ;;  %v5922_v43 = vld [vmem:[#allocation13 + $0x20] ss:$8 sps:$4 sm:$0xff]  }
 0x3b3   : > { %v2262_v44 = vpop.f32.mrf.mxu0 }
 0x3b4   : > { %v2323_v45 = vsel %vm2310_vm9, %v2262_v44, -1e+09  ;;  %v5927_v44 = vld [vmem:[#allocation13 + $0x14] ss:$8 sps:$4 sm:$0xff]  }
 0x3b5   : > { %v5604_v26 = vpop.f32.mrf.mxu0  ;;  %v2330_v46 = vsel %vm2326_vm8, %v2323_v45, -inf }
 0x3b6   : > { %2331 = vmax.xlane.f32.xlu1 %v2330_v46  ;;  %v5930_v26 = vld [vmem:[#allocation13 + $0x4] ss:$8 sps:$4 sm:$0xff]   ;;  %v5928_v46 = vld [vmem:[#allocation13] ss:$8 sps:$4 sm:$0xff]  }
 0x3b7   : > { %v2300_v47 = vpop.f32.mrf.mxu0 }
 0x3b8   : > { %v2324_v48 = vsel %vm2316_vm7, %v2300_v47, -1e+09  ;;  %v5933_v47 = vld [vmem:[#allocation13 + $0xf4] ss:$8 sps:$4 sm:$0xff]  }
 0x3b9   : > { %v5609_v50 = vpop.f32.mrf.mxu0  ;;  %v2333_v51 = vsel %vm2326_vm8, %v2324_v48, -inf }
 0x3ba   : > { %2334 = vmax.xlane.f32.xlu0 %v2333_v51  ;;  %v5936_v50 = vld [vmem:[#allocation13 + $0xe4] ss:$8 sps:$4 sm:$0xff]   ;;  %v5934_v51 = vld [vmem:[#allocation13 + $0xe0] ss:$8 sps:$4 sm:$0xff]  }
 0x3bb   : > { %v2303_v36 = vpop.f32.mrf.mxu0 }
 0x3bc   : > { %v2325_v52 = vsel %vm2310_vm9, %v2303_v36, -1e+09  ;;  %v5939_v36 = vld [vmem:[#allocation13 + $0xd4] ss:$8 sps:$4 sm:$0xff]  }
 0x3bd   : > { %v5610_v35 = vpop.f32.mrf.mxu0  ;;  %v2336_v53 = vsel %vm2326_vm8, %v2325_v52, -inf }
 0x3be   : > { %2337 = vmax.xlane.f32.xlu1 %v2336_v53  ;;  %v5942_v35 = vld [vmem:[#allocation13 + $0xc4] ss:$8 sps:$4 sm:$0xff]   ;;  %v5940_v53 = vld [vmem:[#allocation13 + $0xc0] ss:$8 sps:$4 sm:$0xff]  }
 0x43b   : > { %v2329_v55 = vpop.xlane.xlu0 %2328 }
 0x43c   : > { %v2339_v56 = vsub.f32 %v2322_v39, %v2329_v55  ;;  %v5919_v39 = vld [vmem:[#allocation13 + $0x30] ss:$8 sps:$4 sm:$0xff]   ;;  %v5945_v55 = vld [vmem:[#allocation13 + $0xb4] ss:$8 sps:$4 sm:$0xff]  }
 0x43e   : > { %v2343_v42 = vmul.f32 1.442695, %v2339_v56  ;;  %v5943_v56 = vld [vmem:[#allocation13 + $0xb0] ss:$8 sps:$4 sm:$0xff]  }
 0x43f   : > { %v2332_v57 = vpop.xlane.xlu1 %2331 }
 0x440   : > { %6151 = vpow2.f32 %v2343_v42  ;;  %v2340_v41 = vsub.f32 %v2323_v45, %v2332_v57  ;;  %v5925_v45 = vld [vmem:[#allocation13 + $0x10] ss:$8 sps:$4 sm:$0xff]   ;;  %v5948_v42 = vld [vmem:[#allocation13 + $0xa4] ss:$8 sps:$4 sm:$0xff]   ;;  %v5946_v57 = vld [vmem:[#allocation13 + $0xa0] ss:$8 sps:$4 sm:$0xff]  }
 0x442   : > { %v2345_v58 = vmul.f32 1.442695, %v2340_v41  ;;  %v5949_v41 = vld [vmem:[#allocation13 + $0x90] ss:$8 sps:$4 sm:$0xff]  }
 0x443   : > { %v2335_v59 = vpop.xlane.xlu0 %2334 }
 0x444   : > { %6153 = vpow2.f32 %v2345_v58  ;;  %v2341_v20 = vsub.f32 %v2324_v48, %v2335_v59  ;;  %v5931_v48 = vld [vmem:[#allocation13 + $0xf0] ss:$8 sps:$4 sm:$0xff]   ;;  %v5951_v58 = vld [vmem:[#allocation13 + $0x94] ss:$8 sps:$4 sm:$0xff]   ;;  %v5954_v59 = vld [vmem:[#allocation13 + $0x84] ss:$8 sps:$4 sm:$0xff]  }
 0x446   : > { %v2347_v60 = vmul.f32 1.442695, %v2341_v20  ;;  %v5952_v20 = vld [vmem:[#allocation13 + $0x80] ss:$8 sps:$4 sm:$0xff]  }
 0x447   : > { %v2338_v61 = vpop.xlane.xlu1 %2337 }
 0x448   : > { %6155 = vpow2.f32 %v2347_v60  ;;  %v2342_v62 = vsub.f32 %v2325_v52, %v2338_v61  ;;  %v5937_v52 = vld [vmem:[#allocation13 + $0xd0] ss:$8 sps:$4 sm:$0xff]  }
 0x44a   : > { %v2349_v63 = vmul.f32 1.442695, %v2342_v62 }
 0x44c   : > { %6157 = vpow2.f32 %v2349_v63 }
 0x44d   : > { %v6152_v0 = vpop.eup %6151 }
 0x44e   : > { %v2351_v1 = vsel %vm2326_vm8, %v6152_v0, 0.0 }
 0x44f   : > { %2352 = vadd.xlane.f32.xlu0 %v2351_v1 }
 0x451   : > { %v6154_v2 = vpop.eup %6153 }
 0x452   : > { %v2354_v3 = vsel %vm2326_vm8, %v6154_v2, 0.0 }
 0x453   : > { %2355 = vadd.xlane.f32.xlu1 %v2354_v3 }
 0x455   : > { %v6156_v4 = vpop.eup %6155 }
 0x456   : > { %v2357_v5 = vsel %vm2326_vm8, %v6156_v4, 0.0 }
 0x457   : > { %2358 = vadd.xlane.f32.xlu0 %v2357_v5 }
 0x459   : > { %v6158_v19 = vpop.eup %6157 }
 0x45a   : > { %v2360_v6 = vsel %vm2326_vm8, %v6158_v19, 0.0 }
 0x45b   : > { %2361 = vadd.xlane.f32.xlu1 %v2360_v6 }
 0x4d8   : > { %v2353_v7 = vpop.xlane.xlu0 %2352 }
 0x4d9   : > { %6159 = vrcp.f32 %v2353_v7 }
 0x4dc   : > { %v2356_v8 = vpop.xlane.xlu1 %2355 }
 0x4dd   : > { %6161 = vrcp.f32 %v2356_v8 }
 0x4e0   : > { %v2359_v9 = vpop.xlane.xlu0 %2358 }
 0x4e1   : > { %6163 = vrcp.f32 %v2359_v9 }
 0x4e4   : > { %v2362_v10 = vpop.xlane.xlu1 %2361 }
 0x4e5   : > { %6165 = vrcp.f32 %v2362_v10 }
 0x4e6   : > { %v6160_v11 = vpop.eup %6159 }
 0x4e7   : > { %v2367_v13 = vmul.f32 %v6160_v11, %v6152_v0 }
 0x4ea   : > { %v6162_v12 = vpop.eup %6161 }
 0x4eb   : > { %v2368_v14 = vmul.f32 %v6162_v12, %v6154_v2 }
 0x4ed   : > { %v2371_v15 = vpack.c.bf16 %v2368_v14, %v2367_v13 }
 0x4ee   : > { %v6164_v17 = vpop.eup %6163 }
 0x4ef   : > { %5614 = vmatmul.mubr.msk.bf16.vlgmr.msra.gmra.mxu1 %vm2326_vm8, %v2371_v15  ;;  %v2369_v21 = vmul.f32 %v6164_v17, %v6156_v4 }
 0x4f0   : > { %5618 = vmatpush3.bf16.msra.mxu1 %v7038_v33  ;;  %5619 = vmatprep.mubr.msk.bf16.mxu1 %vm6509_vm2, %v6508_v54  ;;  %v5918_v33 = vld [vmem:[#allocation13 + $0x44] ss:$8 sps:$4 sm:$0xff]  }
 0x4f1   : > { %2899 = vmatprep.subr.bf16.mxu1 %v5909_v16 }
 0x4f2   : > { %v6166_v18 = vpop.eup %6165 }
 0x4f3   : > { %v2370_v22 = vmul.f32 %v6166_v18, %v6158_v19 }
 0x4f5   : > { %v2372_v24 = vpack.c.bf16 %v2370_v22, %v2369_v21 }
 0x4f7   : > { %5620 = vmatmul.mubr.msk.bf16.vlgmr.msra.gmra.mxu1 %vm2326_vm8, %v2372_v24 }
 0x4f8   : > { %2900 = vmatpush1.bf16.msra.mxu1 %v5907_v23 }
 0x4f9   : > { %2901 = vmatprep.subr.bf16.mxu1 %v5912_v27 }
 0x4fc   : > { %2902 = vmatpush1.bf16.msra.mxu1 %v5910_v31 }
 0x4fd   : > { %2903 = vmatprep.subr.bf16.mxu1 %v5915_v32 }
 0x500   : > { %2904 = vmatpush1.bf16.msra.mxu1 %v5913_v34 }
 0x501   : > { %2905 = vmatprep.subr.bf16.mxu1 %v5918_v33 }
 0x504   : > { %2906 = vmatpush1.bf16.msra.mxu1 %v5916_v37 }
 0x505   : > { %2907 = vmatprep.subr.bf16.mxu1 %v5921_v38 }
 0x508   : > { %2908 = vmatpush1.bf16.msra.mxu1 %v5919_v39 }
 0x509   : > { %2909 = vmatprep.subr.bf16.mxu1 %v5924_v40 }
 0x50c   : > { %2910 = vmatpush1.bf16.msra.mxu1 %v5922_v43 }
 0x50d   : > { %2911 = vmatprep.subr.bf16.mxu1 %v5927_v44 }
 0x510   : > { %2912 = vmatpush1.bf16.msra.mxu1 %v5925_v45 }
 0x511   : > { %2913 = vmatprep.subr.bf16.mxu1 %v5930_v26 }
 0x514   : > { %2914 = vmatpush1.bf16.msra.mxu1 %v5928_v46 }
 0x515   : > { %2915 = vmatprep.subr.bf16.mxu1 %v5933_v47 }
 0x518   : > { %2916 = vmatpush2.bf16.msra.mxu1 %v5931_v48 }
 0x519   : > { %2917 = vmatprep.subr.bf16.mxu1 %v5936_v50 }
 0x51c   : > { %2918 = vmatpush2.bf16.msra.mxu1 %v5934_v51 }
 0x51d   : > { %2919 = vmatprep.subr.bf16.mxu1 %v5939_v36 }
 0x520   : > { %2920 = vmatpush2.bf16.msra.mxu1 %v5937_v52 }
 0x521   : > { %2921 = vmatprep.subr.bf16.mxu1 %v5942_v35 }
 0x524   : > { %2922 = vmatpush2.bf16.msra.mxu1 %v5940_v53 }
 0x525   : > { %2923 = vmatprep.subr.bf16.mxu1 %v5945_v55 }
 0x528   : > { %2924 = vmatpush2.bf16.msra.mxu1 %v5943_v56 }
 0x529   : > { %2925 = vmatprep.subr.bf16.mxu1 %v5948_v42 }
 0x52c   : > { %2926 = vmatpush2.bf16.msra.mxu1 %v5946_v57 }
 0x52d   : > { %2927 = vmatprep.subr.bf16.mxu1 %v5951_v58 }
 0x530   : > { %2928 = vmatpush2.bf16.msra.mxu1 %v5949_v41 }
 0x531   : > { %2929 = vmatprep.subr.bf16.mxu1 %v5954_v59 }
 0x534   : > { %2930 = vmatpush2.bf16.msra.mxu1 %v5952_v20 }
 0x5af   : > { %v2410_v60 = vpop.f32.mrf.mxu1 }
 0x5b0   : > { %v2461_v0 = vcombine.high %v2410_v60, %v6508_v54  ;;  %v2468_v2 = vrot.slane %v2410_v60, %v6938_v25 }
 0x5b1   : > { %v5615_v61 = vpop.f32.mrf.mxu1 }
 0x5b2   : > { %v2475_v19 = vrot.slane %v2461_v0, %v6938_v25 }
 0x5b3   : > { %v2413_v62 = vpop.f32.mrf.mxu1 }
 0x5b4   : > { %v2527_v9 = vcombine.high %v2413_v62, %v6508_v54  ;;  %v2534_v15 = vrot.slane %v2413_v62, %v6938_v25 }
 0x5b5   : > { %v5616_v63 = vpop.f32.mrf.mxu1 }
 0x5b6   : > { %v2541_v27 = vrot.slane %v2527_v9, %v6938_v25 }
 0x5b7   : > { %v2454_v1 = vpop.f32.mrf.mxu1 }
 0x5b8   : > { %v2476_v3 = vcombine.high %v2454_v1, %v6508_v54  ;;  %v2483_v4 = vrot.slane %v2454_v1, %v6938_v25 }
 0x5b9   : > { %v5621_v5 = vpop.f32.mrf.mxu1 }
 0x5ba   : > { %v2490_v6 = vrot.slane %v2476_v3, %v6938_v25  ;;  %v2491_v7 = vcombine.low %v2468_v2, %v2483_v4  ;;  %v2492_v8 = vcombine.high %v2468_v2, %v2483_v4 }
 0x5bb   : > { %v2457_v10 = vpop.f32.mrf.mxu1 }
 0x5bc   : > { %v2499_v11 = vrot.slane %v2491_v7, %v6946_v49  ;;  %v2506_v12 = vrot.slane %v2492_v8, %v6946_v49  ;;  %v2507_v13 = vcombine.low %v2475_v19, %v2490_v6  ;;  %v2508_v14 = vcombine.high %v2475_v19, %v2490_v6  ;;  %v6171_v8 = vld [vmem:[%s6821_s2] sm:$0xff] }
 0x5bd   : > { %v2542_v16 = vcombine.high %v2457_v10, %v6508_v54  ;;  %v2549_v17 = vrot.slane %v2457_v10, %v6938_v25  ;;  %v5622_v18 = vpop.f32.mrf.mxu1  ;;  %v6172_v10 = vld [vmem:[%s6821_s2 + $0x8] sm:$0xff] }
 0x5be   : > { %v2515_v21 = vrot.slane %v2507_v13, %v6946_v49  ;;  %v2522_v22 = vrot.slane %v2508_v14, %v6946_v49  ;;  %v2593_v23 = vcombine.low %v2499_v11, %v2506_v12  ;;  %v5292_v24 = vcombine.high %v2499_v11, %v2506_v12  ;;  %v6174_v18 = vld [vmem:[%s6821_s2 + $0x18] sm:$0xff] }
 0x5bf   : > { %v2556_v31 = vrot.slane %v2542_v16, %v6938_v25  ;;  %v2557_v32 = vcombine.low %v2534_v15, %v2549_v17  ;;  %v2558_v34 = vcombine.high %v2534_v15, %v2549_v17  ;;  %v6173_v16 = vld [vmem:[%s6821_s2 + $0x10] sm:$0xff]  ;;  %s7188_s2 = scalar_lea.hbm %s7305_s23, %s5590_s16 }
 0x5c0   : > { %v2609_v33 = vcombine.low %v2515_v21, %v2522_v22  ;;  %v5293_v37 = vcombine.high %v2515_v21, %v2522_v22  ;;  %v2600_v43 = vrot.slane %v2593_v23, %v6938_v25  ;;  %v2608_v44 = vrot.slane %v5292_v24, %v6938_v25  ;;  %v3068_v23 = vld [vmem:[#allocation14 + $0x1c0] sm:$0xff] }
 0x5c1   : > { %v2565_v38 = vrot.slane %v2557_v32, %v6946_v49  ;;  %v2572_v54 = vrot.slane %v2558_v34, %v6946_v49  ;;  %v2573_v39 = vcombine.low %v2541_v27, %v2556_v31  ;;  %v2574_v40 = vcombine.high %v2541_v27, %v2556_v31  ;;  %v3072_v24 = vld [vmem:[#allocation14 + $0x1e0] sm:$0xff]  ;;  %v3069_v27 = vld [vmem:[#allocation14 + $0x1c8] sm:$0xff] }
 0x5c2   : > { %v2616_v45 = vrot.slane %v2609_v33, %v6938_v25  ;;  %v2624_v26 = vrot.slane %v5293_v37, %v6938_v25  ;;  %v2625_v42 = vcombine.low %v2600_v43, %v2608_v44  ;;  %v5384_v31 = vcombine.low %v3068_v23, %v3072_v24  ;;  %v3073_v34 = vld [vmem:[#allocation14 + $0x1e8] sm:$0xff]  ;;  %v3060_v33 = vld [vmem:[#allocation14 + $0x180] sm:$0xff] }
 0x5c3   : > { %v2581_v46 = vrot.slane %v2573_v39, %v6946_v49  ;;  %v2588_v47 = vrot.slane %v2574_v40, %v6946_v49  ;;  %v2643_v48 = vcombine.low %v2565_v38, %v2572_v54  ;;  %v5294_v50 = vcombine.high %v2565_v38, %v2572_v54  ;;  %v3064_v37 = vld [vmem:[#allocation14 + $0x1a0] sm:$0xff]  ;;  %v3061_v40 = vld [vmem:[#allocation14 + $0x188] sm:$0xff] }
 0x5c4   : > { %v2633_v51 = vcombine.low %v2616_v45, %v2624_v26  ;;  %v2632_v59 = vrot.slane %v2625_v42, %v6946_v49  ;;  %v5385_v32 = vcombine.high %v3068_v23, %v3072_v24  ;;  %v5386_v38 = vcombine.low %v3069_v27, %v3073_v34  ;;  %v3065_v43 = vld [vmem:[#allocation14 + $0x1a8] sm:$0xff]  ;;  %v3052_v44 = vld [vmem:[#allocation14 + $0x140] sm:$0xff] }
 0x5c5   : > { %v2650_v36 = vrot.slane %v2643_v48, %v6938_v25  ;;  %v2658_v52 = vrot.slane %v5294_v50, %v6938_v25  ;;  %v2659_v35 = vcombine.low %v2581_v46, %v2588_v47  ;;  %v5295_v53 = vcombine.high %v2581_v46, %v2588_v47  ;;  %v3056_v26 = vld [vmem:[#allocation14 + $0x160] sm:$0xff]  ;;  %v3053_v46 = vld [vmem:[#allocation14 + $0x148] sm:$0xff] }
 0x5c6   : > { %v2640_v41 = vrot.slane %v2633_v51, %v6946_v49  ;;  %v5387_v54 = vcombine.high %v3069_v27, %v3073_v34  ;;  %v5377_v39 = vcombine.high %v3060_v33, %v3064_v37  ;;  %3822 = vmatprep.subr.bf16.mxu0 %v5385_v32  ;;  %v5379_v45 = vcombine.high %v3061_v40, %v3065_v43  ;;  %v3057_v47 = vld [vmem:[#allocation14 + $0x168] sm:$0xff]  ;;  %v3132_v34 = vld [vmem:[#allocation14 + $0x3c0] sm:$0xff] }
 0x5c7   : > { %v2666_v55 = vrot.slane %v2659_v35, %v6938_v25  ;;  %v2674_v56 = vrot.slane %v5295_v53, %v6938_v25  ;;  %v2675_v57 = vcombine.low %v2650_v36, %v2658_v52  ;;  %v2727_v25 = vld [vmem:[%s7243_s11] sm:$0x3]  ;;  %3823 = vmatpush1.bf16.msra.mxu0 %v5384_v31  ;;  %v5376_v48 = vcombine.low %v3060_v33, %v3064_v37  ;;  %v3044_v52 = vld [vmem:[#allocation14 + $0x100] sm:$0xff]  ;;  %v3045_v53 = vld [vmem:[#allocation14 + $0x108] sm:$0xff] }
 0x5c8   : > { %v2642_v61 = vcombine.high %v2632_v59, %v2640_v41  ;;  %v2641_v63 = vcombine.low %v2632_v59, %v2640_v41  ;;  %v2732_v3 = vrot.slane %v2727_v25, %v6886_v30  ;;  %v2736_v4 = vrot.slane %v2727_v25, %v6883_v29  ;;  %3865 = vmatprep.subr.bf16.mxu1 %v5387_v54  ;;  %v3048_v35 = vld [vmem:[#allocation14 + $0x120] sm:$0xff]  ;;  %v3029_v25 = vld [vmem:[#allocation14 + $0x88] sm:$0xff] }
 0x5c9   : > { %v2683_v58 = vcombine.low %v2666_v55, %v2674_v56  ;;  %v2682_v20 = vrot.slane %v2675_v57, %v6946_v49  ;;  %3824 = vmatprep.subr.bf16.mxu0 %v5377_v39  ;;  %v5378_v50 = vcombine.low %v3061_v40, %v3065_v43  ;;  %v5369_v51 = vcombine.high %v3052_v44, %v3056_v26  ;;  %v3049_v55 = vld [vmem:[#allocation14 + $0x128] sm:$0xff]  ;;  %v3040_v59 = vld [vmem:[#allocation14 + $0xe0] sm:$0xff] }
 0x5ca   : > { %v5371_v36 = vcombine.high %v3053_v46, %v3057_v47  ;;  %v5368_v56 = vcombine.low %v3052_v44, %v3056_v26  ;;  %v5370_v42 = vcombine.low %v3053_v46, %v3057_v47  ;;  %v5361_v57 = vcombine.high %v3044_v52, %v3048_v35  ;;  %v3017_v23 = vld [vmem:[#allocation14 + $0x28] sm:$0xff]  ;;  %v3136_v33 = vld [vmem:[#allocation14 + $0x3e0] sm:$0xff] }
 0x5cb   : > { %v2690_v60 = vrot.slane %v2683_v58, %v6946_v49  ;;  %3825 = vmatpush1.bf16.msra.mxu0 %v5376_v48  ;;  %v5363_v41 = vcombine.high %v3045_v53, %v3049_v55  ;;  %v3036_v58 = vld [vmem:[#allocation14 + $0xc0] sm:$0xff]  ;;  %v3133_v37 = vld [vmem:[#allocation14 + $0x3c8] sm:$0xff]  ;;  %v5449_v40 = vcombine.high %v3132_v34, %v3136_v33  ;;  %v5448_v44 = vcombine.low %v3132_v34, %v3136_v33 }
 0x5cc   : > { %3826 = vmatprep.subr.bf16.mxu0 %v5369_v51  ;;  %v3097_v34 = vld [vmem:[#allocation14 + $0x2a8] sm:$0xff] }
 0x5cd   : > { %v2692_v62 = vcombine.high %v2682_v20, %v2690_v60  ;;  %v2691_v0 = vcombine.low %v2682_v20, %v2690_v60  ;;  %v3037_v20 = vld [vmem:[#allocation14 + $0xc8] sm:$0xff] }
 0x5ce   : > { %v3041_v60 = vld [vmem:[#allocation14 + $0xe8] sm:$0xff] }
 0x5cf   : > { %v2694_v1 = vpack.c.bf16 %v2692_v62, %v2642_v61  ;;  %v2693_v2 = vpack.c.bf16 %v2691_v0, %v2641_v63  ;;  %3827 = vmatpush1.bf16.msra.mxu0 %v5368_v56  ;;  %v5360_v61 = vcombine.low %v3044_v52, %v3048_v35  ;;  %v5362_v62 = vcombine.low %v3045_v53, %v3049_v55 }
 0x5d0   : > { %3828 = vmatprep.subr.bf16.mxu0 %v5361_v57  ;;  %v5353_v63 = vcombine.high %v3036_v58, %v3040_v59  ;;  %v5355_v0 = vcombine.high %v3037_v20, %v3041_v60 }
 0x5d1   : > { %2931 = vmatprep.mubr.bf16.mxu1 %v2694_v1  ;;  %v3028_v1 = vld [vmem:[#allocation14 + $0x80] sm:$0xff] }
 0x5d2   : > { %2932 = vmatmul.mubr.bf16.vlgmr.msra.gmra.mxu1 %v2693_v2  ;;  %v3032_v2 = vld [vmem:[#allocation14 + $0xa0] sm:$0xff] }
 0x5d3   : > { %3866 = vmatpush1.bf16.msra.mxu1 %v5386_v38  ;;  %3829 = vmatpush1.bf16.msra.mxu0 %v5360_v61  ;;  %v3137_v38 = vld [vmem:[#allocation14 + $0x3e8] sm:$0xff] }
 0x5d4   : > { %3867 = vmatprep.subr.bf16.mxu1 %v5379_v45  ;;  %3830 = vmatprep.subr.bf16.mxu0 %v5353_v63  ;;  %v5451_v43 = vcombine.high %v3133_v37, %v3137_v38  ;;  %v5450_v45 = vcombine.low %v3133_v37, %v3137_v38 }
 0x5d7   : > { %3868 = vmatpush1.bf16.msra.mxu1 %v5378_v50 }
 0x5d8   : > { %3869 = vmatprep.subr.bf16.mxu1 %v5371_v36 }
 0x5db   : > { %3870 = vmatpush1.bf16.msra.mxu1 %v5370_v42 }
 0x5dc   : > { %3871 = vmatprep.subr.bf16.mxu1 %v5363_v41  ;;  %v3124_v41 = vld [vmem:[#allocation14 + $0x380] sm:$0xff] }
 0x5df   : > { %3872 = vmatpush1.bf16.msra.mxu1 %v5362_v62 }
 0x5e0   : > { %3873 = vmatprep.subr.bf16.mxu1 %v5355_v0  ;;  %v3116_v0 = vld [vmem:[#allocation14 + $0x340] sm:$0xff] }
 0x692   : > { %v2933_v49 = vpop.f32.mrf.mxu1 }
 0x693   : > { %v2934_v5 = vadd.f32 %v2933_v49, %v2732_v3  ;;  %v5354_v49 = vcombine.low %v3037_v20, %v3041_v60  ;;  %v3129_v60 = vld [vmem:[#allocation14 + $0x3a8] sm:$0xff] }
 0x694   : > { %v2935_v19 = vpop.f32.mrf.mxu1 }
 0x695   : > { %v2936_v6 = vadd.f32 %v2935_v19, %v2736_v4  ;;  %v7096_v9 = vadd.f32 %v6171_v8, %v2934_v5  ;;  %v5345_v5 = vcombine.high %v3028_v1, %v3032_v2  ;;  %v3021_v8 = vld [vmem:[#allocation14 + $0x48] sm:$0xff]  ;;  %3874 = vmatpush1.bf16.msra.mxu1 %v5354_v49 }
 0x696   : > { %v2937_v7 = vpop.f32.mrf.mxu1 }
 0x697   : > { %v7099_v11 = vadd.f32 %v6172_v10, %v2936_v6  ;;  %v2938_v12 = vadd.f32 %v2937_v7, %v2732_v3  ;;  %v3033_v3 = vld [vmem:[#allocation14 + $0xa8] sm:$0xff]  ;;  %v3020_v6 = vld [vmem:[#allocation14 + $0x40] sm:$0xff] }
 0x698   : > { %v2939_v13 = vpop.f32.mrf.mxu1  ;;  %v5347_v19 = vcombine.high %v3029_v25, %v3033_v3  ;;  %v3024_v7 = vld [vmem:[#allocation14 + $0x60] sm:$0xff]  ;;  %v3025_v10 = vld [vmem:[#allocation14 + $0x68] sm:$0xff] }
 0x699   : > { %v2940_v14 = vadd.f32 %v2939_v13, %v2736_v4  ;;  %v2948_v15 = vadd.f32 %v7099_v11, %v7096_v9  ;;  %v7104_v17 = vadd.f32 %v6173_v16, %v2938_v12  ;;  %v5352_v4 = vcombine.low %v3036_v58, %v3040_v59  ;;  %v3012_v16 = vld [vmem:[#allocation14] sm:$0xff]  ;;  %v3125_v59 = vld [vmem:[#allocation14 + $0x388] sm:$0xff] }
 0x69a   : > { %v5344_v12 = vcombine.low %v3028_v1, %v3032_v2  ;;  %v5346_v13 = vcombine.low %v3029_v25, %v3033_v3  ;;  %3875 = vmatprep.subr.bf16.mxu1 %v5347_v19  ;;  %v5336_v24 = vcombine.low %v3020_v6, %v3024_v7  ;;  %v5338_v27 = vcombine.low %v3021_v8, %v3025_v10  ;;  %v3128_v58 = vld [vmem:[#allocation14 + $0x3a0] sm:$0xff]  ;;  %v3117_v2 = vld [vmem:[#allocation14 + $0x348] sm:$0xff] }
 0x69b   : > { %v7107_v21 = vadd.f32 %v6174_v18, %v2940_v14  ;;  %2949 = vadd.xlane.f32.xlu0 %v2948_v15  ;;  %3831 = vmatpush1.bf16.msra.mxu0 %v5352_v4  ;;  %v5337_v14 = vcombine.high %v3020_v6, %v3024_v7  ;;  %v5339_v15 = vcombine.high %v3021_v8, %v3025_v10  ;;  %v3016_v18 = vld [vmem:[#allocation14 + $0x20] sm:$0xff]  ;;  %v3121_v3 = vld [vmem:[#allocation14 + $0x368] sm:$0xff] }
 0x69c   : > { %3832 = vmatprep.subr.bf16.mxu0 %v5345_v5  ;;  %3876 = vmatpush1.bf16.msra.mxu1 %v5346_v13  ;;  %v5329_v31 = vcombine.high %v3012_v16, %v3016_v18  ;;  %v5328_v54 = vcombine.low %v3012_v16, %v3016_v18  ;;  %v5441_v20 = vcombine.high %v3124_v41, %v3128_v58  ;;  %v3120_v1 = vld [vmem:[#allocation14 + $0x360] sm:$0xff]  ;;  %v3109_v7 = vld [vmem:[#allocation14 + $0x308] sm:$0xff] }
 0x69d   : > { %v2951_v22 = vadd.f32 %v7107_v21, %v7104_v17  ;;  %3877 = vmatprep.subr.bf16.mxu1 %v5339_v15  ;;  %v5440_v61 = vcombine.low %v3124_v41, %v3128_v58  ;;  %v5442_v62 = vcombine.low %v3125_v59, %v3129_v60  ;;  %v5443_v63 = vcombine.high %v3125_v59, %v3129_v60  ;;  %v3108_v19 = vld [vmem:[#allocation14 + $0x300] sm:$0xff]  ;;  %v3074_v60 = vld [vmem:[#allocation14 + $0x1f0] sm:$0xff] }
 0x69e   : > { %v5433_v25 = vcombine.high %v3116_v0, %v3120_v1  ;;  %v5432_v4 = vcombine.low %v3116_v0, %v3120_v1  ;;  %v5434_v49 = vcombine.low %v3117_v2, %v3121_v3  ;;  %v5435_v5 = vcombine.high %v3117_v2, %v3121_v3  ;;  %v3112_v6 = vld [vmem:[#allocation14 + $0x320] sm:$0xff] }
 0x69f   : > { %2952 = vadd.xlane.f32.xlu1 %v2951_v22  ;;  %v3013_v22 = vld [vmem:[#allocation14 + $0x8] sm:$0xff]  ;;  %3833 = vmatpush1.bf16.msra.mxu0 %v5344_v12  ;;  %v5424_v8 = vcombine.low %v3108_v19, %v3112_v6  ;;  %v5425_v10 = vcombine.high %v3108_v19, %v3112_v6  ;;  %v3100_v13 = vld [vmem:[#allocation14 + $0x2c0] sm:$0xff]  ;;  %v2946_v6 = vld [vmem:[%s7244_s12] sm:$0x3] }
 0x6a0   : > { %3834 = vmatprep.subr.bf16.mxu0 %v5337_v14  ;;  %v5331_v32 = vcombine.high %v3013_v22, %v3017_v23  ;;  %3878 = vmatpush1.bf16.msra.mxu1 %v5338_v27  ;;  %v5330_v39 = vcombine.low %v3013_v22, %v3017_v23  ;;  %v3113_v12 = vld [vmem:[#allocation14 + $0x328] sm:$0xff]  ;;  %v3104_v14 = vld [vmem:[#allocation14 + $0x2e0] sm:$0xff] }
 0x6a1   : > { %v5426_v15 = vcombine.low %v3109_v7, %v3113_v12  ;;  %v5427_v16 = vcombine.high %v3109_v7, %v3113_v12  ;;  %v5417_v18 = vcombine.high %v3100_v13, %v3104_v14  ;;  %v3101_v22 = vld [vmem:[#allocation14 + $0x2c8] sm:$0xff]  ;;  %v5416_v33 = vcombine.low %v3100_v13, %v3104_v14 }
 0x6a2   : > { %3879 = vmatprep.subr.bf16.mxu1 %v5331_v32  ;;  %v3105_v23 = vld [vmem:[#allocation14 + $0x2e8] sm:$0xff]  ;;  %v2988_v12 = vrot.slane %v2946_v6, %v6883_v29  ;;  %v2984_v14 = vrot.slane %v2946_v6, %v6886_v30 }
 0x6a3   : > { %3835 = vmatpush1.bf16.msra.mxu0 %v5336_v24  ;;  %v3092_v24 = vld [vmem:[#allocation14 + $0x280] sm:$0xff]  ;;  %v5419_v27 = vcombine.high %v3101_v22, %v3105_v23  ;;  %v3093_v32 = vld [vmem:[#allocation14 + $0x288] sm:$0xff]  ;;  %v5418_v37 = vcombine.low %v3101_v22, %v3105_v23 }
 0x6a4   : > { %3836 = vmatprep.subr.bf16.mxu0 %v5329_v31  ;;  %3880 = vmatpush1.bf16.msra.mxu1 %v5330_v39  ;;  %v3096_v31 = vld [vmem:[#allocation14 + $0x2a0] sm:$0xff] }
 0x6a5   : > { %3881 = vmatprep.subr.bf16.mxu1 %v5451_v43  ;;  %v5409_v38 = vcombine.high %v3092_v24, %v3096_v31  ;;  %v3084_v39 = vld [vmem:[#allocation14 + $0x240] sm:$0xff]  ;;  %v3085_v43 = vld [vmem:[#allocation14 + $0x248] sm:$0xff] }
 0x6a7   : > { %3837 = vmatpush1.bf16.msra.mxu0 %v5328_v54  ;;  %v5411_v54 = vcombine.high %v3093_v32, %v3097_v34 }
 0x6a8   : > { %3838 = vmatprep.subr.bf16.mxu0 %v5449_v40  ;;  %3882 = vmatpush2.bf16.msra.mxu1 %v5450_v45  ;;  %v3088_v40 = vld [vmem:[#allocation14 + $0x260] sm:$0xff]  ;;  %v5408_v45 = vcombine.low %v3092_v24, %v3096_v31 }
 0x6a9   : > { %3883 = vmatprep.subr.bf16.mxu1 %v5443_v63  ;;  %v3075_v63 = vld [vmem:[#allocation14 + $0x1f8] sm:$0xff] }
 0x6ab   : > { %3839 = vmatpush2.bf16.msra.mxu0 %v5448_v44  ;;  %v3089_v44 = vld [vmem:[#allocation14 + $0x268] sm:$0xff] }
 0x6ac   : > { %3840 = vmatprep.subr.bf16.mxu0 %v5441_v20  ;;  %3884 = vmatpush2.bf16.msra.mxu1 %v5442_v62  ;;  %v3070_v20 = vld [vmem:[#allocation14 + $0x1d0] sm:$0xff] }
 0x6ad   : > { %3885 = vmatprep.subr.bf16.mxu1 %v5435_v5  ;;  %v5389_v62 = vcombine.high %v3070_v20, %v3074_v60  ;;  %v5388_v0 = vcombine.low %v3070_v20, %v3074_v60  ;;  %v3038_v60 = vld [vmem:[#allocation14 + $0xd0] sm:$0xff] }
 0x6af   : > { %3841 = vmatpush2.bf16.msra.mxu0 %v5440_v61  ;;  %v3071_v61 = vld [vmem:[#allocation14 + $0x1d8] sm:$0xff] }
 0x6b0   : > { %3842 = vmatprep.subr.bf16.mxu0 %v5433_v25  ;;  %3886 = vmatpush2.bf16.msra.mxu1 %v5434_v49  ;;  %v5390_v1 = vcombine.low %v3071_v61, %v3075_v63  ;;  %v5391_v2 = vcombine.high %v3071_v61, %v3075_v63  ;;  %v3042_v61 = vld [vmem:[#allocation14 + $0xf0] sm:$0xff]  ;;  %v3043_v63 = vld [vmem:[#allocation14 + $0xf8] sm:$0xff] }
 0x6b1   : > { %3887 = vmatprep.subr.bf16.mxu1 %v5427_v16 }
 0x6b3   : > { %3843 = vmatpush2.bf16.msra.mxu0 %v5432_v4 }
 0x6b4   : > { %3844 = vmatprep.subr.bf16.mxu0 %v5425_v10  ;;  %3888 = vmatpush2.bf16.msra.mxu1 %v5426_v15 }
 0x6b5   : > { %3889 = vmatprep.subr.bf16.mxu1 %v5419_v27 }
 0x6b7   : > { %3845 = vmatpush2.bf16.msra.mxu0 %v5424_v8  ;;  %v2947_v8 = vld [vmem:[%s7245_s13] sm:$0x3] }
 0x6b8   : > { %3846 = vmatprep.subr.bf16.mxu0 %v5417_v18  ;;  %3890 = vmatpush2.bf16.msra.mxu1 %v5418_v37  ;;  %v3003_v16 = vrot.slane %v2947_v8, %v6883_v29  ;;  %v2999_v18 = vrot.slane %v2947_v8, %v6886_v30 }
 0x6b9   : > { %3891 = vmatprep.subr.bf16.mxu1 %v5411_v54  ;;  %v3063_v54 = vld [vmem:[#allocation14 + $0x198] sm:$0xff] }
 0x6bb   : > { %3847 = vmatpush2.bf16.msra.mxu0 %v5416_v33 }
 0x6bc   : > { %3848 = vmatprep.subr.bf16.mxu0 %v5409_v38  ;;  %v3066_v38 = vld [vmem:[#allocation14 + $0x1b0] sm:$0xff] }
 0x6bf   : > { %3849 = vmatpush2.bf16.msra.mxu0 %v5408_v45 }
 0x724   : > { %v2950_v26 = vpop.xlane.xlu0 %2949 }
 0x725   : > { %v2954_v46 = vmul.f32 0.00390625, %v2950_v26  ;;  %v5410_v26 = vcombine.low %v3093_v32, %v3097_v34 }
 0x727   : > { %v7112_v47 = vsub.f32 %v7096_v9, %v2954_v46  ;;  %v7115_v48 = vsub.f32 %v7099_v11, %v2954_v46  ;;  %v5401_v46 = vcombine.high %v3084_v39, %v3088_v40  ;;  %3892 = vmatpush2.bf16.msra.mxu1 %v5410_v26  ;;  %v3055_v26 = vld [vmem:[#allocation14 + $0x158] sm:$0xff] }
 0x728   : > { %v2953_v50 = vpop.xlane.xlu1 %2952 }
 0x729   : > { %v2955_v51 = vmul.f32 0.00390625, %v2953_v50  ;;  %v2960_v36 = vmul.f32 %v7112_v47, %v7112_v47  ;;  %v2961_v52 = vmul.f32 %v7115_v48, %v7115_v48  ;;  %v5403_v50 = vcombine.high %v3085_v43, %v3089_v44  ;;  %3850 = vmatprep.subr.bf16.mxu0 %v5401_v46  ;;  %v3059_v46 = vld [vmem:[#allocation14 + $0x178] sm:$0xff] }
 0x72b   : > { %v7122_v35 = vsub.f32 %v7104_v17, %v2955_v51  ;;  %v7125_v53 = vsub.f32 %v7107_v21, %v2955_v51  ;;  %v2964_v55 = vadd.f32 %v2961_v52, %v2960_v36  ;;  %v3076_v51 = vld [vmem:[#allocation14 + $0x200] sm:$0xff]  ;;  %v3077_v52 = vld [vmem:[#allocation14 + $0x208] sm:$0xff]  ;;  %3893 = vmatprep.subr.bf16.mxu1 %v5403_v50 }
 0x72c   : > { %v3080_v36 = vld [vmem:[#allocation14 + $0x220] sm:$0xff] }
 0x72d   : > { %2965 = vadd.xlane.f32.xlu0 %v2964_v55  ;;  %v2962_v56 = vmul.f32 %v7122_v35, %v7122_v35  ;;  %v2963_v42 = vmul.f32 %v7125_v53, %v7125_v53  ;;  %v3081_v55 = vld [vmem:[#allocation14 + $0x228] sm:$0xff]  ;;  %v5392_v58 = vcombine.low %v3076_v51, %v3080_v36 }
 0x72e   : > { %v5395_v41 = vcombine.high %v3077_v52, %v3081_v55  ;;  %v5394_v59 = vcombine.low %v3077_v52, %v3081_v55  ;;  %v5375_v52 = vcombine.high %v3055_v26, %v3059_v46  ;;  %v3046_v55 = vld [vmem:[#allocation14 + $0x110] sm:$0xff] }
 0x72f   : > { %v2967_v57 = vadd.f32 %v2963_v42, %v2962_v56  ;;  %v5400_v56 = vcombine.low %v3084_v39, %v3088_v40  ;;  %v5402_v42 = vcombine.low %v3085_v43, %v3089_v44  ;;  %v3067_v39 = vld [vmem:[#allocation14 + $0x1b8] sm:$0xff]  ;;  %v3054_v44 = vld [vmem:[#allocation14 + $0x150] sm:$0xff] }
 0x730   : > { %v5383_v45 = vcombine.high %v3063_v54, %v3067_v39 }
 0x731   : > { %2968 = vadd.xlane.f32.xlu1 %v2967_v57  ;;  %v5393_v57 = vcombine.high %v3076_v51, %v3080_v36  ;;  %3851 = vmatpush2.bf16.msra.mxu0 %v5400_v56  ;;  %v5382_v51 = vcombine.low %v3063_v54, %v3067_v39  ;;  %v3050_v56 = vld [vmem:[#allocation14 + $0x130] sm:$0xff]  ;;  %v3139_v54 = vld [vmem:[#allocation14 + $0x3f8] sm:$0xff] }
 0x732   : > { %3894 = vmatpush2.bf16.msra.mxu1 %v5402_v42  ;;  %v3047_v42 = vld [vmem:[#allocation14 + $0x118] sm:$0xff] }
 0x733   : > { %3852 = vmatprep.subr.bf16.mxu0 %v5393_v57  ;;  %3895 = vmatprep.subr.bf16.mxu1 %v5395_v41  ;;  %v3051_v57 = vld [vmem:[#allocation14 + $0x138] sm:$0xff] }
 0x734   : > { %v5367_v20 = vcombine.high %v3047_v42, %v3051_v57 }
 0x735   : > { %3853 = vmatpush2.bf16.msra.mxu0 %v5392_v58  ;;  %v5374_v58 = vcombine.low %v3055_v26, %v3059_v46  ;;  %v3127_v26 = vld [vmem:[#allocation14 + $0x398] sm:$0xff] }
 0x736   : > { %3896 = vmatpush2.bf16.msra.mxu1 %v5394_v59  ;;  %3908 = vmatprep.subr.bf16.mxu0 %v5389_v62  ;;  %v5365_v59 = vcombine.high %v3046_v55, %v3050_v56  ;;  %v3039_v62 = vld [vmem:[#allocation14 + $0xd8] sm:$0xff] }
 0x737   : > { %3951 = vmatprep.subr.bf16.mxu1 %v5391_v2  ;;  %v5357_v2 = vcombine.high %v3038_v60, %v3042_v61  ;;  %v5358_v6 = vcombine.low %v3039_v62, %v3043_v63  ;;  %v3131_v46 = vld [vmem:[#allocation14 + $0x3b8] sm:$0xff] }
 0x7b6   : > { %v2966_v25 = vpop.xlane.xlu0 %2965 }
 0x7b7   : > { %v2970_v3 = vmul.f32 0.00390625, %v2966_v25  ;;  %v5359_v25 = vcombine.high %v3039_v62, %v3043_v63  ;;  %v3111_v62 = vld [vmem:[#allocation14 + $0x318] sm:$0xff] }
 0x7b8   : > { %v3115_v63 = vld [vmem:[#allocation14 + $0x338] sm:$0xff] }
 0x7b9   : > { %v2972_v4 = vadd.f32 1e-05, %v2970_v3  ;;  %v3030_v3 = vld [vmem:[#allocation14 + $0x90] sm:$0xff] }
 0x7ba   : > { %v2969_v49 = vpop.xlane.xlu1 %2968 }
 0x7bb   : > { %6167 = vrsqrt.f32 %v2972_v4  ;;  %v2971_v5 = vmul.f32 0.00390625, %v2969_v49  ;;  %v3034_v4 = vld [vmem:[#allocation14 + $0xb0] sm:$0xff]  ;;  %v3031_v49 = vld [vmem:[#allocation14 + $0x98] sm:$0xff] }
 0x7bd   : > { %v2973_v19 = vadd.f32 1e-05, %v2971_v5  ;;  %v3035_v5 = vld [vmem:[#allocation14 + $0xb8] sm:$0xff] }
 0x7be   : > { %v5351_v8 = vcombine.high %v3031_v49, %v3035_v5 }
 0x7bf   : > { %6169 = vrsqrt.f32 %v2973_v19  ;;  %v5356_v19 = vcombine.low %v3038_v60, %v3042_v61  ;;  %v3110_v60 = vld [vmem:[#allocation14 + $0x310] sm:$0xff] }
 0x7c0   : > { %v3114_v61 = vld [vmem:[#allocation14 + $0x330] sm:$0xff] }
 0x7c8   : > { %v6168_v7 = vpop.eup %6167 }
 0x7c9   : > { %v2977_v10 = vmul.f32 %v6168_v7, %v7115_v48  ;;  %v2976_v13 = vmul.f32 %v6168_v7, %v7112_v47  ;;  %v3062_v47 = vld [vmem:[#allocation14 + $0x190] sm:$0xff]  ;;  %v5349_v7 = vcombine.high %v3030_v3, %v3034_v4 }
 0x7ca   : > { %v5380_v50 = vcombine.low %v3062_v47, %v3066_v38 }
 0x7cb   : > { %v2992_v23 = vmul.f32 %v2988_v12, %v2977_v10  ;;  %v2991_v27 = vmul.f32 %v2984_v14, %v2976_v13  ;;  %v3022_v10 = vld [vmem:[#allocation14 + $0x50] sm:$0xff]  ;;  %v3023_v13 = vld [vmem:[#allocation14 + $0x58] sm:$0xff] }
 0x7cc   : > { %v6170_v15 = vpop.eup %6169 }
 0x7cd   : > { %v2979_v22 = vmul.f32 %v6170_v15, %v7125_v53  ;;  %v2978_v24 = vmul.f32 %v6170_v15, %v7122_v35  ;;  %v3007_v48 = vadd.f32 %v3003_v16, %v2992_v23  ;;  %v3006_v33 = vadd.f32 %v2999_v18, %v2991_v27  ;;  %v3058_v35 = vld [vmem:[#allocation14 + $0x170] sm:$0xff]  ;;  %v3015_v27 = vld [vmem:[#allocation14 + $0x18] sm:$0xff] }
 0x7ce   : > { %v5381_v53 = vcombine.high %v3062_v47, %v3066_v38  ;;  %v5373_v36 = vcombine.high %v3054_v44, %v3058_v35  ;;  %v5372_v41 = vcombine.low %v3054_v44, %v3058_v35  ;;  %v5348_v15 = vcombine.low %v3030_v3, %v3034_v4  ;;  %v3014_v23 = vld [vmem:[#allocation14 + $0x10] sm:$0xff]  ;;  %v3135_v38 = vld [vmem:[#allocation14 + $0x3d8] sm:$0xff] }
 0x7cf   : > { %v2994_v31 = vmul.f32 %v2988_v12, %v2979_v22  ;;  %v2993_v32 = vmul.f32 %v2984_v14, %v2978_v24  ;;  %v3026_v12 = vld [vmem:[#allocation14 + $0x70] sm:$0xff]  ;;  %v3027_v14 = vld [vmem:[#allocation14 + $0x78] sm:$0xff] }
 0x7d0   : > { %v5343_v22 = vcombine.high %v3023_v13, %v3027_v14  ;;  %v3018_v24 = vld [vmem:[#allocation14 + $0x30] sm:$0xff] }
 0x7d1   : > { %v3009_v34 = vadd.f32 %v3003_v16, %v2994_v31  ;;  %v3008_v37 = vadd.f32 %v2999_v18, %v2993_v32  ;;  %v5350_v16 = vcombine.low %v3031_v49, %v3035_v5  ;;  %v5341_v18 = vcombine.high %v3022_v10, %v3026_v12  ;;  %v3019_v31 = vld [vmem:[#allocation14 + $0x38] sm:$0xff]  ;;  %v3138_v47 = vld [vmem:[#allocation14 + $0x3f0] sm:$0xff] }
 0x7d2   : > { %v5340_v32 = vcombine.low %v3022_v10, %v3026_v12  ;;  %v5332_v39 = vcombine.low %v3014_v23, %v3018_v24  ;;  %v3130_v35 = vld [vmem:[#allocation14 + $0x3b0] sm:$0xff]  ;;  %v3103_v49 = vld [vmem:[#allocation14 + $0x2d8] sm:$0xff] }
 0x7d3   : > { %v3011_v40 = vpack.c.bf16 %v3009_v34, %v3007_v48  ;;  %v7145_v43 = vpack.c.bf16 %v3008_v37, %v3006_v33  ;;  %v5342_v48 = vcombine.low %v3023_v13, %v3027_v14  ;;  %v5333_v34 = vcombine.high %v3014_v23, %v3018_v24  ;;  %v3134_v37 = vld [vmem:[#allocation14 + $0x3d0] sm:$0xff]  ;;  %v3107_v5 = vld [vmem:[#allocation14 + $0x2f8] sm:$0xff] }
 0x7d4   : > { %v5335_v33 = vcombine.high %v3015_v27, %v3019_v31  ;;  %v5453_v44 = vcombine.high %v3134_v37, %v3138_v47  ;;  %v3102_v3 = vld [vmem:[#allocation14 + $0x2d0] sm:$0xff]  ;;  %v3095_v13 = vld [vmem:[#allocation14 + $0x298] sm:$0xff] }
 0x7d5   : > { %3854 = vmatprep.mubr.bf16.mxu0 %v3011_v40  ;;  %3897 = vmatprep.mubr.bf16.mxu1 %v3011_v40  ;;  %v3106_v4 = vld [vmem:[#allocation14 + $0x2f0] sm:$0xff]  ;;  %v3099_v14 = vld [vmem:[#allocation14 + $0x2b8] sm:$0xff] }
 0x7d6   : > { %3855 = vmatmul.mubr.bf16.vlgmr.msra.gmra.mxu0 %v7145_v43  ;;  %3898 = vmatmul.mubr.bf16.vlgmr.msra.gmra.mxu1 %v7145_v43  ;;  %v3094_v10 = vld [vmem:[#allocation14 + $0x290] sm:$0xff] }
 0x7d7   : > { %3909 = vmatpush1.bf16.msra.mxu0 %v5388_v0  ;;  %3952 = vmatpush1.bf16.msra.mxu1 %v5390_v1  ;;  %v5364_v0 = vcombine.low %v3046_v55, %v3050_v56  ;;  %v5366_v1 = vcombine.low %v3047_v42, %v3051_v57  ;;  %v3118_v55 = vld [vmem:[#allocation14 + $0x350] sm:$0xff]  ;;  %v3119_v42 = vld [vmem:[#allocation14 + $0x358] sm:$0xff] }
 0x7d8   : > { %3940 = vmatprep.mubr.bf16.mxu0 %v3011_v40  ;;  %3983 = vmatprep.mubr.bf16.mxu1 %v3011_v40  ;;  %v5334_v40 = vcombine.low %v3015_v27, %v3019_v31  ;;  %v3122_v56 = vld [vmem:[#allocation14 + $0x370] sm:$0xff]  ;;  %v3123_v57 = vld [vmem:[#allocation14 + $0x378] sm:$0xff] }
 0x7d9   : > { %3910 = vmatprep.subr.bf16.mxu0 %v5381_v53  ;;  %3953 = vmatprep.subr.bf16.mxu1 %v5383_v45  ;;  %v5455_v53 = vcombine.high %v3135_v38, %v3139_v54  ;;  %v3126_v45 = vld [vmem:[#allocation14 + $0x390] sm:$0xff]  ;;  %v3087_v27 = vld [vmem:[#allocation14 + $0x258] sm:$0xff] }
 0x7da   : > { %v3098_v12 = vld [vmem:[#allocation14 + $0x2b0] sm:$0xff]  ;;  %v3091_v31 = vld [vmem:[#allocation14 + $0x278] sm:$0xff] }
 0x7db   : > { %3911 = vmatpush1.bf16.msra.mxu0 %v5380_v50  ;;  %3954 = vmatpush1.bf16.msra.mxu1 %v5382_v51  ;;  %v5452_v50 = vcombine.low %v3134_v37, %v3138_v47  ;;  %v5454_v51 = vcombine.low %v3135_v38, %v3139_v54  ;;  %v3086_v23 = vld [vmem:[#allocation14 + $0x250] sm:$0xff]  ;;  %v3079_v38 = vld [vmem:[#allocation14 + $0x218] sm:$0xff] }
 0x7dc   : > { %3912 = vmatprep.subr.bf16.mxu0 %v5373_v36  ;;  %3955 = vmatprep.subr.bf16.mxu1 %v5375_v52  ;;  %v5445_v36 = vcombine.high %v3126_v45, %v3130_v35  ;;  %v5447_v52 = vcombine.high %v3127_v26, %v3131_v46  ;;  %v3090_v24 = vld [vmem:[#allocation14 + $0x270] sm:$0xff]  ;;  %v3083_v54 = vld [vmem:[#allocation14 + $0x238] sm:$0xff] }
 0x7dd   : > { %v3078_v37 = vld [vmem:[#allocation14 + $0x210] sm:$0xff] }
 0x7de   : > { %v3082_v47 = vld [vmem:[#allocation14 + $0x230] sm:$0xff] }
 0x7df   : > { %3913 = vmatpush1.bf16.msra.mxu0 %v5372_v41  ;;  %3956 = vmatpush1.bf16.msra.mxu1 %v5374_v58  ;;  %v5444_v41 = vcombine.low %v3126_v45, %v3130_v35  ;;  %v5446_v58 = vcombine.low %v3127_v26, %v3131_v46  ;;  %v5396_v45 = vcombine.low %v3078_v37, %v3082_v47  ;;  %v5957_v26 = vld [vmem:[#allocation16 + $0x74] ss:$8 sps:$4 sm:$0xff]  }
 0x7e0   : > { %3914 = vmatprep.subr.bf16.mxu0 %v5365_v59  ;;  %3957 = vmatprep.subr.bf16.mxu1 %v5367_v20  ;;  %v5437_v59 = vcombine.high %v3118_v55, %v3122_v56  ;;  %v5439_v20 = vcombine.high %v3119_v42, %v3123_v57  ;;  %v5398_v35 = vcombine.low %v3079_v38, %v3083_v54  ;;  %v5960_v46 = vld [vmem:[#allocation16 + $0x174] ss:$8 sps:$4 sm:$0xff]  }
 0x7e3   : > { %3915 = vmatpush1.bf16.msra.mxu0 %v5364_v0  ;;  %3958 = vmatpush1.bf16.msra.mxu1 %v5366_v1  ;;  %v5436_v0 = vcombine.low %v3118_v55, %v3122_v56  ;;  %v5438_v1 = vcombine.low %v3119_v42, %v3123_v57  ;;  %v5961_v55 = vld [vmem:[#allocation16 + $0x60] ss:$8 sps:$4 sm:$0xff]   ;;  %v5969_v42 = vld [vmem:[#allocation16 + $0x54] ss:$8 sps:$4 sm:$0xff]  }
 0x7e4   : > { %3916 = vmatprep.subr.bf16.mxu0 %v5357_v2  ;;  %3959 = vmatprep.subr.bf16.mxu1 %v5359_v25  ;;  %v5429_v2 = vcombine.high %v3110_v60, %v3114_v61  ;;  %v5431_v25 = vcombine.high %v3111_v62, %v3115_v63  ;;  %v5964_v56 = vld [vmem:[#allocation16 + $0x160] ss:$8 sps:$4 sm:$0xff]   ;;  %v5972_v57 = vld [vmem:[#allocation16 + $0x154] ss:$8 sps:$4 sm:$0xff]  }
 0x7e7   : > { %3917 = vmatpush1.bf16.msra.mxu0 %v5356_v19  ;;  %3960 = vmatpush1.bf16.msra.mxu1 %v5358_v6  ;;  %v5428_v19 = vcombine.low %v3110_v60, %v3114_v61  ;;  %v5430_v6 = vcombine.low %v3111_v62, %v3115_v63  ;;  %v5973_v60 = vld [vmem:[#allocation16 + $0x40] ss:$8 sps:$4 sm:$0xff]   ;;  %v5981_v61 = vld [vmem:[#allocation16 + $0x34] ss:$8 sps:$4 sm:$0xff]   ;;  %v5979_v63 = vld [vmem:[#allocation16 + $0x30] ss:$8 sps:$4 sm:$0xff]  }
 0x7e8   : > { %3918 = vmatprep.subr.bf16.mxu0 %v5349_v7  ;;  %3961 = vmatprep.subr.bf16.mxu1 %v5351_v8  ;;  %v5421_v7 = vcombine.high %v3102_v3, %v3106_v4  ;;  %v5423_v8 = vcombine.high %v3103_v49, %v3107_v5  ;;  %v5984_v62 = vld [vmem:[#allocation16 + $0x134] ss:$8 sps:$4 sm:$0xff]  }
 0x7eb   : > { %3919 = vmatpush1.bf16.msra.mxu0 %v5348_v15  ;;  %3962 = vmatpush1.bf16.msra.mxu1 %v5350_v16  ;;  %v5420_v15 = vcombine.low %v3102_v3, %v3106_v4  ;;  %v5422_v16 = vcombine.low %v3103_v49, %v3107_v5  ;;  %v5988_v3 = vld [vmem:[#allocation16 + $0x120] ss:$8 sps:$4 sm:$0xff]   ;;  %v5993_v4 = vld [vmem:[#allocation16 + $0x14] ss:$8 sps:$4 sm:$0xff]   ;;  %v5991_v5 = vld [vmem:[#allocation16 + $0x10] ss:$8 sps:$4 sm:$0xff]  }
 0x7ec   : > { %3920 = vmatprep.subr.bf16.mxu0 %v5341_v18  ;;  %3963 = vmatprep.subr.bf16.mxu1 %v5343_v22  ;;  %v5413_v18 = vcombine.high %v3094_v10, %v3098_v12  ;;  %v5415_v22 = vcombine.high %v3095_v13, %v3099_v14  ;;  %v5996_v49 = vld [vmem:[#allocation16 + $0x114] ss:$8 sps:$4 sm:$0xff]  }
 0x7ef   : > { %3921 = vmatpush1.bf16.msra.mxu0 %v5340_v32  ;;  %3964 = vmatpush1.bf16.msra.mxu1 %v5342_v48  ;;  %v5412_v32 = vcombine.low %v3094_v10, %v3098_v12  ;;  %v5414_v48 = vcombine.low %v3095_v13, %v3099_v14  ;;  %v6000_v10 = vld [vmem:[#allocation16 + $0x100] ss:$8 sps:$4 sm:$0xff]   ;;  %v6005_v12 = vld [vmem:[#allocation16 + $0xf4] ss:$8 sps:$4 sm:$0xff]   ;;  %v6003_v14 = vld [vmem:[#allocation16 + $0xf0] ss:$8 sps:$4 sm:$0xff]  }
 0x7f0   : > { %3922 = vmatprep.subr.bf16.mxu0 %v5333_v34  ;;  %3965 = vmatprep.subr.bf16.mxu1 %v5335_v33  ;;  %v5405_v34 = vcombine.high %v3086_v23, %v3090_v24  ;;  %v5407_v33 = vcombine.high %v3087_v27, %v3091_v31  ;;  %v6008_v13 = vld [vmem:[#allocation16 + $0x1f4] ss:$8 sps:$4 sm:$0xff]  }
 0x7f3   : > { %3923 = vmatpush1.bf16.msra.mxu0 %v5332_v39  ;;  %3966 = vmatpush1.bf16.msra.mxu1 %v5334_v40  ;;  %v5404_v39 = vcombine.low %v3086_v23, %v3090_v24  ;;  %v5406_v40 = vcombine.low %v3087_v27, %v3091_v31  ;;  %v6012_v23 = vld [vmem:[#allocation16 + $0x1e0] ss:$8 sps:$4 sm:$0xff]   ;;  %v6017_v24 = vld [vmem:[#allocation16 + $0xd4] ss:$8 sps:$4 sm:$0xff]   ;;  %v6015_v31 = vld [vmem:[#allocation16 + $0xd0] ss:$8 sps:$4 sm:$0xff]  }
 0x7f4   : > { %3924 = vmatprep.subr.bf16.mxu0 %v5453_v44  ;;  %3967 = vmatprep.subr.bf16.mxu1 %v5455_v53  ;;  %v5397_v44 = vcombine.high %v3078_v37, %v3082_v47  ;;  %v5399_v53 = vcombine.high %v3079_v38, %v3083_v54  ;;  %v6020_v27 = vld [vmem:[#allocation16 + $0x1d4] ss:$8 sps:$4 sm:$0xff]   ;;  %v6024_v37 = vld [vmem:[#allocation16 + $0x1c0] ss:$8 sps:$4 sm:$0xff]   ;;  %v6027_v54 = vld [vmem:[#allocation16 + $0xb0] ss:$8 sps:$4 sm:$0xff]  }
 0x7f5   : > { %v6029_v47 = vld [vmem:[#allocation16 + $0xb4] ss:$8 sps:$4 sm:$0xff]  }
 0x7f6   : > { %v6032_v38 = vld [vmem:[#allocation16 + $0x1b4] ss:$8 sps:$4 sm:$0xff]  }
 0x7f7   : > { %3925 = vmatpush2.bf16.msra.mxu0 %v5452_v50  ;;  %3968 = vmatpush2.bf16.msra.mxu1 %v5454_v51  ;;  %v5955_v50 = vld [vmem:[#allocation16 + $0x70] ss:$8 sps:$4 sm:$0xff]  }
 0x7f8   : > { %3926 = vmatprep.subr.bf16.mxu0 %v5445_v36  ;;  %3969 = vmatprep.subr.bf16.mxu1 %v5447_v52  ;;  %v5958_v51 = vld [vmem:[#allocation16 + $0x170] ss:$8 sps:$4 sm:$0xff]   ;;  %v5963_v36 = vld [vmem:[#allocation16 + $0x64] ss:$8 sps:$4 sm:$0xff]  }
 0x7f9   : > { %v5966_v52 = vld [vmem:[#allocation16 + $0x164] ss:$8 sps:$4 sm:$0xff]  }
 0x7fb   : > { %3927 = vmatpush2.bf16.msra.mxu0 %v5444_v41  ;;  %3970 = vmatpush2.bf16.msra.mxu1 %v5446_v58  ;;  %v5967_v41 = vld [vmem:[#allocation16 + $0x50] ss:$8 sps:$4 sm:$0xff]  }
 0x7fc   : > { %3928 = vmatprep.subr.bf16.mxu0 %v5437_v59  ;;  %3971 = vmatprep.subr.bf16.mxu1 %v5439_v20  ;;  %v5970_v58 = vld [vmem:[#allocation16 + $0x150] ss:$8 sps:$4 sm:$0xff]   ;;  %v5975_v59 = vld [vmem:[#allocation16 + $0x44] ss:$8 sps:$4 sm:$0xff]  }
 0x7fd   : > { %v5978_v20 = vld [vmem:[#allocation16 + $0x144] ss:$8 sps:$4 sm:$0xff]  }
 0x7ff   : > { %3929 = vmatpush2.bf16.msra.mxu0 %v5436_v0  ;;  %3972 = vmatpush2.bf16.msra.mxu1 %v5438_v1  ;;  %v5982_v0 = vld [vmem:[#allocation16 + $0x130] ss:$8 sps:$4 sm:$0xff]   ;;  %v5987_v1 = vld [vmem:[#allocation16 + $0x24] ss:$8 sps:$4 sm:$0xff]  }
 0x800   : > { %3930 = vmatprep.subr.bf16.mxu0 %v5429_v2  ;;  %3973 = vmatprep.subr.bf16.mxu1 %v5431_v25  ;;  %v5990_v2 = vld [vmem:[#allocation16 + $0x124] ss:$8 sps:$4 sm:$0xff]   ;;  %v5985_v25 = vld [vmem:[#allocation16 + $0x20] ss:$8 sps:$4 sm:$0xff]  }
 0x803   : > { %3931 = vmatpush2.bf16.msra.mxu0 %v5428_v19  ;;  %3974 = vmatpush2.bf16.msra.mxu1 %v5430_v6  ;;  %v5994_v19 = vld [vmem:[#allocation16 + $0x110] ss:$8 sps:$4 sm:$0xff]   ;;  %v5999_v6 = vld [vmem:[#allocation16 + $0x4] ss:$8 sps:$4 sm:$0xff]  }
 0x804   : > { %3932 = vmatprep.subr.bf16.mxu0 %v5421_v7  ;;  %3975 = vmatprep.subr.bf16.mxu1 %v5423_v8  ;;  %v6002_v7 = vld [vmem:[#allocation16 + $0x104] ss:$8 sps:$4 sm:$0xff]   ;;  %v5997_v8 = vld [vmem:[#allocation16] ss:$8 sps:$4 sm:$0xff]  }
 0x807   : > { %3933 = vmatpush2.bf16.msra.mxu0 %v5420_v15  ;;  %3976 = vmatpush2.bf16.msra.mxu1 %v5422_v16  ;;  %v6006_v15 = vld [vmem:[#allocation16 + $0x1f0] ss:$8 sps:$4 sm:$0xff]   ;;  %v6011_v16 = vld [vmem:[#allocation16 + $0xe4] ss:$8 sps:$4 sm:$0xff]  }
 0x808   : > { %3934 = vmatprep.subr.bf16.mxu0 %v5413_v18  ;;  %3977 = vmatprep.subr.bf16.mxu1 %v5415_v22  ;;  %v6014_v18 = vld [vmem:[#allocation16 + $0x1e4] ss:$8 sps:$4 sm:$0xff]   ;;  %v6009_v22 = vld [vmem:[#allocation16 + $0xe0] ss:$8 sps:$4 sm:$0xff]  }
 0x80b   : > { %3935 = vmatpush2.bf16.msra.mxu0 %v5412_v32  ;;  %3978 = vmatpush2.bf16.msra.mxu1 %v5414_v48  ;;  %v6018_v32 = vld [vmem:[#allocation16 + $0x1d0] ss:$8 sps:$4 sm:$0xff]   ;;  %v6023_v48 = vld [vmem:[#allocation16 + $0xc4] ss:$8 sps:$4 sm:$0xff]  }
 0x80c   : > { %3936 = vmatprep.subr.bf16.mxu0 %v5405_v34  ;;  %3979 = vmatprep.subr.bf16.mxu1 %v5407_v33  ;;  %v6026_v34 = vld [vmem:[#allocation16 + $0x1c4] ss:$8 sps:$4 sm:$0xff]   ;;  %v6021_v33 = vld [vmem:[#allocation16 + $0xc0] ss:$8 sps:$4 sm:$0xff]  }
 0x80f   : > { %3937 = vmatpush2.bf16.msra.mxu0 %v5404_v39  ;;  %3980 = vmatpush2.bf16.msra.mxu1 %v5406_v40  ;;  %v6030_v39 = vld [vmem:[#allocation16 + $0x1b0] ss:$8 sps:$4 sm:$0xff]   ;;  %v6035_v40 = vld [vmem:[#allocation16 + $0xa4] ss:$8 sps:$4 sm:$0xff]  }
 0x810   : > { %3938 = vmatprep.subr.bf16.mxu0 %v5397_v44  ;;  %3981 = vmatprep.subr.bf16.mxu1 %v5399_v53  ;;  %v6038_v44 = vld [vmem:[#allocation16 + $0x1a4] ss:$8 sps:$4 sm:$0xff]   ;;  %v6033_v53 = vld [vmem:[#allocation16 + $0xa0] ss:$8 sps:$4 sm:$0xff]  }
 0x813   : > { %3939 = vmatpush2.bf16.msra.mxu0 %v5396_v45  ;;  %3982 = vmatpush2.bf16.msra.mxu1 %v5398_v35  ;;  %v6036_v45 = vld [vmem:[#allocation16 + $0x1a0] ss:$8 sps:$4 sm:$0xff]   ;;  %v6041_v35 = vld [vmem:[#allocation16 + $0x94] ss:$8 sps:$4 sm:$0xff]  }
 0x814   : > { %4814 = vmatprep.subr.bf16.mxu0 %v5957_v26  ;;  %4857 = vmatprep.subr.bf16.mxu1 %v5960_v46  ;;  %v6044_v26 = vld [vmem:[#allocation16 + $0x194] ss:$8 sps:$4 sm:$0xff]   ;;  %v6039_v46 = vld [vmem:[#allocation16 + $0x90] ss:$8 sps:$4 sm:$0xff]  }
 0x816   : > { %3941 = vmatmul.mubr.bf16.vlgmr.msra.gmra.mxu0 %v7145_v43  ;;  %3984 = vmatmul.mubr.bf16.vlgmr.msra.gmra.mxu1 %v7145_v43  ;;  %v5976_v43 = vld [vmem:[#allocation16 + $0x140] ss:$8 sps:$4 sm:$0xff]  }
 0x817   : > { %4815 = vmatpush1.bf16.msra.mxu0 %v5955_v50  ;;  %4858 = vmatpush1.bf16.msra.mxu1 %v5958_v51  ;;  %v6042_v50 = vld [vmem:[#allocation16 + $0x190] ss:$8 sps:$4 sm:$0xff]   ;;  %v6047_v51 = vld [vmem:[#allocation16 + $0x84] ss:$8 sps:$4 sm:$0xff]  }
 0x818   : > { %4816 = vmatprep.subr.bf16.mxu0 %v5963_v36  ;;  %4859 = vmatprep.subr.bf16.mxu1 %v5966_v52  ;;  %v6050_v36 = vld [vmem:[#allocation16 + $0x184] ss:$8 sps:$4 sm:$0xff]   ;;  %v6045_v52 = vld [vmem:[#allocation16 + $0x80] ss:$8 sps:$4 sm:$0xff]  }
 0x81b   : > { %4817 = vmatpush1.bf16.msra.mxu0 %v5961_v55  ;;  %4860 = vmatpush1.bf16.msra.mxu1 %v5964_v56  ;;  %v6048_v55 = vld [vmem:[#allocation16 + $0x180] ss:$8 sps:$4 sm:$0xff]   ;;  %v6053_v56 = vld [vmem:[#allocation16 + $0x274] ss:$8 sps:$4 sm:$0xff]  }
 0x81c   : > { %4818 = vmatprep.subr.bf16.mxu0 %v5969_v42  ;;  %4861 = vmatprep.subr.bf16.mxu1 %v5972_v57  ;;  %v6056_v42 = vld [vmem:[#allocation16 + $0x374] ss:$8 sps:$4 sm:$0xff]   ;;  %v3156_v57 = vsub.s32 3, %v6880_v28 }
 0x81f   : > { %4819 = vmatpush1.bf16.msra.mxu0 %v5967_v41  ;;  %4862 = vmatpush1.bf16.msra.mxu1 %v5970_v58  ;;  %v3152_v41 = vsub.s32 2, %v6880_v28  ;;  %v7156_v58 = vld [vmem:[%s7247_s15] sm:$0xff] }
 0x820   : > { %4820 = vmatprep.subr.bf16.mxu0 %v5975_v59  ;;  %4863 = vmatprep.subr.bf16.mxu1 %v5978_v20  ;;  %v3149_v59 = vrot.slane %v7156_v58, %v6883_v29  ;;  %v3157_v20 = vrot.slane %v7156_v58, %v3156_v57  ;;  %v6077_v57 = vld [vmem:[#allocation16 + $0x234] ss:$8 sps:$4 sm:$0xff]  }
 0x823   : > { %4821 = vmatpush1.bf16.msra.mxu0 %v5973_v60  ;;  %4864 = vmatpush1.bf16.msra.mxu1 %v5976_v43  ;;  %v3145_v60 = vrot.slane %v7156_v58, %v6886_v30 }
 0x824   : > { %4822 = vmatprep.subr.bf16.mxu0 %v5981_v61  ;;  %4865 = vmatprep.subr.bf16.mxu1 %v5984_v62  ;;  %v3153_v61 = vrot.slane %v7156_v58, %v3152_v41  ;;  %v6080_v41 = vld [vmem:[#allocation16 + $0x334] ss:$8 sps:$4 sm:$0xff]  }
 0x827   : > { %4823 = vmatpush1.bf16.msra.mxu0 %v5979_v63  ;;  %4866 = vmatpush1.bf16.msra.mxu1 %v5982_v0 }
 0x828   : > { %4824 = vmatprep.subr.bf16.mxu0 %v5987_v1  ;;  %4867 = vmatprep.subr.bf16.mxu1 %v5990_v2 }
 0x82b   : > { %4825 = vmatpush1.bf16.msra.mxu0 %v5985_v25  ;;  %4868 = vmatpush1.bf16.msra.mxu1 %v5988_v3 }
 0x82c   : > { %4826 = vmatprep.subr.bf16.mxu0 %v5993_v4  ;;  %4869 = vmatprep.subr.bf16.mxu1 %v5996_v49 }
 0x82f   : > { %4827 = vmatpush1.bf16.msra.mxu0 %v5991_v5  ;;  %4870 = vmatpush1.bf16.msra.mxu1 %v5994_v19 }
 0x830   : > { %4828 = vmatprep.subr.bf16.mxu0 %v5999_v6  ;;  %4871 = vmatprep.subr.bf16.mxu1 %v6002_v7 }
 0x833   : > { %4829 = vmatpush1.bf16.msra.mxu0 %v5997_v8  ;;  %4872 = vmatpush1.bf16.msra.mxu1 %v6000_v10 }
 0x834   : > { %4830 = vmatprep.subr.bf16.mxu0 %v6005_v12  ;;  %4873 = vmatprep.subr.bf16.mxu1 %v6008_v13 }
 0x837   : > { %4831 = vmatpush2.bf16.msra.mxu0 %v6003_v14  ;;  %4874 = vmatpush2.bf16.msra.mxu1 %v6006_v15 }
 0x838   : > { %4832 = vmatprep.subr.bf16.mxu0 %v6011_v16  ;;  %4875 = vmatprep.subr.bf16.mxu1 %v6014_v18 }
 0x83b   : > { %4833 = vmatpush2.bf16.msra.mxu0 %v6009_v22  ;;  %4876 = vmatpush2.bf16.msra.mxu1 %v6012_v23 }
 0x83c   : > { %4834 = vmatprep.subr.bf16.mxu0 %v6017_v24  ;;  %4877 = vmatprep.subr.bf16.mxu1 %v6020_v27 }
 0x83f   : > { %4835 = vmatpush2.bf16.msra.mxu0 %v6015_v31  ;;  %4878 = vmatpush2.bf16.msra.mxu1 %v6018_v32 }
 0x840   : > { %4836 = vmatprep.subr.bf16.mxu0 %v6023_v48  ;;  %4879 = vmatprep.subr.bf16.mxu1 %v6026_v34 }
 0x843   : > { %4837 = vmatpush2.bf16.msra.mxu0 %v6021_v33  ;;  %4880 = vmatpush2.bf16.msra.mxu1 %v6024_v37 }
 0x844   : > { %4838 = vmatprep.subr.bf16.mxu0 %v6029_v47  ;;  %4881 = vmatprep.subr.bf16.mxu1 %v6032_v38 }
 0x847   : > { %4839 = vmatpush2.bf16.msra.mxu0 %v6027_v54  ;;  %4882 = vmatpush2.bf16.msra.mxu1 %v6030_v39  ;;  %v6051_v54 = vld [vmem:[#allocation16 + $0x270] ss:$8 sps:$4 sm:$0xff]  }
 0x848   : > { %4840 = vmatprep.subr.bf16.mxu0 %v6035_v40  ;;  %4883 = vmatprep.subr.bf16.mxu1 %v6038_v44  ;;  %v6054_v39 = vld [vmem:[#allocation16 + $0x370] ss:$8 sps:$4 sm:$0xff]  }
 0x84b   : > { %4841 = vmatpush2.bf16.msra.mxu0 %v6033_v53  ;;  %4884 = vmatpush2.bf16.msra.mxu1 %v6036_v45  ;;  %v6059_v53 = vld [vmem:[#allocation16 + $0x264] ss:$8 sps:$4 sm:$0xff]  }
 0x84c   : > { %4842 = vmatprep.subr.bf16.mxu0 %v6041_v35  ;;  %4885 = vmatprep.subr.bf16.mxu1 %v6044_v26  ;;  %v6062_v45 = vld [vmem:[#allocation16 + $0x364] ss:$8 sps:$4 sm:$0xff]   ;;  %v6057_v35 = vld [vmem:[#allocation16 + $0x260] ss:$8 sps:$4 sm:$0xff]  }
 0x84d   : > { %v6060_v26 = vld [vmem:[#allocation16 + $0x360] ss:$8 sps:$4 sm:$0xff]  }
 0x84f   : > { %4843 = vmatpush2.bf16.msra.mxu0 %v6039_v46  ;;  %4886 = vmatpush2.bf16.msra.mxu1 %v6042_v50  ;;  %v6065_v46 = vld [vmem:[#allocation16 + $0x254] ss:$8 sps:$4 sm:$0xff]  }
 0x850   : > { %4844 = vmatprep.subr.bf16.mxu0 %v6047_v51  ;;  %4887 = vmatprep.subr.bf16.mxu1 %v6050_v36  ;;  %v6068_v50 = vld [vmem:[#allocation16 + $0x354] ss:$8 sps:$4 sm:$0xff]   ;;  %v6063_v51 = vld [vmem:[#allocation16 + $0x250] ss:$8 sps:$4 sm:$0xff]  }
 0x851   : > { %v6066_v36 = vld [vmem:[#allocation16 + $0x350] ss:$8 sps:$4 sm:$0xff]  }
 0x853   : > { %4845 = vmatpush2.bf16.msra.mxu0 %v6045_v52  ;;  %4888 = vmatpush2.bf16.msra.mxu1 %v6048_v55  ;;  %v6071_v52 = vld [vmem:[#allocation16 + $0x244] ss:$8 sps:$4 sm:$0xff]  }
 0x854   : > { %4900 = vmatprep.subr.bf16.mxu0 %v6053_v56  ;;  %4943 = vmatprep.subr.bf16.mxu1 %v6056_v42  ;;  %v6074_v55 = vld [vmem:[#allocation16 + $0x344] ss:$8 sps:$4 sm:$0xff]   ;;  %v6069_v56 = vld [vmem:[#allocation16 + $0x240] ss:$8 sps:$4 sm:$0xff]  }
 0x855   : > { %v6072_v42 = vld [vmem:[#allocation16 + $0x340] ss:$8 sps:$4 sm:$0xff]  }
 0x896   : > { %v3856_v43 = vpop.f32.mrf.mxu0  ;;  %v3899_v62 = vpop.f32.mrf.mxu1 }
 0x897   : > { %v3857_v25 = vadd.f32 %v3856_v43, %v3145_v60  ;;  %v3900_v3 = vadd.f32 %v3899_v62, %v3153_v61  ;;  %v6086_v43 = vld [vmem:[#allocation16 + $0x324] ss:$8 sps:$4 sm:$0xff]   ;;  %v6084_v62 = vld [vmem:[#allocation16 + $0x320] ss:$8 sps:$4 sm:$0xff]  }
 0x898   : > { %v3858_v63 = vpop.f32.mrf.mxu0  ;;  %v3901_v0 = vpop.f32.mrf.mxu1 }
 0x899   : > { %v3859_v1 = vadd.f32 %v3858_v63, %v3149_v59  ;;  %v3902_v2 = vadd.f32 %v3901_v0, %v3157_v20  ;;  %v3994_v14 = vmax.f32 %v3857_v25, 0.0  ;;  %v3996_v15 = vmax.f32 %v3900_v3, 0.0  ;;  %v6089_v63 = vld [vmem:[#allocation16 + $0x214] ss:$8 sps:$4 sm:$0xff]   ;;  %v6095_v25 = vld [vmem:[#allocation16 + $0x204] ss:$8 sps:$4 sm:$0xff]  }
 0x89a   : > { %v3860_v4 = vpop.f32.mrf.mxu0  ;;  %v3903_v49 = vpop.f32.mrf.mxu1  ;;  %v6092_v0 = vld [vmem:[#allocation16 + $0x314] ss:$8 sps:$4 sm:$0xff]   ;;  %v6098_v3 = vld [vmem:[#allocation16 + $0x304] ss:$8 sps:$4 sm:$0xff]  }
 0x89b   : > { %v3861_v5 = vadd.f32 %v3860_v4, %v3145_v60  ;;  %v3904_v19 = vadd.f32 %v3903_v49, %v3153_v61  ;;  %v3995_v8 = vmax.f32 %v3859_v1, 0.0  ;;  %v3997_v10 = vmax.f32 %v3902_v2, 0.0  ;;  %v6083_v60 = vld [vmem:[#allocation16 + $0x224] ss:$8 sps:$4 sm:$0xff]   ;;  %v6081_v61 = vld [vmem:[#allocation16 + $0x220] ss:$8 sps:$4 sm:$0xff]  }
 0x89c   : > { %v3862_v6 = vpop.f32.mrf.mxu0  ;;  %v3905_v7 = vpop.f32.mrf.mxu1  ;;  %v4010_v33 = vmul.f32 %v3994_v14, %v3994_v14  ;;  %v4012_v37 = vmul.f32 %v3996_v15, %v3996_v15  ;;  %v6087_v1 = vld [vmem:[#allocation16 + $0x210] ss:$8 sps:$4 sm:$0xff]   ;;  %v6093_v4 = vld [vmem:[#allocation16 + $0x200] ss:$8 sps:$4 sm:$0xff]   ;;  %v6113_v14 = vld [vmem:[#allocation16 + $0x2d4] ss:$8 sps:$4 sm:$0xff]  }
 0x89d   : > { %v3863_v12 = vadd.f32 %v3862_v6, %v3149_v59  ;;  %v3906_v13 = vadd.f32 %v3905_v7, %v3157_v20  ;;  %v4002_v16 = vmax.f32 %v3861_v5, 0.0  ;;  %v4004_v18 = vmax.f32 %v3904_v19, 0.0  ;;  %v6075_v59 = vld [vmem:[#allocation16 + $0x230] ss:$8 sps:$4 sm:$0xff]   ;;  %v6096_v49 = vld [vmem:[#allocation16 + $0x300] ss:$8 sps:$4 sm:$0xff]  }
 0x89e   : > { %v4011_v31 = vmul.f32 %v3995_v8, %v3995_v8  ;;  %v4013_v32 = vmul.f32 %v3997_v10, %v3997_v10  ;;  %v6078_v20 = vld [vmem:[#allocation16 + $0x330] ss:$8 sps:$4 sm:$0xff]   ;;  %v6101_v5 = vld [vmem:[#allocation16 + $0x2f4] ss:$8 sps:$4 sm:$0xff]   ;;  %v6107_v8 = vld [vmem:[#allocation16 + $0x2e4] ss:$8 sps:$4 sm:$0xff]  }
 0x89f   : > { %v4003_v22 = vmax.f32 %v3863_v12, 0.0  ;;  %v4005_v23 = vmax.f32 %v3906_v13, 0.0  ;;  %v4018_v24 = vmul.f32 %v4002_v16, %v4002_v16  ;;  %v4020_v27 = vmul.f32 %v4004_v18, %v4004_v18  ;;  %v6090_v2 = vld [vmem:[#allocation16 + $0x310] ss:$8 sps:$4 sm:$0xff]   ;;  %v6104_v19 = vld [vmem:[#allocation16 + $0x3f4] ss:$8 sps:$4 sm:$0xff]  }
 0x8a0   : > { %v6099_v6 = vld [vmem:[#allocation16 + $0x2f0] ss:$8 sps:$4 sm:$0xff]   ;;  %v6110_v10 = vld [vmem:[#allocation16 + $0x3e4] ss:$8 sps:$4 sm:$0xff]   ;;  %v6105_v12 = vld [vmem:[#allocation16 + $0x2e0] ss:$8 sps:$4 sm:$0xff]  }
 0x8a1   : > { %v4019_v48 = vmul.f32 %v4003_v22, %v4003_v22  ;;  %v4021_v34 = vmul.f32 %v4005_v23, %v4005_v23  ;;  %v4026_v40 = vpack.c.bf16 %v4018_v24, %v4010_v33  ;;  %v4028_v44 = vpack.c.bf16 %v4020_v27, %v4012_v37  ;;  %v6102_v7 = vld [vmem:[#allocation16 + $0x3f0] ss:$8 sps:$4 sm:$0xff]   ;;  %v6108_v13 = vld [vmem:[#allocation16 + $0x3e0] ss:$8 sps:$4 sm:$0xff]   ;;  %v6116_v15 = vld [vmem:[#allocation16 + $0x3d4] ss:$8 sps:$4 sm:$0xff]  }
 0x8a2   : > { %v6111_v16 = vld [vmem:[#allocation16 + $0x2d0] ss:$8 sps:$4 sm:$0xff]   ;;  %v6119_v22 = vld [vmem:[#allocation16 + $0x2c4] ss:$8 sps:$4 sm:$0xff]   ;;  %v6117_v24 = vld [vmem:[#allocation16 + $0x2c0] ss:$8 sps:$4 sm:$0xff]  }
 0x8a3   : > { %v4027_v47 = vpack.c.bf16 %v4019_v48, %v4011_v31  ;;  %v4029_v38 = vpack.c.bf16 %v4021_v34, %v4013_v32  ;;  %v6114_v18 = vld [vmem:[#allocation16 + $0x3d0] ss:$8 sps:$4 sm:$0xff]   ;;  %v6122_v23 = vld [vmem:[#allocation16 + $0x3c4] ss:$8 sps:$4 sm:$0xff]   ;;  %v6120_v27 = vld [vmem:[#allocation16 + $0x3c0] ss:$8 sps:$4 sm:$0xff]  }
 0x8a4   : > { %v6125_v31 = vld [vmem:[#allocation16 + $0x2b4] ss:$8 sps:$4 sm:$0xff]   ;;  %v3164_v48 = vsub.s32 5, %v6880_v28  ;;  %v3172_v34 = vsub.s32 7, %v6880_v28  ;;  %v3160_v33 = vsub.s32 4, %v6880_v28  ;;  %v3168_v37 = vsub.s32 6, %v6880_v28 }
 0x8a5   : > { %4846 = vmatprep.mubr.bf16.mxu0 %v4027_v47  ;;  %4889 = vmatprep.mubr.bf16.mxu1 %v4029_v38  ;;  %v6128_v32 = vld [vmem:[#allocation16 + $0x3b4] ss:$8 sps:$4 sm:$0xff]   ;;  %v6123_v47 = vld [vmem:[#allocation16 + $0x2b0] ss:$8 sps:$4 sm:$0xff]   ;;  %v6129_v28 = vld [vmem:[#allocation16 + $0x2a0] ss:$8 sps:$4 sm:$0xff]  }
 0x8a6   : > { %4847 = vmatmul.mubr.bf16.vlgmr.msra.gmra.mxu0 %v4026_v40  ;;  %4890 = vmatmul.mubr.bf16.vlgmr.msra.gmra.mxu1 %v4028_v44  ;;  %v6126_v38 = vld [vmem:[#allocation16 + $0x3b0] ss:$8 sps:$4 sm:$0xff]   ;;  %v3165_v40 = vrot.slane %v7156_v58, %v3164_v48  ;;  %v3173_v44 = vrot.slane %v7156_v58, %v3172_v34 }
 0x8a7   : > { %4901 = vmatpush1.bf16.msra.mxu0 %v6051_v54  ;;  %4944 = vmatpush1.bf16.msra.mxu1 %v6054_v39  ;;  %v6131_v54 = vld [vmem:[#allocation16 + $0x2a4] ss:$8 sps:$4 sm:$0xff]  }
 0x8a8   : > { %4902 = vmatprep.subr.bf16.mxu0 %v6059_v53  ;;  %4945 = vmatprep.subr.bf16.mxu1 %v6062_v45  ;;  %v6134_v39 = vld [vmem:[#allocation16 + $0x3a4] ss:$8 sps:$4 sm:$0xff]   ;;  %v3161_v53 = vrot.slane %v7156_v58, %v3160_v33  ;;  %v4162_v33 = vld [vmem:[%s7304_s6] sm:$0x3] }
 0x8ab   : > { %4903 = vmatpush1.bf16.msra.mxu0 %v6057_v35  ;;  %4946 = vmatpush1.bf16.msra.mxu1 %v6060_v26  ;;  %v3169_v35 = vrot.slane %v7156_v58, %v3168_v37  ;;  %v6135_v58 = vld [vmem:[#allocation16 + $0x290] ss:$8 sps:$4 sm:$0xff]  }
 0x8ac   : > { %4904 = vmatprep.subr.bf16.mxu0 %v6065_v46  ;;  %4947 = vmatprep.subr.bf16.mxu1 %v6068_v50  ;;  %v6132_v46 = vld [vmem:[#allocation16 + $0x3a0] ss:$8 sps:$4 sm:$0xff]  }
 0x8af   : > { %4905 = vmatpush1.bf16.msra.mxu0 %v6063_v51  ;;  %4948 = vmatpush1.bf16.msra.mxu1 %v6066_v36  ;;  %v6137_v36 = vld [vmem:[#allocation16 + $0x294] ss:$8 sps:$4 sm:$0xff]  }
 0x8b0   : > { %4906 = vmatprep.subr.bf16.mxu0 %v6071_v52  ;;  %4949 = vmatprep.subr.bf16.mxu1 %v6074_v55  ;;  %v6140_v52 = vld [vmem:[#allocation16 + $0x394] ss:$8 sps:$4 sm:$0xff]  }
 0x8b3   : > { %4907 = vmatpush1.bf16.msra.mxu0 %v6069_v56  ;;  %4950 = vmatpush1.bf16.msra.mxu1 %v6072_v42 }
 0x8b4   : > { %4908 = vmatprep.subr.bf16.mxu0 %v6077_v57  ;;  %4951 = vmatprep.subr.bf16.mxu1 %v6080_v41 }
 0x8b7   : > { %4909 = vmatpush1.bf16.msra.mxu0 %v6075_v59  ;;  %4952 = vmatpush1.bf16.msra.mxu1 %v6078_v20  ;;  %v6138_v20 = vld [vmem:[#allocation16 + $0x390] ss:$8 sps:$4 sm:$0xff]  }
 0x8b8   : > { %4910 = vmatprep.subr.bf16.mxu0 %v6083_v60  ;;  %4953 = vmatprep.subr.bf16.mxu1 %v6086_v43 }
 0x8bb   : > { %4911 = vmatpush1.bf16.msra.mxu0 %v6081_v61  ;;  %4954 = vmatpush1.bf16.msra.mxu1 %v6084_v62 }
 0x8bc   : > { %4912 = vmatprep.subr.bf16.mxu0 %v6089_v63  ;;  %4955 = vmatprep.subr.bf16.mxu1 %v6092_v0  ;;  %v6143_v63 = vld [vmem:[#allocation16 + $0x284] ss:$8 sps:$4 sm:$0xff]  }
 0x8bd   : > { %v6146_v0 = vld [vmem:[#allocation16 + $0x384] ss:$8 sps:$4 sm:$0xff]  }
 0x8bf   : > { %4913 = vmatpush1.bf16.msra.mxu0 %v6087_v1  ;;  %4956 = vmatpush1.bf16.msra.mxu1 %v6090_v2 }
 0x8c0   : > { %4914 = vmatprep.subr.bf16.mxu0 %v6095_v25  ;;  %4957 = vmatprep.subr.bf16.mxu1 %v6098_v3 }
 0x8c3   : > { %4915 = vmatpush1.bf16.msra.mxu0 %v6093_v4  ;;  %4958 = vmatpush1.bf16.msra.mxu1 %v6096_v49 }
 0x8c4   : > { %4916 = vmatprep.subr.bf16.mxu0 %v6101_v5  ;;  %4959 = vmatprep.subr.bf16.mxu1 %v6104_v19 }
 0x8c7   : > { %4917 = vmatpush2.bf16.msra.mxu0 %v6099_v6  ;;  %4960 = vmatpush2.bf16.msra.mxu1 %v6102_v7 }
 0x8c8   : > { %4918 = vmatprep.subr.bf16.mxu0 %v6107_v8  ;;  %4961 = vmatprep.subr.bf16.mxu1 %v6110_v10  ;;  %v6141_v8 = vld [vmem:[#allocation16 + $0x280] ss:$8 sps:$4 sm:$0xff]  }
 0x8c9   : > { %v6144_v10 = vld [vmem:[#allocation16 + $0x380] ss:$8 sps:$4 sm:$0xff]  }
 0x8cb   : > { %4919 = vmatpush2.bf16.msra.mxu0 %v6105_v12  ;;  %4962 = vmatpush2.bf16.msra.mxu1 %v6108_v13 }
 0x8cc   : > { %4920 = vmatprep.subr.bf16.mxu0 %v6113_v14  ;;  %4963 = vmatprep.subr.bf16.mxu1 %v6116_v15 }
 0x8cf   : > { %4921 = vmatpush2.bf16.msra.mxu0 %v6111_v16  ;;  %4964 = vmatpush2.bf16.msra.mxu1 %v6114_v18 }
 0x8d0   : > { %4922 = vmatprep.subr.bf16.mxu0 %v6119_v22  ;;  %4965 = vmatprep.subr.bf16.mxu1 %v6122_v23 }
 0x8d3   : > { %4923 = vmatpush2.bf16.msra.mxu0 %v6117_v24  ;;  %4966 = vmatpush2.bf16.msra.mxu1 %v6120_v27 }
 0x8d4   : > { %4924 = vmatprep.subr.bf16.mxu0 %v6125_v31  ;;  %4967 = vmatprep.subr.bf16.mxu1 %v6128_v32 }
 0x8d6   : > { %v3942_v45 = vpop.f32.mrf.mxu0  ;;  %v3985_v26 = vpop.f32.mrf.mxu1 }
 0x8d7   : > { %4925 = vmatpush2.bf16.msra.mxu0 %v6123_v47  ;;  %4968 = vmatpush2.bf16.msra.mxu1 %v6126_v38  ;;  %v3943_v42 = vadd.f32 %v3942_v45, %v3161_v53  ;;  %v3986_v57 = vadd.f32 %v3985_v26, %v3169_v35  ;;  %v4167_v38 = vrot.slane %v4162_v33, %v6886_v30 }
 0x8d8   : > { %v3944_v50 = vpop.f32.mrf.mxu0  ;;  %v3987_v51 = vpop.f32.mrf.mxu1  ;;  %4926 = vmatprep.subr.bf16.mxu0 %v6131_v54  ;;  %4969 = vmatprep.subr.bf16.mxu1 %v6134_v39  ;;  %v4171_v54 = vrot.slane %v4162_v33, %v6883_v29 }
 0x8d9   : > { %v3945_v55 = vadd.f32 %v3944_v50, %v3165_v40  ;;  %v3988_v56 = vadd.f32 %v3987_v51, %v3173_v44  ;;  %v3998_v4 = vmax.f32 %v3943_v42, 0.0  ;;  %v4000_v49 = vmax.f32 %v3986_v57, 0.0 }
 0x8da   : > { %v3946_v41 = vpop.f32.mrf.mxu0  ;;  %v3989_v59 = vpop.f32.mrf.mxu1 }
 0x8db   : > { %4927 = vmatpush2.bf16.msra.mxu0 %v6129_v28  ;;  %4970 = vmatpush2.bf16.msra.mxu1 %v6132_v46  ;;  %v3947_v60 = vadd.f32 %v3946_v41, %v3161_v53  ;;  %v3990_v43 = vadd.f32 %v3989_v59, %v3169_v35  ;;  %v3999_v1 = vmax.f32 %v3945_v55, 0.0  ;;  %v4001_v2 = vmax.f32 %v3988_v56, 0.0 }
 0x8dc   : > { %v3948_v61 = vpop.f32.mrf.mxu0  ;;  %v3991_v62 = vpop.f32.mrf.mxu1  ;;  %4928 = vmatprep.subr.bf16.mxu0 %v6137_v36  ;;  %4971 = vmatprep.subr.bf16.mxu1 %v6140_v52  ;;  %v4014_v22 = vmul.f32 %v3998_v4, %v3998_v4  ;;  %v4016_v23 = vmul.f32 %v4000_v49, %v4000_v49 }
 0x8dd   : > { %v3949_v25 = vadd.f32 %v3948_v61, %v3165_v40  ;;  %v3992_v3 = vadd.f32 %v3991_v62, %v3173_v44  ;;  %v4006_v5 = vmax.f32 %v3947_v60, 0.0  ;;  %v4008_v19 = vmax.f32 %v3990_v43, 0.0 }
 0x8de   : > { %v4015_v14 = vmul.f32 %v3999_v1, %v3999_v1  ;;  %v4017_v15 = vmul.f32 %v4001_v2, %v4001_v2 }
 0x8df   : > { %v4007_v6 = vmax.f32 %v3949_v25, 0.0  ;;  %v4009_v7 = vmax.f32 %v3992_v3, 0.0  ;;  %4929 = vmatpush2.bf16.msra.mxu0 %v6135_v58  ;;  %4972 = vmatpush2.bf16.msra.mxu1 %v6138_v20  ;;  %v4022_v12 = vmul.f32 %v4006_v5, %v4006_v5  ;;  %v4024_v13 = vmul.f32 %v4008_v19, %v4008_v19 }
 0x8e0   : > { %4930 = vmatprep.subr.bf16.mxu0 %v6143_v63  ;;  %4973 = vmatprep.subr.bf16.mxu1 %v6146_v0 }
 0x8e1   : > { %v4023_v16 = vmul.f32 %v4007_v6, %v4007_v6  ;;  %v4025_v18 = vmul.f32 %v4009_v7, %v4009_v7  ;;  %v4030_v31 = vpack.c.bf16 %v4022_v12, %v4014_v22  ;;  %v4032_v32 = vpack.c.bf16 %v4024_v13, %v4016_v23 }
 0x8e3   : > { %v4031_v24 = vpack.c.bf16 %v4023_v16, %v4015_v14  ;;  %v4033_v27 = vpack.c.bf16 %v4025_v18, %v4017_v15  ;;  %4931 = vmatpush2.bf16.msra.mxu0 %v6141_v8  ;;  %4974 = vmatpush2.bf16.msra.mxu1 %v6144_v10 }
 0x8e5   : > { %4932 = vmatprep.mubr.bf16.mxu0 %v4031_v24  ;;  %4975 = vmatprep.mubr.bf16.mxu1 %v4033_v27 }
 0x8e6   : > { %4933 = vmatmul.mubr.bf16.vlgmr.msra.gmra.mxu0 %v4030_v31  ;;  %4976 = vmatmul.mubr.bf16.vlgmr.msra.gmra.mxu1 %v4032_v32 }
 0x966   : > { %v4848_v48 = vpop.f32.mrf.mxu0  ;;  %v4891_v34 = vpop.f32.mrf.mxu1 }
 0x967   : > { %v4849_v44 = vadd.f32 %v4848_v48, %v4167_v38 }
 0x968   : > { %v4850_v37 = vpop.f32.mrf.mxu0  ;;  %v4893_v47 = vpop.f32.mrf.mxu1 }
 0x969   : > { %v4851_v53 = vadd.f32 %v4850_v37, %v4171_v54  ;;  %v4892_v26 = vadd.f32 %v4891_v34, %v4849_v44 }
 0x96a   : > { %v4852_v39 = vpop.f32.mrf.mxu0  ;;  %v4895_v40 = vpop.f32.mrf.mxu1 }
 0x96b   : > { %v4853_v28 = vadd.f32 %v4852_v39, %v4167_v38  ;;  %v4894_v51 = vadd.f32 %v4893_v47, %v4851_v53 }
 0x96c   : > { %v4854_v45 = vpop.f32.mrf.mxu0  ;;  %v4897_v35 = vpop.f32.mrf.mxu1 }
 0x96d   : > { %v4855_v36 = vadd.f32 %v4854_v45, %v4171_v54  ;;  %v4896_v42 = vadd.f32 %v4895_v40, %v4853_v28 }
 0x96f   : > { %v4898_v59 = vadd.f32 %v4897_v35, %v4855_v36 }
 0x9a6   : > { %v4934_v46 = vpop.f32.mrf.mxu0  ;;  %v4977_v50 = vpop.f32.mrf.mxu1 }
 0x9a7   : > { %v4935_v52 = vadd.f32 %v4934_v46, %v4892_v26 }
 0x9a8   : > { %v4936_v55 = vpop.f32.mrf.mxu0  ;;  %v4979_v56 = vpop.f32.mrf.mxu1 }
 0x9a9   : > { %v4978_v30 = vadd.f32 %v4977_v50, %v4935_v52  ;;  %v4937_v29 = vadd.f32 %v4936_v55, %v4894_v51 }
 0x9aa   : > { %v4938_v57 = vpop.f32.mrf.mxu0  ;;  %v4981_v41 = vpop.f32.mrf.mxu1 }
 0x9ab   : > { %v4986_v58 = vadd.f32 %v4978_v30, %v7096_v9  ;;  %v4980_v20 = vadd.f32 %v4979_v56, %v4937_v29  ;;  %v4939_v60 = vadd.f32 %v4938_v57, %v4896_v42 }
 0x9ac   : > { %v4940_v43 = vpop.f32.mrf.mxu0  ;;  %v4983_v0 = vpop.f32.mrf.mxu1 }
 0x9ad   : > { %4990 = vst [vmem:[%s705_s26] sm:$0xff] %v4986_v58  ;;  %v4987_v61 = vadd.f32 %v4980_v20, %v7099_v11  ;;  %v4982_v62 = vadd.f32 %v4981_v41, %v4939_v60  ;;  %v4941_v63 = vadd.f32 %v4940_v43, %v4898_v59 }
 0x9af   : > { %4991 = vst [vmem:[%s705_s26 + $0x8] sm:$0xff] %v4987_v61  ;;  %v4988_v9 = vadd.f32 %v4982_v62, %v7104_v17  ;;  %v4984_v1 = vadd.f32 %v4983_v0, %v4941_v63 }
 0x9b1   : > { %4992 = vst [vmem:[%s705_s26 + $0x10] sm:$0xff] %v4988_v9  ;;  %v4989_v11 = vadd.f32 %v4984_v1, %v7107_v21 }
 0x9b3   : > { %4993 = vst [vmem:[%s705_s26 + $0x18] sm:$0xff] %v4989_v11 }
 0x9b4   : > { %6424 = shalt.err (!%p6421_p13)
}
 0x9b5   : > { %s6425_s20 = scalar_lea.hbm %s7188_s2, 512  ;;  %s6429_s26 = scalar_lea.hbm %s7305_s23, 1024 }
 0x9b6   : > { %p6426_p5 = scmp.ne.s32.totalorder %s7188_s2, %s6425_s20  ;;  %p6430_p9 = scmp.lt.s32.totalorder %s7188_s2, %s7305_s23 }
 0x9b7   : > { %p6431_p11 = scmp.lt.s32.totalorder %s6429_s26, %s6425_s20 }
 0x9b8   : > { %p6427_p0 = pnand %p6426_p5, %p7306_p4 }
 0x9b9   : > { %p6432_p12 = por %p6431_p11, %p6430_p9 }
 0x9ba   : > { %p6428_p2 = pneg %p6427_p0 }
 0x9bc   : > { %p6433_p10 = pnand %p6432_p12, %p6428_p2 }
 0x9be   : > { %6436 = shalt.err (!%p6433_p10)
}
 0x9bf   : > { %s6514_s24 = smov 256   ;;  %s6515_s4 = smov 16  }
 0x9c0   : > { %5657 = dma.vmem_to_hbm [thread:$0]  (%p7306_p4), %s7182_s17, 512, %s7188_s2, %s4995_s1, %s6514_s24, %s6514_s24, %s6515_s4  }
 0x9c1 PF: > { %s5023_s8 = sand.u32 1, %s6479_s27   ;;  %p7307_p7 = scmp.ne.s32.totalorder %s7290_s0, 0 }
 0x9c2   : > { %p7308_p8 = scmp.ge.s32.totalorder %s6491_s30, 2  ;;  %s5024_s10 = scalar_lea.sflag [#allocation4], %s5023_s8 }
 0x9c4   : > { %p5689_p1 = pnand %p7308_p8, %p7307_p7 }
 0x9c6   : > { %p5690_p3 = pneg %p5689_p1 }
 0x9c8   : > { %6474 = dma.done.wait (%p5690_p3), %s5024_s10, 512  }
 0x9c9   : > { %6476 = vsyncadd (%p5690_p3), %s5024_s10, 4294966784  ;;  %s7309_s14 = sld [smem:[#allocation24_spill]]  ;;  %p35_p6 = scmp.ge.s32.totalorder %s6743_s25, 4  }
 0x9ca   : > { %s7310_s27 = smov %s6483_s28  ;;  %s7311_s28 = smov %s6487_s29 }
 0x9cb   : > { %s7313_s30 = smov %s6743_s25  ;;  %37 = sbr.rel (!%p35_p6) target bundleno = 22 (0x16), region = 169 }
 0x9cf   : > { %s7312_s29 = smov %s7309_s14 }
 0x9d0   :  { %5029 = vsyncpa [#allocation3], 1 }
 0x9d1   :  { %5031 = vsyncpa [#allocation3 + $0x1], 1 }
 0x9d2   :  { %5032 = vsyncpa [#allocation6], 1 }
 0x9d3   :  { %5033 = vsyncpa [#allocation9], 1 }
 0x9d4   :  { %5034 = vsyncpa [#allocation12], 1 }
 0x9d5   :  { %5035 = vsyncpa [#allocation15], 1 }
 0x9d6   :  { %5036 = vsyncpa [#allocation4], 1 }
 0x9d7   :  { %5038 = vsyncpa [#allocation4 + $0x1], 1 }

</bundles_post_ra>
